<compile_context>
chip_gen: v7x
topology: tpu7x:2x2x1
jax: 0.10.0
libtpu: 0.0.40
codegen_flags: <defaults>
</compile_context>

<pallas_src>
import jax
import jax.numpy as jnp
from jax.experimental import pallas as pl
from jax.experimental.pallas import tpu as pltpu


# ----------------------------------------------------------------------------
# Pallas kernel
# ----------------------------------------------------------------------------

def _ripple_kernel(x_ref, w0_ref, w1_ref, b1_ref, b0_ref, o_ref):
    x = x_ref[...]                        # (TB, IN)
    w0 = w0_ref[...]                      # (IN, OUT)
    w1 = w1_ref[...]                      # (IN, OUT)
    b1 = b1_ref[...]                      # (IN, OUT)
    b0 = b0_ref[...]                      # (1, OUT)
    # arg[b, i, o] = w1[i, o] * x[b, i] + b1[i, o]   -> OUT stays on the lane dim
    arg = w1[None, :, :] * x[:, :, None] + b1[None, :, :]    # (TB, IN, OUT)
    s = jnp.sin(arg)                                          # EUP transcendental
    y = jnp.sum(w0[None, :, :] * s, axis=1) + b0              # (TB, OUT)
    o_ref[...] = y.astype(o_ref.dtype)


def ripple_linear(x, w0t, w1t, b1t, b0, *, block_rows=None,
                  vmem_budget_bytes=8 * 1024 * 1024):
    """y = sum_i W0[o,i] * sin(W1[o,i]*x[...,i] + B1[o,i]) + B0[o].

    w0t, w1t, b1t are stored pre-transposed as (in_features, out_features);
    b0 is (out_features,). Works for any number of leading dims on x.
    """
    in_features, out_features = w0t.shape
    assert x.shape[-1] == in_features
    lead = x.shape[:-1]
    x2d = x.reshape(-1, in_features)
    n = x2d.shape[0]

    if block_rows is None:
        # f32 intermediates per row: arg + sin + product  ~ 3 * IN * OUT * 4 bytes
        per_row = in_features * out_features * 4 * 3
        block_rows = max(8, min(1024, (vmem_budget_bytes // max(per_row, 1)) // 8 * 8))
        if n > 8:
            # prefer >= 2 grid steps so the parallel axis can shard across 2 TCs (v7x)
            block_rows = min(block_rows, max(8, ((pl.cdiv(n, 2) + 7) // 8) * 8))
    block_rows = max(8, (block_rows // 8) * 8)

    n_pad = pl.cdiv(n, block_rows) * block_rows
    if n_pad != n:
        x2d = jnp.pad(x2d, ((0, n_pad - n), (0, 0)))

    out = pl.pallas_call(
        _ripple_kernel,
        out_shape=jax.ShapeDtypeStruct((n_pad, out_features), x.dtype),
        grid=(n_pad // block_rows,),
        in_specs=[
            pl.BlockSpec((block_rows, in_features), lambda i: (i, 0)),
            # weights: constant block index -> stay VMEM-resident across the grid
            pl.BlockSpec((in_features, out_features), lambda i: (0, 0)),
            pl.BlockSpec((in_features, out_features), lambda i: (0, 0)),
            pl.BlockSpec((in_features, out_features), lambda i: (0, 0)),
            pl.BlockSpec((1, out_features), lambda i: (0, 0)),
        ],
        out_specs=pl.BlockSpec((block_rows, out_features), lambda i: (i, 0)),
        compiler_params=pltpu.CompilerParams(dimension_semantics=("parallel",)),
    )(x2d, w0t, w1t, b1t, b0.reshape(1, out_features))

    return out[:n].reshape(*lead, out_features)


# ----------------------------------------------------------------------------
# Parameter packing (PyTorch layout -> kernel layout), done once, not per call
# ----------------------------------------------------------------------------

def pack_trigo_params(weight, bias):
    """weight: (OUT, IN, 2), bias: (OUT, IN+1)  ->  (IN,OUT)x3 + (OUT,)."""
    w0t = jnp.transpose(weight[:, :, 0])   # (IN, OUT)
    w1t = jnp.transpose(weight[:, :, 1])   # (IN, OUT)
    b1t = jnp.transpose(bias[:, 1:])       # (IN, OUT)
    b0 = bias[:, 0]                        # (OUT,)
    return w0t, w1t, b1t, b0


def trigo_linear(x, weight, bias):
    """Forward pass matching TrigoLinear.forward (bias required)."""
    return ripple_linear(x, *pack_trigo_params(weight, bias))
    # TODO(synk): bias=False variant (register_parameter None) not exercised here;
    # it would simply drop b0 and b1 (pass zeros).


# ----------------------------------------------------------------------------
# Pure-JAX reference (mirrors the PyTorch ripple_linear exactly)
# ----------------------------------------------------------------------------

def ripple_linear_ref(x, weight, bias):
    w0 = weight[:, :, 0]                   # (OUT, IN)
    w1 = weight[:, :, 1]                   # (OUT, IN)
    b1 = bias[:, 1:]                       # (OUT, IN)
    b0 = bias[:, 0]                        # (OUT,)
    x2d = x.reshape(-1, x.shape[-1])       # (N, IN)
    arg = w1[None, :, :] * x2d[:, None, :] + b1[None, :, :]   # (N, OUT, IN)
    y = jnp.sum(w0[None, :, :] * jnp.sin(arg), axis=-1) + b0  # (N, OUT)
    return y.reshape(*x.shape[:-1], w0.shape[0])


# ----------------------------------------------------------------------------
# Main
# ----------------------------------------------------------------------------

if __name__ == "__main__":
    bs, seq, in_features, out_features = 2, 8, 32, 64

    key = jax.random.PRNGKey(0)
    kx, kw, kb = jax.random.split(key, 3)

    x = jax.random.normal(kx, (bs, seq, in_features), jnp.float32)

    # deterministic init in the spirit of kaiming_uniform_(a=sqrt(5)) / uniform bias
    bound = 1.0 / (in_features ** 0.5)
    weight = jax.random.uniform(kw, (out_features, in_features, 2), jnp.float32,
                                minval=-bound, maxval=bound)
    bias = jax.random.uniform(kb, (out_features, in_features + 1), jnp.float32,
                              minval=-bound, maxval=bound)

    # Pack params once (layout plumbing), then run the fused Pallas kernel.
    w0t, w1t, b1t, b0 = pack_trigo_params(weight, bias)
    y = ripple_linear(x, w0t, w1t, b1t, b0, block_rows=8)   # grid=(2,) -> 2 TCs on v7x
    y = jax.block_until_ready(y)

    # Correctness vs. pure-JAX reference.
    y_ref = ripple_linear_ref(x, weight, bias)
    assert y.shape == (bs, seq, out_features)
    assert bool(jnp.all(jnp.isfinite(y)))
    max_err = float(jnp.max(jnp.abs(y - y_ref)))
    assert max_err < 1e-2, f"max abs error {max_err}"

    print("KERNEL_OK")
</pallas_src>

<mosaic_0001>
module attributes {stable_mosaic.version = 11 : i64} {
  func.func @_ripple_kernel(%arg0: i32, %arg1: memref<8x32xf32, #tpu.memory_space<vmem>>, %arg2: memref<32x64xf32, #tpu.memory_space<vmem>>, %arg3: memref<32x64xf32, #tpu.memory_space<vmem>>, %arg4: memref<32x64xf32, #tpu.memory_space<vmem>>, %arg5: memref<1x64xf32, #tpu.memory_space<vmem>>, %arg6: memref<8x64xf32, #tpu.memory_space<vmem>>) attributes {dimension_semantics = [#tpu.dimension_semantics<parallel>], iteration_bounds = array<i64: 2>, scalar_prefetch = 0 : i64, scratch_operands = 0 : i64, tpu.core_type = #tpu.core_type<tc>, window_params = [{transform_indices = @transform_0, window_bounds = array<i64: 8, 32>}, {pipeline_mode = #tpu.pipeline_mode<synchronous>, transform_indices = @transform_1, window_bounds = array<i64: 32, 64>}, {pipeline_mode = #tpu.pipeline_mode<synchronous>, transform_indices = @transform_2, window_bounds = array<i64: 32, 64>}, {pipeline_mode = #tpu.pipeline_mode<synchronous>, transform_indices = @transform_3, window_bounds = array<i64: 32, 64>}, {pipeline_mode = #tpu.pipeline_mode<synchronous>, transform_indices = @transform_4, window_bounds = array<i64: 1, 64>}, {transform_indices = @transform_5, window_bounds = array<i64: 8, 64>}]} {
    %c0 = arith.constant 0 : index
    %c0_0 = arith.constant 0 : index
    %0 = vector.load %arg1[%c0, %c0_0] : memref<8x32xf32, #tpu.memory_space<vmem>>, vector<8x32xf32>
    %c0_1 = arith.constant 0 : index
    %c0_2 = arith.constant 0 : index
    %1 = vector.load %arg2[%c0_1, %c0_2] : memref<32x64xf32, #tpu.memory_space<vmem>>, vector<32x64xf32>
    %c0_3 = arith.constant 0 : index
    %c0_4 = arith.constant 0 : index
    %2 = vector.load %arg3[%c0_3, %c0_4] : memref<32x64xf32, #tpu.memory_space<vmem>>, vector<32x64xf32>
    %c0_5 = arith.constant 0 : index
    %c0_6 = arith.constant 0 : index
    %3 = vector.load %arg4[%c0_5, %c0_6] : memref<32x64xf32, #tpu.memory_space<vmem>>, vector<32x64xf32>
    %c0_7 = arith.constant 0 : index
    %c0_8 = arith.constant 0 : index
    %4 = vector.load %arg5[%c0_7, %c0_8] : memref<1x64xf32, #tpu.memory_space<vmem>>, vector<1x64xf32>
    %5 = vector.shape_cast %2 : vector<32x64xf32> to vector<1x32x64xf32>
    %6 = vector.shape_cast %0 : vector<8x32xf32> to vector<8x32x1xf32>
    %7 = vector.broadcast %5 : vector<1x32x64xf32> to vector<8x32x64xf32>
    %8 = vector.broadcast %6 : vector<8x32x1xf32> to vector<8x32x64xf32>
    %9 = arith.mulf %7, %8 : vector<8x32x64xf32>
    %10 = vector.shape_cast %3 : vector<32x64xf32> to vector<1x32x64xf32>
    %11 = vector.broadcast %10 : vector<1x32x64xf32> to vector<8x32x64xf32>
    %12 = arith.addf %9, %11 : vector<8x32x64xf32>
    %13 = math.sin %12 : vector<8x32x64xf32>
    %14 = vector.shape_cast %1 : vector<32x64xf32> to vector<1x32x64xf32>
    %15 = vector.broadcast %14 : vector<1x32x64xf32> to vector<8x32x64xf32>
    %16 = arith.mulf %15, %13 : vector<8x32x64xf32>
    %cst = arith.constant dense<0.000000e+00> : vector<8x64xf32>
    %17 = vector.multi_reduction <add>, %16, %cst [1] : vector<8x32x64xf32> to vector<8x64xf32>
    %18 = vector.broadcast %4 : vector<1x64xf32> to vector<8x64xf32>
    %19 = arith.addf %17, %18 : vector<8x64xf32>
    %c0_9 = arith.constant 0 : index
    %c0_10 = arith.constant 0 : index
    %20 = vector.load %arg6[%c0_9, %c0_10] : memref<8x64xf32, #tpu.memory_space<vmem>>, vector<8x64xf32>
    tpu.vector_store %arg6[%c0_9, %c0_10], %19 {strides = array<i32>} : memref<8x64xf32, #tpu.memory_space<vmem>>, vector<8x64xf32>,
    return
  }
  func.func @transform_0(%arg0: i32) -> (i32, i32) {
    %c0_i32 = arith.constant 0 : i32
    %c0_i32_0 = arith.constant 0 : i32
    return %arg0, %c0_i32 : i32, i32
  }
  func.func @transform_1(%arg0: i32) -> (i32, i32) {
    %c0_i32 = arith.constant 0 : i32
    %c0_i32_0 = arith.constant 0 : i32
    %c0_i32_1 = arith.constant 0 : i32
    return %c0_i32, %c0_i32_0 : i32, i32
  }
  func.func @transform_2(%arg0: i32) -> (i32, i32) {
    %c0_i32 = arith.constant 0 : i32
    %c0_i32_0 = arith.constant 0 : i32
    %c0_i32_1 = arith.constant 0 : i32
    return %c0_i32, %c0_i32_0 : i32, i32
  }
  func.func @transform_3(%arg0: i32) -> (i32, i32) {
    %c0_i32 = arith.constant 0 : i32
    %c0_i32_0 = arith.constant 0 : i32
    %c0_i32_1 = arith.constant 0 : i32
    return %c0_i32, %c0_i32_0 : i32, i32
  }
  func.func @transform_4(%arg0: i32) -> (i32, i32) {
    %c0_i32 = arith.constant 0 : i32
    %c0_i32_0 = arith.constant 0 : i32
    %c0_i32_1 = arith.constant 0 : i32
    return %c0_i32, %c0_i32_0 : i32, i32
  }
  func.func @transform_5(%arg0: i32) -> (i32, i32) {
    %c0_i32 = arith.constant 0 : i32
    %c0_i32_0 = arith.constant 0 : i32
    return %arg0, %c0_i32 : i32, i32
  }
}

</mosaic_0001>

<bundles_post_ra>
// kernel: tpu_custom_call.1
= control target key start
LH: loop header
LB: loop body
LE: loop exit
PB: predicated region body
PF: predicated region fallthrough
CT: control target
= control target key end

     0   :  { %10 = vsyncpa [#allocation3], 0  ;;  %s9596_s0 = inlined_call_operand.hbm [shape: f32[16,32], index: 0, kind: input, shape index: {}]   ;;  %s9597_s1 = inlined_call_operand.hbm [shape: f32[32,64], index: 1, kind: input, shape index: {}]   ;;  %s9598_s2 = inlined_call_operand.hbm [shape: f32[32,64], index: 2, kind: input, shape index: {}]   ;;  %s9599_s3 = inlined_call_operand.hbm [shape: f32[32,64], index: 3, kind: input, shape index: {}]   ;;  %s9600_s4 = inlined_call_operand.vmem [shape: f32[1,64], index: 4, kind: input, shape index: {}]   ;;  %s9601_s5 = inlined_call_operand.hbm [shape: f32[16,64], index: 5, kind: output, shape index: {}]  }
   0x1   :  { %12 = vsyncpa [#allocation3 + $0x1], 0 }
   0x2   :  { %13 = vsyncpa [#allocation6], 0 }
   0x3   :  { %14 = vsyncpa [#allocation9], 0 }
   0x4   :  { %15 = vsyncpa [#allocation4], 0 }
   0x5   :  { %17 = vsyncpa [#allocation4 + $0x1], 0  ;;  %s4891_s18 = smov 0   ;;  %s4893_s19 = smov 0  }
   0x6   :  { %s4895_s20 = smov 0   ;;  %s4897_s21 = smov 0  }
   0x7 LB: > { %s4912_s22 = sadd.s32 4294967295, %s4846_s21   ;;  %s4137_s23 = sadd.s32 4294967294, %s4846_s21   ;;  %s4846_s21 = sphi %s4897_s21, %s9897_s21   ;;  %s4842_s20 = sphi %s4895_s20, %s9896_s20   ;;  %s4838_s19 = sphi %s4893_s19, %s9895_s19   ;;  %s4834_s18 = sphi %s4891_s18, %s9894_s18  }
   0x8   : > { %p43_p0 = scmp.ne.s32.totalorder %s4838_s19, %s4834_s18  ;;  %p9602_p1 = scmp.eq.s32.totalorder %s4912_s22, 0 }
   0x9   : > { %p157_p3 = scmp.eq.s32.totalorder %s4137_s23, 1  ;;  %p4138_p5 = scmp.ge.s32.totalorder %s4846_s21, 1 }
   0xa   : > { %p4921_p4 = por %p9602_p1, %p43_p0  ;;  %p164_p7 = scmp.lt.s32.totalorder %s4846_s21, 3 }
   0xb   : > { %p4926_p6 = por %p157_p3, %p43_p0  ;;  %s4848_s27 = smov [#allocation5]  }
   0xc   : > { %s9681_s24 = scalar_select %p4921_p4, 1, 0 }
   0xd   : > { %s9682_s25 = scalar_select %p4926_p6, 1, 0 }
   0xe   : > { %p4931_p8 = pnand %p4138_p5, %p164_p7  ;;  %s176_s28 = sshll.u32 %s4848_s27, 4  ;;  %s4935_s28 = int_to_ptr.vmem [resolvable:$true] %s176_s28 }
   0xf   : > { %s4849_s30 = smov [#allocation7]   ;;  %s4850_s7 = smov [#allocation8]  }
  0x10   : > { %s9683_s26 = scalar_select %p4931_p8, 1, 0 }
  0x11   : > { %p4428_p9 = pneg %p4931_p8  ;;  %s189_s6 = sshll.u32 %s4849_s30, 4  ;;  %s4946_s6 = int_to_ptr.vmem [resolvable:$true] %s189_s6 }
  0x12   : > { %s4948_s8 = sshll.u32 %s4850_s7, 4  ;;  %s4658_s11 = scalar_lea.hbm %s9597_s1, 512  ;;  %s203_s8 = int_to_ptr.vmem [resolvable:$true] %s4948_s8 }
  0x13   : > { %p4942_p11 = pnand %p4428_p9, %p9602_p1  ;;  %p4659_p12 = scmp.ne.s32.totalorder %s9597_s1, %s4658_s11 }
  0x14   : > { %p4665_p5 = scmp.lt.u32.totalorder %s4658_s11, %s9597_s1 }
  0x15   : > { %p4958_p13 = pneg %p4942_p11 }
  0x17   : > { %p4661_p0 = pnand %p4958_p13, %p4659_p12 }
  0x19   : > { %p4662_p3 = pneg %p4661_p0 }
  0x1b   : > { %p4667_p7 = pnand %p4665_p5, %p4662_p3 }
  0x1d   : > { %4670 = shalt.err (!%p4667_p7)
}
  0x1e   : > { %s4671_s17 = scalar_lea.vmem %s4935_s28, 512  ;;  %p4679_p2 = scmp.lt.s32.totalorder %s4935_s28, %s4935_s28 }
  0x1f   : > { %p4672_p9 = scmp.ne.s32.totalorder %s4935_s28, %s4671_s17  ;;  %p4680_p6 = scmp.lt.s32.totalorder %s4671_s17, %s4671_s17 }
  0x21   : > { %p4674_p10 = pnand %p4672_p9, %p4958_p13  ;;  %p4681_p12 = por %p4680_p6, %p4679_p2 }
  0x23   : > { %p4675_p1 = pneg %p4674_p10 }
  0x25   : > { %p4682_p0 = pnand %p4681_p12, %p4675_p1 }
  0x27   : > { %4685 = shalt.err (!%p4682_p0)
}
  0x28   : > { %s4851_s23 = smov 128   ;;  %s4852_s27 = smov 8  }
  0x29   : > { %4431 = dma.hbm_to_vmem [thread:$0]  (!%p4942_p11), %s9597_s1, 512, %s4935_s28, [#allocation6], %s4851_s23, %s4851_s23, %s4852_s27  }
  0x2a   : > { %s4686_s11 = scalar_lea.hbm %s9598_s2, 512 }
  0x2b   : > { %p4687_p1 = scmp.ne.s32.totalorder %s9598_s2, %s4686_s11  ;;  %p4693_p10 = scmp.lt.u32.totalorder %s4686_s11, %s9598_s2 }
  0x2d   : > { %p4689_p2 = pnand %p4687_p1, %p4958_p13 }
  0x2f   : > { %p4690_p6 = pneg %p4689_p2 }
  0x31   : > { %p4695_p3 = pnand %p4693_p10, %p4690_p6 }
  0x33   : > { %4698 = shalt.err (!%p4695_p3)
}
  0x34   : > { %s4699_s28 = scalar_lea.vmem %s4946_s6, 512  ;;  %p4707_p12 = scmp.lt.s32.totalorder %s4946_s6, %s4946_s6 }
  0x35   : > { %p4700_p5 = scmp.ne.s32.totalorder %s4946_s6, %s4699_s28  ;;  %p4708_p0 = scmp.lt.s32.totalorder %s4699_s28, %s4699_s28 }
  0x37   : > { %p4702_p7 = pnand %p4700_p5, %p4958_p13  ;;  %p4709_p1 = por %p4708_p0, %p4707_p12 }
  0x39   : > { %p4703_p9 = pneg %p4702_p7 }
  0x3b   : > { %p4710_p2 = pnand %p4709_p1, %p4703_p9 }
  0x3d   : > { %4713 = shalt.err (!%p4710_p2)
}
  0x3e   : > { %4434 = dma.hbm_to_vmem [thread:$0]  (!%p4942_p11), %s9598_s2, 512, %s4946_s6, [#allocation6], %s4851_s23, %s4851_s23, %s4852_s27  }
  0x3f   : > { %s4714_s10 = scalar_lea.hbm %s9599_s3, 512 }
  0x40   : > { %p4715_p6 = scmp.ne.s32.totalorder %s9599_s3, %s4714_s10  ;;  %p4721_p5 = scmp.lt.u32.totalorder %s4714_s10, %s9599_s3 }
  0x42   : > { %p4717_p10 = pnand %p4715_p6, %p4958_p13 }
  0x44   : > { %p4718_p3 = pneg %p4717_p10 }
  0x46   : > { %p4723_p7 = pnand %p4721_p5, %p4718_p3 }
  0x48   : > { %4726 = shalt.err (!%p4723_p7)
}
  0x49   : > { %s4727_s16 = scalar_lea.vmem %s203_s8, 512  ;;  %p4735_p1 = scmp.lt.s32.totalorder %s203_s8, %s203_s8 }
  0x4a   : > { %p4728_p9 = scmp.ne.s32.totalorder %s203_s8, %s4727_s16  ;;  %p4736_p2 = scmp.lt.s32.totalorder %s4727_s16, %s4727_s16 }
  0x4c   : > { %p4730_p12 = pnand %p4728_p9, %p4958_p13  ;;  %p4737_p4 = por %p4736_p2, %p4735_p1 }
  0x4e   : > { %p4731_p0 = pneg %p4730_p12 }
  0x50   : > { %p4738_p8 = pnand %p4737_p4, %p4731_p0 }
  0x52   : > { %4741 = shalt.err (!%p4738_p8)
}
  0x53   : > { %4437 = dma.hbm_to_vmem [thread:$0]  (!%p4942_p11), %s9599_s3, 512, %s203_s8, [#allocation9], %s4851_s23, %s4851_s23, %s4852_s27  }
  0x54   : > { %s5031_s14 = sadd.s32 1, %s4846_s21   ;;  %s30_s17 = sadd.s32 1, %s4842_s20 }
  0x55   : > { %s27_s29 = ssub.s32 %s4846_s21, %s5031_s14  ;;  %p37_p8 = scmp.ne.s32.totalorder %s4842_s20, %s4838_s19 }
  0x56   : > { %p28_p4 = scmp.eq.s32.totalorder %s27_s29, 0  ;;  %p38_p13 = scmp.eq.s32.totalorder %s4846_s21, 0 }
  0x57   : > { %p4449_p6 = scmp.lt.s32.totalorder %s4846_s21, 2  ;;  %p9686_p3 = scmp.eq.s32.totalorder %s4912_s22, 1 }
  0x58   : > { %s5041_s30 = scalar_select %p28_p4, %s4842_s20, %s30_s17  }
  0x59   : > { %p39_p10 = por %p38_p13, %p37_p8  ;;  %p5045_p5 = por %p9686_p3, %p37_p8 }
  0x5a   : > { %s219_s9 = sand.u32 1, %s4842_s20   ;;  %s4144_s10 = sshll.u32 %s4846_s21, 7 }
  0x5b   : > { %s4143_s8 = sshll.u32 %s219_s9, 3  ;;  %s5054_s11 = scalar_lea.hbm %s9596_s0, %s4144_s10 }
  0x5c   : > { %s223_s12 = scalar_lea.vmem [#allocation2], %s4143_s8  ;;  %p5056_p11 = pnand %p4449_p6, %p39_p10 }
  0x5d   : > { %s230_s13 = sshll.u32 %s223_s12, 4  ;;  %s220_s16 = scalar_lea.sflag [#allocation3], %s219_s9  ;;  %s5060_s13 = int_to_ptr.vmem [resolvable:$true] %s230_s13 }
  0x5e   : > { %s4742_s6 = scalar_lea.hbm %s5054_s11, 128  ;;  %p4744_p9 = pneg %p5056_p11 }
  0x5f   : > { %p4743_p7 = scmp.ne.s32.totalorder %s5054_s11, %s4742_s6  ;;  %s4747_s17 = scalar_lea.hbm %s9596_s0, 256 }
  0x60   : > { %p4748_p1 = scmp.lt.u32.totalorder %s5054_s11, %s9596_s0  ;;  %p4749_p2 = scmp.lt.u32.totalorder %s4747_s17, %s4742_s6 }
  0x61   : > { %p4745_p12 = pnand %p4744_p9, %p4743_p7  ;;  %p4751_p8 = scmp.lt.u32.totalorder %s4742_s6, %s5054_s11 }
  0x62   : > { %p4750_p4 = por %p4749_p2, %p4748_p1 }
  0x63   : > { %p4746_p0 = pneg %p4745_p12 }
  0x64   : > { %p4752_p13 = por %p4751_p8, %p4750_p4 }
  0x66   : > { %p4753_p6 = pnand %p4752_p13, %p4746_p0 }
  0x68   : > { %4756 = shalt.err (!%p4753_p6)
}
  0x69   : > { %s4757_s9 = scalar_lea.vmem %s5060_s13, 128  ;;  %s4853_s23 = smov [#allocation2]  }
  0x6a   : > { %p4758_p10 = scmp.ne.s32.totalorder %s5060_s13, %s4757_s9  ;;  %s4762_s27 = sshll.u32 %s4853_s23, 4  ;;  %s4763_s27 = int_to_ptr.vmem [resolvable:$false] %s4762_s27 }
  0x6b   : > { %s4764_s12 = scalar_lea.vmem %s4763_s27, 256  ;;  %p4765_p12 = scmp.lt.s32.totalorder %s5060_s13, %s4763_s27 }
  0x6c   : > { %p4760_p3 = pnand %p4758_p10, %p4744_p9  ;;  %p4766_p1 = scmp.lt.s32.totalorder %s4764_s12, %s4757_s9 }
  0x6e   : > { %p4761_p7 = pneg %p4760_p3  ;;  %p4767_p2 = por %p4766_p1, %p4765_p12 }
  0x70   : > { %p4768_p4 = pnand %p4767_p2, %p4761_p7 }
  0x72   : > { %4771 = shalt.err (!%p4768_p4)
}
  0x73   : > { %4441 = dma.hbm_to_vmem [thread:$0]  (!%p5056_p11), %s5054_s11, 128, %s5060_s13, %s220_s16  }
  0x74   : > { %p9689_p0 = scmp.ne.s32.totalorder %s9683_s26, 0 }
  0x76   : > { %239 = sbr.rel (%p9689_p0) target bundleno = 1141 (0x475), region = 40 }
  0x7d   : > { %s5090_s6 = sand.u32 1, %s4838_s19   ;;  %p9690_p9 = scmp.ne.s32.totalorder %s9681_s24, 0 }
  0x7e   : > { %s4146_s28 = sshll.u32 %s5090_s6, 3  ;;  %s242_s29 = scalar_lea.sflag [#allocation3], %s5090_s6 }
  0x7f   : > { %s245_s17 = scalar_lea.vmem [#allocation2], %s4146_s28 }
  0x80   : > { %4817 = dma.done.wait (%p9690_p9), %s242_s29, 128  }
  0x81   : > { %4819 = vsyncadd (%p9690_p9), %s242_s29, 4294967168  ;;  %p9691_p11 = scmp.eq.s32.totalorder %s4912_s22, 0 }
  0x83   : > { %4821 = dma.done.wait (%p9691_p11), [#allocation6], 1024   ;;  %p9692_p8 = pmov %p9691_p11 }
  0x85   : > { %4823 = vsyncadd (%p9692_p8), [#allocation6], 4294966272  ;;  %p9693_p13 = pmov %p9692_p8 }
  0x86   : > { %p9694_p6 = pmov %p9692_p8 }
  0x87   : > { %4825 = dma.done.wait (%p9693_p13), [#allocation9], 512  }
  0x88   : > { %4827 = vsyncadd (%p9694_p6), [#allocation9], 4294966784  ;;  %v298_v0 = vlaneseq  ;;  %v284_v4 = vld [vmem:[%s245_s17] sm:$0xff]  ;;  %v5108_v19 = vld [vmem:[#allocation7] sm:$0xff]  ;;  %v9608_v50 = vmov 1326507024  }
  0x89   : > { %v5111_v23 = vld [vmem:[#allocation8] sm:$0xff]  ;;  %v5122_v35 = vld [vmem:[#allocation7 + $0x8] sm:$0xff]  ;;  %v9616_v53 = vmov 2475754826   ;;  %v9612_v55 = vmov 920167782  }
  0x8a   : > { %v299_v1 = vshrl.u32 %v298_v0, 7  ;;  %v5125_v39 = vld [vmem:[#allocation8 + $0x8] sm:$0xff]  ;;  %v9620_v58 = vmov 683565275   ;;  %v9618_v63 = vmov 2131351028  }
  0x8b   : > { %s4281_s11 = sshll.u32 %s4912_s22, 7  ;;  %s283_s13 = scalar_lea.vmem [#allocation10], %s4146_s28 }
  0x8c   : > { %v338_v2 = vsub.s32 2, %v299_v1  ;;  %v319_v3 = vsub.s32 1, %v299_v1  ;;  %v300_v7 = vsub.s32 0, %v299_v1  ;;  %v357_v9 = vsub.s32 3, %v299_v1  ;;  %s4038_s15 = sshll.u32 %s283_s13, 4  ;;  %s9551_s8 = scalar_lea.hbm %s9601_s5, %s4281_s11  ;;  %s9553_s15 = int_to_ptr.vmem [resolvable:$true] %s4038_s15 }
  0x8d   : > { %v376_v11 = vsub.s32 4, %v299_v1  ;;  %v395_v13 = vsub.s32 5, %v299_v1  ;;  %v414_v15 = vsub.s32 6, %v299_v1  ;;  %v433_v17 = vsub.s32 7, %v299_v1  ;;  %s4025_s22 = scalar_lea.sflag [#allocation4], %s5090_s6  ;;  %s4772_s9 = scalar_lea.vmem %s9553_s15, 128 }
  0x8e   : > { %v339_v5 = vrot.slane %v284_v4, %v338_v2  ;;  %v320_v6 = vrot.slane %v284_v4, %v319_v3  ;;  %v301_v8 = vrot.slane %v284_v4, %v300_v7  ;;  %v358_v10 = vrot.slane %v284_v4, %v357_v9  ;;  %p4773_p10 = scmp.ne.s32.totalorder %s9553_s15, %s4772_s9  ;;  %s4860_s23 = smov [#allocation10]  }
  0x8f   : > { %v377_v12 = vrot.slane %v284_v4, %v376_v11  ;;  %v396_v14 = vrot.slane %v284_v4, %v395_v13  ;;  %v415_v16 = vrot.slane %v284_v4, %v414_v15  ;;  %v434_v18 = vrot.slane %v284_v4, %v433_v17  ;;  %s4776_s27 = sshll.u32 %s4860_s23, 4  ;;  %s4777_s27 = int_to_ptr.vmem [resolvable:$false] %s4776_s27 }
  0x90   : > { %341 = vbcast.lane.b32.xlu1 %v339_v5, 256  ;;  %322 = vbcast.lane.b32.xlu0 %v320_v6, 256  ;;  %v9610_v1 = vmov 2102212464   ;;  %p4774_p3 = pnand %p4773_p10, %p5045_p5  ;;  %s4778_s12 = scalar_lea.vmem %s4777_s27, 256 }
  0x91   : > { %p4779_p12 = scmp.lt.s32.totalorder %s9553_s15, %s4777_s27  ;;  %p4780_p1 = scmp.lt.s32.totalorder %s4778_s12, %s4772_s9 }
  0x92   : > { %p4775_p7 = pneg %p4774_p3 }
  0x93   : > { %p4781_p2 = por %p4780_p1, %p4779_p12 }
  0x94   : > { %345 = vbcast.lane.b32.xlu1 %v339_v5, 264  ;;  %326 = vbcast.lane.b32.xlu0 %v320_v6, 264 }
  0x95   : > { %p4782_p4 = pnand %p4781_p2, %p4775_p7 }
  0x98   : > { %307 = vbcast.lane.b32.xlu1 %v301_v8, 264  ;;  %303 = vbcast.lane.b32.xlu0 %v301_v8, 256 }
  0x9c   : > { %360 = vbcast.lane.b32.xlu1 %v358_v10, 256  ;;  %330 = vbcast.lane.b32.xlu0 %v320_v6, 272 }
  0xa0   : > { %349 = vbcast.lane.b32.xlu1 %v339_v5, 272  ;;  %364 = vbcast.lane.b32.xlu0 %v358_v10, 264 }
  0xa4   : > { %383 = vbcast.lane.b32.xlu1 %v377_v12, 264  ;;  %379 = vbcast.lane.b32.xlu0 %v377_v12, 256 }
  0xa8   : > { %334 = vbcast.lane.b32.xlu1 %v320_v6, 280  ;;  %311 = vbcast.lane.b32.xlu0 %v301_v8, 272 }
  0xac   : > { %398 = vbcast.lane.b32.xlu1 %v396_v14, 256  ;;  %368 = vbcast.lane.b32.xlu0 %v358_v10, 272 }
  0xb0   : > { %353 = vbcast.lane.b32.xlu1 %v339_v5, 280  ;;  %402 = vbcast.lane.b32.xlu0 %v396_v14, 264 }
  0xb4   : > { %417 = vbcast.lane.b32.xlu1 %v415_v16, 256  ;;  %387 = vbcast.lane.b32.xlu0 %v377_v12, 272 }
  0xb8   : > { %315 = vbcast.lane.b32.xlu1 %v301_v8, 280  ;;  %421 = vbcast.lane.b32.xlu0 %v415_v16, 264 }
  0xbc   : > { %406 = vbcast.lane.b32.xlu1 %v396_v14, 272  ;;  %372 = vbcast.lane.b32.xlu0 %v358_v10, 280 }
  0xc0   : > { %440 = vbcast.lane.b32.xlu1 %v434_v18, 264  ;;  %436 = vbcast.lane.b32.xlu0 %v434_v18, 256 }
  0xc4   : > { %425 = vbcast.lane.b32.xlu1 %v415_v16, 272  ;;  %391 = vbcast.lane.b32.xlu0 %v377_v12, 280 }
  0xc8   : > { %444 = vbcast.lane.b32.xlu1 %v434_v18, 272  ;;  %410 = vbcast.lane.b32.xlu0 %v396_v14, 280 }
  0xcc   : > { %448 = vbcast.lane.b32.xlu1 %v434_v18, 280  ;;  %429 = vbcast.lane.b32.xlu0 %v415_v16, 280 }
 0x102   : > { %v342_v20 = vpop.permute.xlu1 %341  ;;  %v323_v22 = vpop.permute.xlu0 %322 }
 0x103   : > { %v458_v21 = vmul.f32 %v342_v20, %v5108_v19  ;;  %v454_v24 = vmul.f32 %v323_v22, %v5108_v19 }
 0x105   : > { %v5115_v25 = vadd.f32 %v458_v21, %v5111_v23  ;;  %v5118_v26 = vadd.f32 %v454_v24, %v5111_v23 }
 0x106   : > { %v346_v36 = vpop.permute.xlu1 %345 }
 0x107   : > { %v1349_v27 = vand.u32 2139095040, %v5115_v25  ;;  %v933_v28 = vand.u32 2139095040, %v5118_v26  ;;  %v459_v38 = vmul.f32 %v346_v36, %v5122_v35  ;;  %v1346_v44 = vand.u32 2147483647, %v5115_v25 }
 0x108   : > { %v930_v46 = vand.u32 2147483647, %v5118_v26 }
 0x109   : > { %v1350_v29 = vshrl.u32 %v1349_v27, 23  ;;  %v934_v30 = vshrl.u32 %v933_v28, 23  ;;  %v5128_v42 = vadd.f32 %v459_v38, %v5125_v39  ;;  %v5139_v49 = vand.u32 8388607, %v1346_v44 }
 0x10a   : > { %v5151_v57 = vand.u32 8388607, %v930_v46 }
 0x10b   : > { %v4183_v31 = vadd.s32 4294967169, %v1350_v29  ;;  %v4167_v32 = vadd.s32 4294967169, %v934_v30  ;;  %v1453_v47 = vand.u32 2139095040, %v5128_v42  ;;  %v327_v30 = vpop.permute.xlu0 %326 }
 0x10d   : > { %v1356_v33 = vadd.s32 1, %v4183_v31  ;;  %v940_v34 = vadd.s32 1, %v4167_v32  ;;  %v1454_v62 = vshrl.u32 %v1453_v47, 23  ;;  %v455_v47 = vmul.f32 %v327_v30, %v5122_v35 }
 0x10f   : > { %vm1357_vm0 = vcmp.gt.s32.totalorder %v1356_v33, 0  ;;  %vm941_vm1 = vcmp.gt.s32.totalorder %v940_v34, 0  ;;  %v4187_v29 = vadd.s32 4294967169, %v1454_v62 }
 0x110   : > { %v1358_v37 = vsel %vm1357_vm0, %v1356_v33, 0  ;;  %v942_v41 = vsel %vm941_vm1, %v940_v34, 0  ;;  %v1354_v34 = vor.u32 8388608, %v5139_v49 }
 0x111   : > { %v1360_v40 = vand.u32 31, %v1358_v37  ;;  %v944_v43 = vand.u32 31, %v942_v41  ;;  %v5143_v52 = vshrl.u32 %v1358_v37, 5  ;;  %v5155_v61 = vshrl.u32 %v942_v41, 5 }
 0x112   : > { %v1460_v49 = vadd.s32 1, %v4187_v29  ;;  %v1394_v62 = vshll.u32 %v1354_v34, 8 }
 0x113   : > { %v5131_v45 = vsub.s32 32, %v1360_v40  ;;  %v5135_v48 = vsub.s32 32, %v944_v43  ;;  %v1363_v59 = vshll.u32 %v9620_v58, %v1360_v40  ;;  %v1375_v60 = vshll.u32 %v9612_v55, %v1360_v40 }
 0x114   : > { %v1372_v3 = vshll.u32 %v9610_v1, %v1360_v40  ;;  %v1366_v5 = vshll.u32 %v9616_v53, %v1360_v40  ;;  %v1369_v6 = vshll.u32 %v9618_v63, %v1360_v40  ;;  %vm1381_vm2 = vcmp.lt.s32.totalorder %v5143_v52, 4 }
 0x115   : > { %v1376_v51 = vshrl.u32 %v9608_v50, %v5131_v45  ;;  %v1364_v54 = vshrl.u32 %v9616_v53, %v5131_v45  ;;  %v1373_v56 = vshrl.u32 %v9612_v55, %v5131_v45  ;;  %v1367_v0 = vshrl.u32 %v9618_v63, %v5131_v45 }
 0x116   : > { %v1370_v2 = vshrl.u32 %v9610_v1, %v5131_v45  ;;  %v957_v4 = vshrl.u32 %v9612_v55, %v5135_v48  ;;  %v960_v8 = vshrl.u32 %v9608_v50, %v5135_v48  ;;  %v956_v11 = vshll.u32 %v9610_v1, %v944_v43 }
 0x117   : > { %v1377_v7 = vor.u32 %v1376_v51, %v1375_v60  ;;  %v5168_v9 = vor.u32 %v1364_v54, %v1363_v59  ;;  %v1374_v10 = vor.u32 %v1373_v56, %v1372_v3  ;;  %v948_v12 = vshrl.u32 %v9616_v53, %v5135_v48 }
 0x118   : > { %v951_v13 = vshrl.u32 %v9618_v63, %v5135_v48  ;;  %v954_v14 = vshrl.u32 %v9610_v1, %v5135_v48  ;;  %v959_v15 = vshll.u32 %v9612_v55, %v944_v43  ;;  %v1368_v16 = vor.u32 %v1367_v0, %v1366_v5 }
 0x119   : > { %v1371_v17 = vor.u32 %v1370_v2, %v1369_v6  ;;  %v947_v18 = vshll.u32 %v9620_v58, %v944_v43  ;;  %v958_v20 = vor.u32 %v957_v4, %v956_v11  ;;  %v1391_v21 = vsel %vm1381_vm2, %v1377_v7, 1326507024 }
 0x11a   : > { %v950_v22 = vshll.u32 %v9616_v53, %v944_v43  ;;  %v953_v24 = vshll.u32 %v9618_v63, %v944_v43  ;;  %v961_v27 = vor.u32 %v960_v8, %v959_v15  ;;  %vm1378_vm3 = vcmp.lt.s32.totalorder %v5143_v52, 1 }
 0x11b   : > { %vm1380_vm4 = vcmp.lt.s32.totalorder %v5143_v52, 3  ;;  %v1387_v28 = vsel %vm1381_vm2, %v1374_v10, 920167782  ;;  %v949_v31 = vor.u32 %v948_v12, %v947_v18  ;;  %vm965_vm5 = vcmp.lt.s32.totalorder %v5155_v61, 4 }
 0x11c   : > { %v952_v32 = vor.u32 %v951_v13, %v950_v22  ;;  %v955_v33 = vor.u32 %v954_v14, %v953_v24  ;;  %v1390_v36 = vsel %vm1378_vm3, %v1368_v16, %v1371_v17  ;;  %v1392_v37 = vsel %vm1380_vm4, %v1374_v10, %v1391_v21 }
 0x11d   : > { %v971_v38 = vsel %vm965_vm5, %v958_v20, 920167782  ;;  %v1386_v40 = vsel %vm1378_vm3, %v5168_v9, %v1368_v16  ;;  %v1388_v41 = vsel %vm1380_vm4, %v1371_v17, %v1387_v28  ;;  %v975_v43 = vsel %vm965_vm5, %v961_v27, 1326507024 }
 0x11e   : > { %vm1379_vm6 = vcmp.lt.s32.totalorder %v5143_v52, 2  ;;  %vm962_vm7 = vcmp.lt.s32.totalorder %v5155_v61, 1  ;;  %vm964_vm8 = vcmp.lt.s32.totalorder %v5155_v61, 3  ;;  %v938_v54 = vor.u32 8388608, %v5151_v57 }
 0x11f   : > { %v1393_v51 = vsel %vm1379_vm6, %v1390_v36, %v1392_v37  ;;  %v970_v56 = vsel %vm962_vm7, %v949_v31, %v952_v32  ;;  %v972_v59 = vsel %vm964_vm8, %v955_v33, %v971_v38  ;;  %v1389_v60 = vsel %vm1379_vm6, %v1386_v40, %v1388_v41 }
 0x120   : > { %v974_v0 = vsel %vm962_vm7, %v952_v32, %v955_v33  ;;  %v976_v2 = vsel %vm964_vm8, %v958_v20, %v975_v43  ;;  %vm963_vm9 = vcmp.lt.s32.totalorder %v5155_v61, 2  ;;  %vm1461_vm10 = vcmp.gt.s32.totalorder %v1460_v49, 0 }
 0x121   : > { %v5221_v3 = vmul.u32.u64.low %v1394_v62, %v1393_v51  ;;  %v5222_v57 = vmul.u32.u64.high %v1394_v62, %v1393_v51, %v5221_v3  ;;  %v973_v4 = vsel %vm963_vm9, %v970_v56, %v972_v59  ;;  %v977_v7 = vsel %vm963_vm9, %v974_v0, %v976_v2 }
 0x122   : > { %v5226_v5 = vmul.u32.u64.low %v1394_v62, %v1389_v60  ;;  %v5227_v6 = vmul.u32.u64.high %v1394_v62, %v1389_v60, %v5226_v5  ;;  %v978_v8 = vshll.u32 %v938_v54, 8  ;;  %v5233_v10 = vadd.f32 %v455_v47, %v5125_v39 }
 0x123   : > { %v1462_v13 = vsel %vm1461_vm10, %v1460_v49, 0  ;;  %v1383_v18 = vsel %vm1381_vm2, %v1371_v17, 2102212464  ;;  %v1362_v20 = vshrl.u32 %v9620_v58, %v5131_v45  ;;  %v967_v24 = vsel %vm965_vm5, %v955_v33, 2102212464 }
 0x124   : > { %v5235_v11 = vmul.u32.u64.low %v978_v8, %v973_v4  ;;  %v5236_v12 = vmul.u32.u64.high %v978_v8, %v973_v4, %v5235_v11  ;;  %v5239_v14 = vmul.u32.u64.low %v978_v8, %v977_v7  ;;  %v5240_v15 = vmul.u32.u64.high %v978_v8, %v977_v7, %v5239_v14 }
 0x125   : > { %v1464_v21 = vand.u32 31, %v1462_v13  ;;  %v1037_v22 = vand.u32 2139095040, %v5233_v10  ;;  %v1382_v27 = vsel %vm1378_vm3, %v1362_v20, %v5168_v9  ;;  %v1384_v28 = vsel %vm1380_vm4, %v1368_v16, %v1383_v18  ;;  %v308_v14 = vpop.permute.xlu1 %307 }
 0x126   : > { %v946_v29 = vshrl.u32 %v9620_v58, %v5135_v48  ;;  %vm1403_vm11 = vc.u32 %v5222_v57, %v5226_v5  ;;  %v1404_v45 = vadd.s32 1, %v5227_v6  ;;  %v968_v30 = vsel %vm964_vm8, %v952_v32, %v967_v24 }
 0x127   : > { %v5263_v33 = vsub.s32 32, %v1464_v21  ;;  %v1038_v9 = vshrl.u32 %v1037_v22, 23  ;;  %v1385_v16 = vsel %vm1379_vm6, %v1382_v27, %v1384_v28  ;;  %v988_v34 = vadd.s32 1, %v5236_v12 }
 0x128   : > { %v966_v17 = vsel %vm962_vm7, %v946_v29, %v949_v31  ;;  %vm987_vm12 = vc.u32 %v5240_v15, %v5235_v11  ;;  %v1405_v48 = vsel %vm1403_vm11, %v1404_v45, %v5227_v6  ;;  %v1401_v31 = vmul.u32 %v1394_v62, %v1385_v16 }
 0x129   : > { %v969_v36 = vsel %vm963_vm9, %v966_v17, %v968_v30  ;;  %v1477_v32 = vshrl.u32 %v9612_v55, %v5263_v33  ;;  %v4171_v37 = vadd.s32 4294967169, %v1038_v9  ;;  %v989_v38 = vsel %vm987_vm12, %v988_v34, %v5236_v12 }
 0x12a   : > { %v1450_v52 = vand.u32 2147483647, %v5128_v42  ;;  %v1480_v40 = vshrl.u32 %v9608_v50, %v5263_v33  ;;  %v1406_v41 = vadd.s32 %v1405_v48, %v1401_v31  ;;  %v985_v43 = vmul.u32 %v978_v8, %v969_v36 }
 0x12b   : > { %v5279_v47 = vshrl.u32 %v1462_v13, 5  ;;  %v1476_v49 = vshll.u32 %v9610_v1, %v1464_v21  ;;  %v1468_v61 = vshrl.u32 %v9616_v53, %v5263_v33  ;;  %v1471_v51 = vshrl.u32 %v9618_v63, %v5263_v33 }
 0x12c   : > { %v1474_v54 = vshrl.u32 %v9610_v1, %v5263_v33  ;;  %v1479_v56 = vshll.u32 %v9612_v55, %v1464_v21  ;;  %v990_v59 = vadd.s32 %v989_v38, %v985_v43  ;;  %v1044_v62 = vadd.s32 1, %v4171_v37 }
 0x12d   : > { %v1478_v60 = vor.u32 %v1477_v32, %v1476_v49  ;;  %v1467_v0 = vshll.u32 %v9620_v58, %v1464_v21  ;;  %v1470_v2 = vshll.u32 %v9616_v53, %v1464_v21  ;;  %v1473_v3 = vshll.u32 %v9618_v63, %v1464_v21 }
 0x12e   : > { %v1481_v4 = vor.u32 %v1480_v40, %v1479_v56  ;;  %v1407_v6 = vadd.s32 536870912, %v1406_v41  ;;  %v1457_v7 = vand.u32 8388607, %v1450_v52  ;;  %vm1485_vm13 = vcmp.lt.s32.totalorder %v5279_v47, 4 }
 0x12f   : > { %v1469_v8 = vor.u32 %v1468_v61, %v1467_v0  ;;  %v1472_v12 = vor.u32 %v1471_v51, %v1470_v2  ;;  %v1475_v13 = vor.u32 %v1474_v54, %v1473_v3  ;;  %v991_v18 = vadd.s32 536870912, %v990_v59 }
 0x130   : > { %v1491_v20 = vsel %vm1485_vm13, %v1478_v60, 920167782  ;;  %vm1045_vm14 = vcmp.gt.s32.totalorder %v1044_v62, 0  ;;  %v1495_v22 = vsel %vm1485_vm13, %v1481_v4, 1326507024  ;;  %v1458_v21 = vor.u32 8388608, %v1457_v7 }
 0x131   : > { %vm1482_vm15 = vcmp.lt.s32.totalorder %v5279_v47, 1  ;;  %vm1484_vm0 = vcmp.lt.s32.totalorder %v5279_v47, 3  ;;  %v451_v24 = vmul.f32 %v308_v14, %v5122_v35  ;;  %v5302_v27 = vshrl.u32 %v1407_v6, 30 }
 0x132   : > { %v1490_v28 = vsel %vm1482_vm15, %v1469_v8, %v1472_v12  ;;  %v1492_v29 = vsel %vm1484_vm0, %v1475_v13, %v1491_v20  ;;  %v1046_v45 = vsel %vm1045_vm14, %v1044_v62, 0  ;;  %v5308_v17 = vshrl.u32 %v991_v18, 30 }
 0x133   : > { %v1494_v30 = vsel %vm1482_vm15, %v1472_v12, %v1475_v13  ;;  %v1496_v9 = vsel %vm1484_vm0, %v1478_v60, %v1495_v22  ;;  %vm1483_vm1 = vcmp.lt.s32.totalorder %v5279_v47, 2  ;;  %v1048_v16 = vand.u32 31, %v1046_v45 }
 0x134   : > { %v1493_v35 = vsel %vm1483_vm1, %v1490_v28, %v1492_v29  ;;  %v1409_v34 = vshll.u32 %v5302_v27, 30  ;;  %v1497_v48 = vsel %vm1483_vm1, %v1494_v30, %v1496_v9  ;;  %v1498_v36 = vshll.u32 %v1458_v21, 8 }
 0x135   : > { %v5321_v31 = vadd.f32 %v451_v24, %v5125_v39  ;;  %v993_v32 = vshll.u32 %v5308_v17, 30  ;;  %v5331_v49 = vsub.s32 32, %v1048_v16  ;;  %v1466_v39 = vshrl.u32 %v9620_v58, %v5263_v33 }
 0x136   : > { %v5324_v37 = vmul.u32.u64.low %v1498_v36, %v1493_v35  ;;  %v5325_v38 = vmul.u32.u64.high %v1498_v36, %v1493_v35, %v5324_v37  ;;  %v5328_v40 = vmul.u32.u64.low %v1498_v36, %v1497_v48  ;;  %v5329_v43 = vmul.u32.u64.high %v1498_v36, %v1497_v48, %v5328_v40 }
 0x137   : > { %v5333_v61 = vsub.s32 %v1406_v41, %v1409_v34  ;;  %v621_v51 = vand.u32 2139095040, %v5321_v31  ;;  %v5336_v54 = vsub.s32 %v990_v59, %v993_v32  ;;  %v1487_v56 = vsel %vm1485_vm13, %v1475_v13, 2102212464 }
 0x138   : > { %v1034_v60 = vand.u32 2147483647, %v5233_v10  ;;  %v1061_v62 = vshrl.u32 %v9612_v55, %v5331_v49  ;;  %v1486_v41 = vsel %vm1482_vm15, %v1466_v39, %v1469_v8  ;;  %v1064_v59 = vshrl.u32 %v9608_v50, %v5331_v49 }
 0x139   : > { %v1412_v0 = vsub.s32 0, %v5333_v61  ;;  %v622_v2 = vshrl.u32 %v621_v51, 23  ;;  %v996_v3 = vsub.s32 0, %v5336_v54  ;;  %v1488_v33 = vsel %vm1484_vm0, %v1472_v12, %v1487_v56 }
 0x13a   : > { %v5353_v4 = vshrl.u32 %v1046_v45, 5  ;;  %v1060_v6 = vshll.u32 %v9610_v1, %v1048_v16  ;;  %v1052_v7 = vshrl.u32 %v9616_v53, %v5331_v49  ;;  %v1055_v13 = vshrl.u32 %v9618_v63, %v5331_v49 }
 0x13b   : > { %v1058_v8 = vshrl.u32 %v9610_v1, %v5331_v49  ;;  %v1063_v14 = vshll.u32 %v9612_v55, %v1048_v16  ;;  %vm1507_vm2 = vc.u32 %v5329_v43, %v5324_v37  ;;  %v1508_v12 = vadd.s32 1, %v5325_v38 }
 0x13c   : > { %v1051_v18 = vshll.u32 %v9620_v58, %v1048_v16  ;;  %v1062_v20 = vor.u32 %v1061_v62, %v1060_v6  ;;  %v1054_v22 = vshll.u32 %v9616_v53, %v1048_v16  ;;  %v1057_v21 = vshll.u32 %v9618_v63, %v1048_v16 }
 0x13d   : > { %v1065_v24 = vor.u32 %v1064_v59, %v1063_v14  ;;  %v4155_v28 = vadd.s32 4294967169, %v622_v2  ;;  %v4184_v29 = vmin.u32 %v1412_v0, %v5333_v61  ;;  %v4168_v45 = vmin.u32 %v996_v3, %v5336_v54 }
 0x13e   : > { %v1489_v30 = vsel %vm1483_vm1, %v1486_v41, %v1488_v33  ;;  %v1041_v9 = vand.u32 8388607, %v1034_v60  ;;  %v1053_v35 = vor.u32 %v1052_v7, %v1051_v18  ;;  %v1056_v34 = vor.u32 %v1055_v13, %v1054_v22 }
 0x13f   : > { %v1059_v48 = vor.u32 %v1058_v8, %v1057_v21  ;;  %vm1069_vm3 = vcmp.lt.s32.totalorder %v5353_v4, 4  ;;  %v1509_v16 = vsel %vm1507_vm2, %v1508_v12, %v5325_v38  ;;  %v1505_v40 = vmul.u32 %v1498_v36, %v1489_v30 }
 0x140   : > { %v1075_v32 = vsel %vm1069_vm3, %v1062_v20, 920167782  ;;  %v1079_v47 = vsel %vm1069_vm3, %v1065_v24, 1326507024  ;;  %v628_v51 = vadd.s32 1, %v4155_v28  ;;  %v1414_v39 = vclz %v4184_v29  ;;  %v304_v24 = vpop.permute.xlu0 %303 }
 0x141   : > { %v998_v56 = vclz %v4168_v45  ;;  %vm1066_vm4 = vcmp.lt.s32.totalorder %v5353_v4, 1  ;;  %vm1068_vm5 = vcmp.lt.s32.totalorder %v5353_v4, 3  ;;  %v1510_v62 = vadd.s32 %v1509_v16, %v1505_v40 }
 0x142   : > { %v1042_v0 = vor.u32 8388608, %v1041_v9  ;;  %v1074_v41 = vsel %vm1066_vm4, %v1053_v35, %v1056_v34  ;;  %v1076_v38 = vsel %vm1068_vm5, %v1059_v48, %v1075_v32  ;;  %v1078_v36 = vsel %vm1066_vm4, %v1056_v34, %v1059_v48 }
 0x143   : > { %v1080_v59 = vsel %vm1068_vm5, %v1062_v20, %v1079_v47  ;;  %vm1067_vm6 = vcmp.lt.s32.totalorder %v5353_v4, 2  ;;  %vm629_vm7 = vcmp.gt.s32.totalorder %v628_v51, 0  ;;  %v4185_v2 = vadd.s32 4294967294, %v1414_v39 }
 0x144   : > { %v4169_v3 = vadd.s32 4294967294, %v998_v56  ;;  %v1077_v33 = vsel %vm1067_vm6, %v1074_v41, %v1076_v38  ;;  %v1511_v6 = vadd.s32 536870912, %v1510_v62  ;;  %v1081_v7 = vsel %vm1067_vm6, %v1078_v36, %v1080_v59 }
 0x145   : > { %v1082_v13 = vshll.u32 %v1042_v0, 8  ;;  %v630_v8 = vsel %vm629_vm7, %v628_v51, 0  ;;  %vm4186_vm8 = vcmp.lt.s32.totalorder %v4185_v2, 0  ;;  %v1071_v45 = vsel %vm1069_vm3, %v1059_v48, 2102212464 }
 0x146   : > { %vm4170_vm9 = vcmp.lt.s32.totalorder %v4169_v3, 0  ;;  %v5406_v22 = vshrl.u32 %v1511_v6, 30  ;;  %v632_v21 = vand.u32 31, %v630_v8  ;;  %v5408_v28 = vsel %vm4186_vm8, 0, %v4185_v2 }
 0x147   : > { %v5399_v14 = vmul.u32.u64.low %v1082_v13, %v1077_v33  ;;  %v5400_v12 = vmul.u32.u64.high %v1082_v13, %v1077_v33, %v5399_v14  ;;  %v5403_v18 = vmul.u32.u64.low %v1082_v13, %v1081_v7  ;;  %v5404_v20 = vmul.u32.u64.high %v1082_v13, %v1081_v7, %v5403_v18 }
 0x148   : > { %v5410_v29 = vsel %vm4170_vm9, 0, %v4169_v3  ;;  %v1513_v30 = vshll.u32 %v5406_v22, 30  ;;  %v1050_v9 = vshrl.u32 %v9620_v58, %v5331_v49  ;;  %v5417_v16 = vsub.s32 32, %v632_v21 }
 0x149   : > { %v450_v32 = vmul.f32 %v304_v24, %v5108_v19  ;;  %v1422_v40 = vsub.s32 4294967266, %v5408_v28  ;;  %v1006_v47 = vsub.s32 4294967266, %v5410_v29  ;;  %v1072_v39 = vsel %vm1068_vm5, %v1056_v34, %v1071_v45 }
 0x14a   : > { %v1070_v51 = vsel %vm1066_vm4, %v1050_v9, %v1053_v35  ;;  %v1092_v48 = vadd.s32 1, %v5400_v12  ;;  %v1402_v56 = vadd.s32 %v5226_v5, %v5222_v57  ;;  %vm1091_vm10 = vc.u32 %v5404_v20, %v5399_v14 }
 0x14b   : > { %v1418_v49 = vsub.s32 32, %v5408_v28  ;;  %v5432_v0 = vsub.s32 %v1510_v62, %v1513_v30  ;;  %v645_v41 = vshrl.u32 %v9612_v55, %v5417_v16  ;;  %v5437_v35 = vadd.f32 %v450_v32, %v5111_v23 }
 0x14c   : > { %v1423_v38 = vadd.s32 127, %v1422_v40  ;;  %v1007_v34 = vadd.s32 127, %v1006_v47  ;;  %v1073_v36 = vsel %vm1067_vm6, %v1070_v51, %v1072_v39  ;;  %v648_v57 = vshrl.u32 %v9608_v50, %v5417_v16 }
 0x14d   : > { %v1093_v5 = vsel %vm1091_vm10, %v1092_v48, %v5400_v12  ;;  %v9607_v59 = vand.u32 2147483647, %v5321_v31  ;;  %v5445_v62 = vshrl.u32 %v630_v8, 5  ;;  %v644_v2 = vshll.u32 %v9610_v1, %v632_v21 }
 0x14e   : > { %v636_v3 = vshrl.u32 %v9616_v53, %v5417_v16  ;;  %v639_v33 = vshrl.u32 %v9618_v63, %v5417_v16  ;;  %v642_v4 = vshrl.u32 %v9610_v1, %v5417_v16  ;;  %v647_v6 = vshll.u32 %v9612_v55, %v632_v21 }
 0x14f   : > { %v1516_v7 = vsub.s32 0, %v5432_v0  ;;  %v1089_v12 = vmul.u32 %v1082_v13, %v1073_v36  ;;  %v646_v18 = vor.u32 %v645_v41, %v644_v2  ;;  %v517_v8 = vand.u32 2139095040, %v5437_v35 }
 0x150   : > { %v635_v24 = vshll.u32 %v9620_v58, %v632_v21  ;;  %v638_v45 = vshll.u32 %v9616_v53, %v632_v21  ;;  %v641_v30 = vshll.u32 %v9618_v63, %v632_v21  ;;  %v649_v9 = vor.u32 %v648_v57, %v647_v6 }
 0x151   : > { %v1424_v32 = vshll.u32 %v1423_v38, 23  ;;  %v1002_v40 = vsub.s32 32, %v5410_v29  ;;  %v1094_v47 = vadd.s32 %v1093_v5, %v1089_v12  ;;  %v625_v51 = vand.u32 8388607, %v9607_v59 }
 0x152   : > { %v637_v39 = vor.u32 %v636_v3, %v635_v24  ;;  %v640_v48 = vor.u32 %v639_v33, %v638_v45  ;;  %v643_v13 = vor.u32 %v642_v4, %v641_v30  ;;  %vm653_vm11 = vcmp.lt.s32.totalorder %v5445_v62, 4 }
 0x153   : > { %v986_v41 = vadd.s32 %v5235_v11, %v5240_v15  ;;  %v4188_v36 = vmin.u32 %v1516_v7, %v5432_v0  ;;  %v659_v21 = vsel %vm653_vm11, %v646_v18, 920167782  ;;  %v518_v38 = vshrl.u32 %v517_v8, 23 }
 0x154   : > { %v1419_v57 = vshll.u32 %v5333_v61, %v5408_v28  ;;  %v1420_v5 = vshrl.u32 %v1402_v56, %v1418_v49  ;;  %v1008_v2 = vshll.u32 %v1007_v34, 23  ;;  %v663_v3 = vsel %vm653_vm11, %v649_v9, 1326507024 }
 0x155   : > { %v1425_v33 = vor.u32 4788187, %v1424_v32  ;;  %v1004_v4 = vshrl.u32 %v986_v41, %v1002_v40  ;;  %vm650_vm12 = vcmp.lt.s32.totalorder %v5445_v62, 1  ;;  %vm652_vm13 = vcmp.lt.s32.totalorder %v5445_v62, 3 }
 0x156   : > { %v1095_v11 = vadd.s32 536870912, %v1094_v47  ;;  %v626_v15 = vor.u32 8388608, %v625_v51  ;;  %v658_v6 = vsel %vm650_vm12, %v637_v39, %v640_v48  ;;  %v660_v7 = vsel %vm652_vm13, %v643_v13, %v659_v21 }
 0x157   : > { %v1518_v61 = vclz %v4188_v36  ;;  %v662_v28 = vsel %vm650_vm12, %v640_v48, %v643_v13  ;;  %v664_v56 = vsel %vm652_vm13, %v646_v18, %v663_v3  ;;  %v4151_v49 = vadd.s32 4294967169, %v518_v38 }
 0x158   : > { %v1421_v34 = vor.u32 %v1420_v5, %v1419_v57  ;;  %v1003_v12 = vshll.u32 %v5336_v54, %v5410_v29  ;;  %v1009_v8 = vor.u32 4788187, %v1008_v2  ;;  %vm651_vm14 = vcmp.lt.s32.totalorder %v5445_v62, 2 }
 0x159   : > { %v1426_v24 = vand.u32 2147483647, %v1425_v33  ;;  %v661_v45 = vsel %vm651_vm14, %v658_v6, %v660_v7  ;;  %v5488_v9 = vshrl.u32 %v1095_v11, 30  ;;  %v665_v32 = vsel %vm651_vm14, %v662_v28, %v664_v56 }
 0x15a   : > { %v1005_v30 = vor.u32 %v1004_v4, %v1003_v12  ;;  %v666_v40 = vshll.u32 %v626_v15, 8  ;;  %v4189_v18 = vadd.s32 4294967294, %v1518_v61  ;;  %v524_v51 = vadd.s32 1, %v4151_v49 }
 0x15b   : > { %v1428_v41 = vcvt.s32.f32 %v1421_v34  ;;  %v1010_v36 = vand.u32 2147483647, %v1009_v8  ;;  %v1097_v2 = vshll.u32 %v5488_v9, 30  ;;  %v655_v33 = vsel %vm653_vm11, %v643_v13, 2102212464  ;;  %v361_v34 = vpop.permute.xlu1 %360 }
 0x15c   : > { %v5492_v21 = vmul.u32.u64.low %v666_v40, %v661_v45  ;;  %v5493_v54 = vmul.u32.u64.high %v666_v40, %v661_v45, %v5492_v21  ;;  %v5496_v29 = vmul.u32.u64.low %v666_v40, %v665_v32  ;;  %v5497_v38 = vmul.u32.u64.high %v666_v40, %v665_v32, %v5496_v29 }
 0x15d   : > { %v1429_v57 = vmul.f32 %v1428_v41, %v1426_v24  ;;  %v1012_v5 = vcvt.s32.f32 %v1005_v30  ;;  %vm4190_vm15 = vcmp.lt.s32.totalorder %v4189_v18, 0  ;;  %vm525_vm0 = vcmp.gt.s32.totalorder %v524_v51, 0 }
 0x15e   : > { %v1432_v4 = vsub.s32 4, %v5302_v27  ;;  %v634_v11 = vshrl.u32 %v9620_v58, %v5417_v16  ;;  %v1521_v6 = vsel %vm4190_vm15, 0, %v4189_v18  ;;  %v5505_v7 = vsub.s32 %v1094_v47, %v1097_v2 }
 0x15f   : > { %v1013_v3 = vmul.f32 %v1012_v5, %v1010_v36  ;;  %v1430_v15 = vxor.u32 2147483648, %v1429_v57  ;;  %v526_v61 = vsel %vm525_vm0, %v524_v51, 0  ;;  %v656_v56 = vsel %vm652_vm13, %v640_v48, %v655_v33 }
 0x160   : > { %v654_v28 = vsel %vm650_vm12, %v634_v11, %v637_v39  ;;  %vm1348_vm1 = vcmp.lt.s32.totalorder %v5115_v25, 0  ;;  %v676_v13 = vadd.s32 1, %v5493_v54  ;;  %v1526_v16 = vsub.s32 4294967266, %v1521_v6 }
 0x161   : > { %v1014_v49 = vxor.u32 2147483648, %v1013_v3  ;;  %v1433_v12 = vsel %vm1348_vm1, %v1432_v4, %v5302_v27  ;;  %vm675_vm2 = vc.u32 %v5497_v38, %v5492_v21  ;;  %v528_v47 = vand.u32 31, %v526_v61 }
 0x162   : > { %v1431_v8 = vsel %vm1348_vm1, %v1430_v15, %v1429_v57  ;;  %v1522_v24 = vsub.s32 32, %v1521_v6  ;;  %v1100_v39 = vsub.s32 0, %v5505_v7  ;;  %v657_v48 = vsel %vm651_vm14, %v654_v28, %v656_v56 }
 0x163   : > { %vm5521_vm3 = vcmp.le.f32.partialorder %v1346_v44, 0.7853982  ;;  %vm932_vm4 = vcmp.lt.s32.totalorder %v5118_v26, 0  ;;  %v462_v27 = vmul.f32 %v361_v34, %v5108_v19  ;;  %v1506_v62 = vadd.s32 %v5324_v37, %v5329_v43  ;;  %v5575_v34 = vld [vmem:[#allocation7 + $0x10] sm:$0xff] }
 0x164   : > { %v1435_v30 = vsel %vm5521_vm3, 0, %v1433_v12  ;;  %v1015_v32 = vsel %vm932_vm4, %v1014_v49, %v1013_v3  ;;  %v677_v18 = vsel %vm675_vm2, %v676_v13, %v5493_v54  ;;  %v1434_v44 = vsel %vm5521_vm3, %v5115_v25, %v1431_v8  ;;  %v331_v12 = vpop.permute.xlu0 %330 }
 0x165   : > { %v1527_v51 = vadd.s32 127, %v1526_v16  ;;  %v673_v41 = vmul.u32 %v666_v40, %v657_v48  ;;  %v5537_v36 = vsub.s32 32, %v528_v47  ;;  %vm5541_vm5 = vcmp.le.f32.partialorder %v930_v46, 0.7853982 }
 0x166   : > { %v1016_v29 = vsub.s32 4, %v5308_v17  ;;  %v1524_v57 = vshrl.u32 %v1506_v62, %v1522_v24  ;;  %v4172_v37 = vmin.u32 %v1100_v39, %v5505_v7  ;;  %v1018_v43 = vsel %vm5541_vm5, %v5118_v26, %v1015_v32 }
 0x167   : > { %v5550_v54 = vadd.s32 %v677_v18, %v673_v41  ;;  %v5553_v40 = vadd.f32 %v462_v27, %v5111_v23  ;;  %4497 = vcosq.f32 %v1434_v44  ;;  %v1439_v5 = vadd.s32 3, %v1435_v30 }
 0x168   : > { %v1523_v46 = vshll.u32 %v5432_v0, %v1521_v6  ;;  %4499 = vsinq.f32 %v1434_v44  ;;  %v1528_v2 = vshll.u32 %v1527_v51, 23  ;;  %v9606_v3 = vand.u32 2147483647, %v5437_v35 }
 0x169   : > { %v541_v33 = vshrl.u32 %v9612_v55, %v5537_v36  ;;  %v1017_v4 = vsel %vm932_vm4, %v1016_v29, %v5308_v17  ;;  %4501 = vcosq.f32 %v1018_v43  ;;  %v1102_v15 = vclz %v4172_v37  ;;  %v5591_v29 = vld [vmem:[#allocation8 + $0x10] sm:$0xff] }
 0x16a   : > { %v1525_v11 = vor.u32 %v1524_v57, %v1523_v46  ;;  %v679_v23 = vadd.s32 536870912, %v5550_v54  ;;  %v540_v28 = vshll.u32 %v9610_v1, %v528_v47  ;;  %v544_v0 = vshrl.u32 %v9608_v50, %v5537_v36 }
 0x16b   : > { %v1765_v6 = vand.u32 2139095040, %v5553_v40  ;;  %v5567_v56 = vshrl.u32 %v526_v61, 5  ;;  %v532_v49 = vshrl.u32 %v9616_v53, %v5537_v36  ;;  %v535_v17 = vshrl.u32 %v9618_v63, %v5537_v36 }
 0x16c   : > { %v538_v13 = vshrl.u32 %v9610_v1, %v5537_v36  ;;  %v1529_v16 = vor.u32 4788187, %v1528_v2  ;;  %v521_v8 = vand.u32 8388607, %v9606_v3  ;;  %v542_v24 = vor.u32 %v541_v33, %v540_v28 }
 0x16d   : > { %v543_v61 = vshll.u32 %v9612_v55, %v528_v47  ;;  %v4173_v39 = vadd.s32 4294967294, %v1102_v15  ;;  %v531_v48 = vshll.u32 %v9620_v58, %v528_v47  ;;  %v534_v45 = vshll.u32 %v9616_v53, %v528_v47 }
 0x16e   : > { %v537_v27 = vshll.u32 %v9618_v63, %v528_v47  ;;  %v5583_v30 = vshrl.u32 %v679_v23, 30  ;;  %v1766_v62 = vshrl.u32 %v1765_v6, 23  ;;  %v456_v18 = vmul.f32 %v331_v12, %v5575_v34 }
 0x16f   : > { %v545_v32 = vor.u32 %v544_v0, %v543_v61  ;;  %v5586_v44 = vor.u32 %v532_v49, %v531_v48  ;;  %v5588_v51 = vor.u32 %v535_v17, %v534_v45  ;;  %vm549_vm6 = vcmp.lt.s32.totalorder %v5567_v56, 4 }
 0x170   : > { %v539_v41 = vor.u32 %v538_v13, %v537_v27  ;;  %v1019_v57 = vsel %vm5541_vm5, 0, %v1017_v4  ;;  %4503 = vsinq.f32 %v1018_v43  ;;  %v1530_v47 = vand.u32 2147483647, %v1529_v16 }
 0x171   : > { %v555_v37 = vsel %vm549_vm6, %v542_v24, 920167782  ;;  %v5597_v46 = vpop.eup %4497  ;;  %v1532_v2 = vcvt.s32.f32 %v1525_v11  ;;  %vm4174_vm7 = vcmp.lt.s32.totalorder %v4173_v39, 0  ;;  %vm546_vm8 = vcmp.lt.s32.totalorder %v5567_v56, 1 }
 0x172   : > { %vm548_vm9 = vcmp.lt.s32.totalorder %v5567_v56, 3  ;;  %v4500_v33 = vpop.eup %4499  ;;  %v681_v15 = vshll.u32 %v5583_v30, 30  ;;  %v559_v19 = vsel %vm549_vm6, %v545_v32, 1326507024  ;;  %v4199_v4 = vadd.s32 4294967169, %v1766_v62 }
 0x173   : > { %v5605_v43 = vadd.f32 %v456_v18, %v5591_v29  ;;  %v5607_v23 = vpop.eup %4501  ;;  %v1023_v28 = vadd.s32 3, %v1019_v57  ;;  %v522_v0 = vor.u32 8388608, %v521_v8  ;;  %v554_v11 = vsel %vm546_vm8, %v5586_v44, %v5588_v51 }
 0x174   : > { %v556_v6 = vsel %vm548_vm9, %v539_v41, %v555_v37  ;;  %v1440_v49 = vand.u32 3, %v1439_v5  ;;  %v1533_v17 = vmul.f32 %v1532_v2, %v1530_v47  ;;  %v1536_v13 = vsub.s32 4, %v5406_v22 }
 0x175   : > { %v5617_v12 = vsel %vm4174_vm7, 0, %v4173_v39  ;;  %vm547_vm10 = vcmp.lt.s32.totalorder %v5567_v56, 2  ;;  %v558_v16 = vsel %vm546_vm8, %v5588_v51, %v539_v41  ;;  %v560_v8 = vsel %vm548_vm9, %v542_v24, %v559_v19 }
 0x176   : > { %v5626_v61 = vsub.s32 %v5550_v54, %v681_v15  ;;  %v557_v5 = vsel %vm547_vm10, %v554_v11, %v556_v6  ;;  %v1772_v48 = vadd.s32 1, %v4199_v4  ;;  %v1141_v45 = vand.u32 2139095040, %v5605_v43 }
 0x177   : > { %v5631_v39 = vand.u32 3, %v1023_v28  ;;  %v5633_v27 = vshll.u32 %v522_v0, 8  ;;  %vm1442_vm11 = vcmp.eq.s32.totalorder %v1440_v49, 0  ;;  %vm5637_vm12 = vcmp.le.f32.partialorder %v1450_v52, 0.7853982 }
 0x178   : > { %vm1452_vm13 = vcmp.lt.s32.totalorder %v5128_v42, 0  ;;  %v561_v54 = vsel %vm547_vm10, %v558_v16, %v560_v8  ;;  %v1110_v62 = vsub.s32 4294967266, %v5617_v12  ;;  %vm1441_vm14 = vcmp.lt.s32.totalorder %v1440_v49, 2 }
 0x179   : > { %v1537_v24 = vsel %vm1452_vm13, %v1536_v13, %v5406_v22  ;;  %v5649_v18 = vmul.u32.u64.low %v5633_v27, %v557_v5  ;;  %v5650_v57 = vmul.u32.u64.high %v5633_v27, %v557_v5, %v5649_v18  ;;  %v1534_v47 = vxor.u32 2147483648, %v1533_v17 }
 0x17a   : > { %v4504_v52 = vpop.eup %4503  ;;  %v684_v37 = vsub.s32 0, %v5626_v61  ;;  %vm1773_vm15 = vcmp.gt.s32.totalorder %v1772_v48, 0  ;;  %v1142_v2 = vshrl.u32 %v1141_v45, 23  ;;  %vm1445_vm0 = vcmp.eq.s32.totalorder %v1440_v49, 2 }
 0x17b   : > { %vm1026_vm1 = vcmp.eq.s32.totalorder %v5631_v39, 0  ;;  %v5656_v15 = vmul.u32.u64.low %v5633_v27, %v561_v54  ;;  %v5657_v22 = vmul.u32.u64.high %v5633_v27, %v561_v54, %v5656_v15  ;;  %v1443_v19 = vxor.u32 2147483648, %v4500_v33 }
 0x17c   : > { %v1446_v4 = vxor.u32 2147483648, %v5597_v46  ;;  %v1539_v28 = vsel %vm5637_vm12, 0, %v1537_v24  ;;  %v1106_v0 = vsub.s32 32, %v5617_v12  ;;  %vm1029_vm2 = vcmp.eq.s32.totalorder %v5631_v39, 2 }
 0x17d   : > { %v1090_v11 = vadd.s32 %v5399_v14, %v5404_v20  ;;  %v1111_v6 = vadd.s32 127, %v1110_v62  ;;  %v1774_v13 = vsel %vm1773_vm15, %v1772_v48, 0  ;;  %vm1438_vm3 = vweird.f32 %v5115_v25 }
 0x17e   : > { %v1535_v16 = vsel %vm1452_vm13, %v1534_v47, %v1533_v17  ;;  %v4156_v8 = vmin.u32 %v684_v37, %v5626_v61  ;;  %v551_v5 = vsel %vm549_vm6, %v539_v41, 2102212464  ;;  %v4175_v45 = vadd.s32 4294967169, %v1142_v2 }
 0x17f   : > { %v1027_v54 = vxor.u32 2147483648, %v4504_v52  ;;  %v1030_v24 = vxor.u32 2147483648, %v5607_v23  ;;  %v1543_v15 = vadd.s32 3, %v1539_v28  ;;  %v530_v14 = vshrl.u32 %v9620_v58, %v5537_v36  ;;  %v350_v28 = vpop.permute.xlu1 %349 }
 0x180   : > { %v1444_v20 = vsel %vm1442_vm11, %v5597_v46, %v1443_v19  ;;  %v1447_v48 = vsel %vm1445_vm0, %v1446_v4, %v4500_v33  ;;  %v1108_v62 = vshrl.u32 %v1090_v11, %v1106_v0  ;;  %v1776_v17 = vand.u32 31, %v1774_v13 }
 0x181   : > { %v1538_v47 = vsel %vm5637_vm12, %v5128_v42, %v1535_v16  ;;  %v1112_v41 = vshll.u32 %v1111_v6, 23  ;;  %v550_v37 = vsel %vm546_vm8, %v530_v14, %v5586_v44  ;;  %v552_v36 = vsel %vm548_vm9, %v5588_v51, %v551_v5 }
 0x182   : > { %v1107_v46 = vshll.u32 %v5505_v7, %v5617_v12  ;;  %v686_v2 = vclz %v4156_v8  ;;  %v572_v33 = vadd.s32 1, %v5650_v57  ;;  %v1148_v19 = vadd.s32 1, %v4175_v45 }
 0x183   : > { %v1448_v4 = vsel %vm1441_vm14, %v1444_v20, %v1447_v48  ;;  %v1028_v32 = vsel %vm1026_vm1, %v5607_v23, %v1027_v54  ;;  %v1031_v44 = vsel %vm1029_vm2, %v1030_v24, %v4504_v52  ;;  %vm571_vm4 = vc.u32 %v5657_v22, %v5649_v18 }
 0x184   : > { %4505 = vcosq.f32 %v1538_v47  ;;  %v1109_v51 = vor.u32 %v1108_v62, %v1107_v46  ;;  %v553_v7 = vsel %vm547_vm10, %v550_v37, %v552_v36  ;;  %v5700_v12 = vsub.s32 32, %v1776_v17 }
 0x185   : > { %vm1025_vm5 = vcmp.lt.s32.totalorder %v5631_v39, 2  ;;  %vm1036_vm6 = vcmp.lt.s32.totalorder %v5233_v10, 0  ;;  %v1113_v49 = vor.u32 4788187, %v1112_v41  ;;  %v9605_v23 = vand.u32 2147483647, %v5553_v40 }
 0x186   : > { %v5705_v0 = vand.u32 3, %v1543_v15  ;;  %v4157_v52 = vadd.s32 4294967294, %v686_v2  ;;  %v573_v11 = vsel %vm571_vm4, %v572_v33, %v5650_v57  ;;  %vm1149_vm7 = vcmp.gt.s32.totalorder %v1148_v19, 0 }
 0x187   : > { %v5710_v56 = vsel %vm1438_vm3, nan, %v1448_v4  ;;  %v5712_v6 = vsel %vm1025_vm5, %v1028_v32, %v1031_v44  ;;  %v569_v16 = vmul.u32 %v5633_v27, %v553_v7  ;;  %v460_v39 = vmul.f32 %v350_v28, %v5575_v34 }
 0x188   : > { %4507 = vsinq.f32 %v1538_v47  ;;  %vm5718_vm8 = vcmp.le.f32.partialorder %v1034_v60, 0.7853982  ;;  %v1116_v5 = vcvt.s32.f32 %v1109_v51  ;;  %v1120_v57 = vsub.s32 4, %v5488_v9 }
 0x189   : > { %v1789_v25 = vshrl.u32 %v9612_v55, %v5700_v12  ;;  %v1114_v45 = vand.u32 2147483647, %v1113_v49  ;;  %v5725_v54 = vadd.s32 %v573_v11, %v569_v16  ;;  %v1769_v27 = vand.u32 8388607, %v9605_v23 }
 0x18a   : > { %v1150_v34 = vsel %vm1149_vm7, %v1148_v19, 0  ;;  %vm4158_vm9 = vcmp.lt.s32.totalorder %v4157_v52, 0  ;;  %v1780_v60 = vshrl.u32 %v9616_v53, %v5700_v12  ;;  %v1788_v24 = vshll.u32 %v9610_v1, %v1776_v17 }
 0x18b   : > { %v1792_v15 = vshrl.u32 %v9608_v50, %v5700_v12  ;;  %v5734_v14 = vshrl.u32 %v1774_v13, 5  ;;  %v1783_v20 = vshrl.u32 %v9618_v63, %v5700_v12  ;;  %v1786_v48 = vshrl.u32 %v9610_v1, %v5700_v12 }
 0x18c   : > { %v5741_v62 = vadd.f32 %v460_v39, %v5591_v29  ;;  %v1779_v47 = vshll.u32 %v9620_v58, %v1776_v17  ;;  %v1790_v41 = vor.u32 %v1789_v25, %v1788_v24  ;;  %v1791_v37 = vshll.u32 %v9612_v55, %v1776_v17  ;;  %v5832_v39 = vld [vmem:[#allocation7 + $0x8] sm:$0xff] }
 0x18d   : > { %v1152_v36 = vand.u32 31, %v1150_v34  ;;  %v5745_v46 = vmul.f32 %v1116_v5, %v1114_v45  ;;  %v5747_v2 = vsel %vm4158_vm9, 0, %v4157_v52  ;;  %v1782_v13 = vshll.u32 %v9616_v53, %v1776_v17 }
 0x18e   : > { %v1785_v33 = vshll.u32 %v9618_v63, %v1776_v17  ;;  %v5751_v19 = vpop.eup %4505  ;;  %v5756_v29 = vsel %vm1036_vm6, %v1120_v57, %v5488_v9  ;;  %v1770_v4 = vor.u32 8388608, %v1769_v27  ;;  %v5758_v32 = vor.u32 %v1780_v60, %v1779_v47 }
 0x18f   : > { %v1793_v44 = vor.u32 %v1792_v15, %v1791_v37  ;;  %v5760_v51 = vor.u32 %v1783_v20, %v1782_v13  ;;  %vm1797_vm10 = vcmp.lt.s32.totalorder %v5734_v14, 4  ;;  %v1557_v28 = vand.u32 2139095040, %v5741_v62 }
 0x190   : > { %v1787_v7 = vor.u32 %v1786_v48, %v1785_v33  ;;  %v694_v17 = vsub.s32 4294967266, %v5747_v2  ;;  %v575_v49 = vadd.s32 536870912, %v5725_v54  ;;  %v1803_v52 = vsel %vm1797_vm10, %v1790_v41, 920167782 }
 0x191   : > { %v5768_v9 = vsub.s32 32, %v1152_v36  ;;  %v1118_v16 = vxor.u32 2147483648, %v5745_v46  ;;  %v674_v5 = vadd.s32 %v5492_v21, %v5497_v38  ;;  %vm1794_vm11 = vcmp.lt.s32.totalorder %v5734_v14, 1 }
 0x192   : > { %v5777_v57 = vpop.eup %4507  ;;  %vm1796_vm12 = vcmp.lt.s32.totalorder %v5734_v14, 3  ;;  %v1807_v25 = vsel %vm1797_vm10, %v1793_v44, 1326507024  ;;  %v9614_v45 = vand.u32 2147483647, %v5605_v43  ;;  %v1802_v27 = vsel %vm1794_vm11, %v5758_v32, %v5760_v51 }
 0x193   : > { %v1804_v60 = vsel %vm1796_vm12, %v1787_v7, %v1803_v52  ;;  %v5790_v21 = vshll.u32 %v1770_v4, 8  ;;  %v1558_v38 = vshrl.u32 %v1557_v28, 23  ;;  %v690_v24 = vsub.s32 32, %v5747_v2 }
 0x194   : > { %v695_v15 = vadd.s32 127, %v694_v17  ;;  %v5793_v20 = vshrl.u32 %v575_v49, 30  ;;  %v1165_v48 = vshrl.u32 %v9612_v55, %v5768_v9  ;;  %vm1795_vm13 = vcmp.lt.s32.totalorder %v5734_v14, 2 }
 0x195   : > { %v1806_v47 = vsel %vm1794_vm11, %v5760_v51, %v1787_v7  ;;  %v1808_v37 = vsel %vm1796_vm12, %v1790_v41, %v1807_v25  ;;  %v1168_v13 = vshrl.u32 %v9608_v50, %v5768_v9  ;;  %v1805_v33 = vsel %vm1795_vm13, %v1802_v27, %v1804_v60  ;;  %v365_v25 = vpop.permute.xlu0 %364 }
 0x196   : > { %v5807_v4 = vshrl.u32 %v1150_v34, 5  ;;  %v1156_v44 = vshrl.u32 %v9616_v53, %v5768_v9  ;;  %v1164_v28 = vshll.u32 %v9610_v1, %v1152_v36  ;;  %v1159_v17 = vshrl.u32 %v9618_v63, %v5768_v9 }
 0x197   : > { %v1162_v49 = vshrl.u32 %v9610_v1, %v5768_v9  ;;  %v1167_v41 = vshll.u32 %v9612_v55, %v1152_v36  ;;  %v4191_v52 = vadd.s32 4294967169, %v1558_v38  ;;  %v577_v23 = vshll.u32 %v5793_v20, 30 }
 0x198   : > { %v1809_v34 = vsel %vm1795_vm13, %v1806_v47, %v1808_v37  ;;  %v1155_v27 = vshll.u32 %v9620_v58, %v1152_v36  ;;  %v1166_v60 = vor.u32 %v1165_v48, %v1164_v28  ;;  %v1145_v3 = vand.u32 8388607, %v9614_v45 }
 0x199   : > { %v1158_v59 = vshll.u32 %v9616_v53, %v1152_v36  ;;  %v1161_v50 = vshll.u32 %v9618_v63, %v1152_v36  ;;  %v1169_v1 = vor.u32 %v1168_v13, %v1167_v41  ;;  %v463_v47 = vmul.f32 %v5832_v39, %v365_v25 }
 0x19a   : > { %v5826_v55 = vmul.u32.u64.low %v5790_v21, %v1805_v33  ;;  %v5827_v38 = vmul.u32.u64.high %v5790_v21, %v1805_v33, %v5826_v55  ;;  %v5830_v11 = vor.u32 %v1156_v44, %v1155_v27  ;;  %vm1173_vm14 = vcmp.lt.s32.totalorder %v5807_v4, 4  ;;  %v285_v27 = vld [vmem:[#allocation5] sm:$0xff] }
 0x19b   : > { %v5835_v48 = vor.u32 %v1159_v17, %v1158_v59  ;;  %v1163_v37 = vor.u32 %v1162_v49, %v1161_v50  ;;  %v1564_v28 = vadd.s32 1, %v4191_v52  ;;  %v696_v45 = vshll.u32 %v695_v15, 23 }
 0x19c   : > { %v5839_v36 = vmul.u32.u64.low %v5790_v21, %v1809_v34  ;;  %v5840_v13 = vmul.u32.u64.high %v5790_v21, %v1809_v34, %v5839_v36  ;;  %v1179_v33 = vsel %vm1173_vm14, %v1166_v60, 920167782  ;;  %vm1022_vm15 = vweird.f32 %v5118_v26 }
 0x19d   : > { %v691_v44 = vshll.u32 %v5626_v61, %v5747_v2  ;;  %v692_v41 = vshrl.u32 %v674_v5, %v690_v24  ;;  %v5848_v59 = vsub.s32 %v5725_v54, %v577_v23  ;;  %v1183_v50 = vsel %vm1173_vm14, %v1169_v1, 1326507024  ;;  %v5864_v23 = vld [vmem:[#allocation8 + $0x8] sm:$0xff] }
 0x19e   : > { %v1799_v15 = vsel %vm1797_vm10, %v1787_v7, 2102212464  ;;  %v1146_v17 = vor.u32 8388608, %v1145_v3  ;;  %vm1170_vm0 = vcmp.lt.s32.totalorder %v5807_v4, 1  ;;  %vm1172_vm1 = vcmp.lt.s32.totalorder %v5807_v4, 3 }
 0x19f   : > { %vm3874_vm2 = vcmask 523264   ;;  %vm1546_vm3 = vcmp.eq.s32.totalorder %v5705_v0, 0  ;;  %vm1549_vm4 = vcmp.eq.s32.totalorder %v5705_v0, 2  ;;  %v1178_v61 = vsel %vm1170_vm0, %v5830_v11, %v5835_v48 }
 0x1a0   : > { %v1180_v1 = vsel %vm1172_vm1, %v1163_v37, %v1179_v33  ;;  %vm1565_vm5 = vcmp.gt.s32.totalorder %v1564_v28, 0  ;;  %v5867_v3 = vadd.f32 %v5864_v23, %v463_v47  ;;  %v697_v54 = vor.u32 4788187, %v696_v45 }
 0x1a1   : > { %v1778_v2 = vshrl.u32 %v9620_v58, %v5700_v12  ;;  %v1182_v7 = vsel %vm1170_vm0, %v5835_v48, %v1163_v37  ;;  %v1184_v5 = vsel %vm1172_vm1, %v1166_v60, %v1183_v50  ;;  %v1547_v24 = vxor.u32 2147483648, %v5777_v57 }
 0x1a2   : > { %v1119_v49 = vsel %vm1036_vm6, %v1118_v16, %v5745_v46  ;;  %v693_v52 = vor.u32 %v692_v41, %v691_v44  ;;  %vm1171_vm7 = vcmp.lt.s32.totalorder %v5807_v4, 2  ;;  %v1800_v45 = vsel %vm1796_vm12, %v5760_v51, %v1799_v15 }
 0x1a3   : > { %v1798_v12 = vsel %vm1794_vm11, %v1778_v2, %v5758_v32  ;;  %v1181_v25 = vsel %vm1171_vm7, %v1178_v61, %v1180_v1  ;;  %v1566_v34 = vsel %vm1565_vm5, %v1564_v28, 0  ;;  %v1820_v60 = vadd.s32 1, %v5827_v38 }
 0x1a4   : > { %v1185_v46 = vsel %vm1171_vm7, %v1182_v7, %v1184_v5  ;;  %v5894_v16 = vshll.u32 %v1146_v17, 8  ;;  %v1869_v47 = vand.u32 2139095040, %v5867_v3  ;;  %v1122_v32 = vsel %vm5718_vm8, %v5233_v10, %v1119_v49 }
 0x1a5   : > { %v698_v36 = vand.u32 2147483647, %v697_v54  ;;  %v580_v51 = vsub.s32 0, %v5848_v59  ;;  %vm1819_vm6 = vc.u32 %v5840_v13, %v5826_v55  ;;  %v1801_v28 = vsel %vm1795_vm13, %v1798_v12, %v1800_v45 }
 0x1a6   : > { %v5906_v33 = vmul.u32.u64.low %v5894_v16, %v1181_v25  ;;  %v5907_v44 = vmul.u32.u64.high %v5894_v16, %v1181_v25, %v5906_v33  ;;  %v1568_v41 = vand.u32 31, %v1566_v34  ;;  %v3850_v50 = vmul.f32 %v5710_v56, %v285_v27 }
 0x1a7   : > { %v1033_v15 = vsel %vm1022_vm15, nan, %v5712_v6  ;;  %v5915_v17 = vmul.u32.u64.low %v5894_v16, %v1185_v46  ;;  %v5916_v61 = vmul.u32.u64.high %v5894_v16, %v1185_v46, %v5915_v17  ;;  %v9703_v14 = vsel %vm5718_vm8, 0, %v5756_v29 }
 0x1a8   : > { %v1127_v1 = vadd.s32 3, %v9703_v14  ;;  %v700_v54 = vcvt.s32.f32 %v693_v52  ;;  %v1821_v2 = vsel %vm1819_vm6, %v1820_v60, %v5827_v38  ;;  %v1870_v7 = vshrl.u32 %v1869_v47, 23 }
 0x1a9   : > { %v1548_v56 = vsel %vm1546_vm3, %v5751_v19, %v1547_v24  ;;  %v9704_v26 = vxor.u32 2147483648, %v5751_v19  ;;  %4509 = vcosq.f32 %v1122_v32  ;;  %v1817_v8 = vmul.u32 %v5790_v21, %v1801_v28  ;;  %v384_v28 = vpop.permute.xlu1 %383 }
 0x1aa   : > { %v701_v5 = vmul.f32 %v700_v54, %v698_v36  ;;  %v4152_v29 = vmin.u32 %v580_v51, %v5848_v59  ;;  %v1175_v38 = vsel %vm1173_vm14, %v1163_v37, 2102212464  ;;  %v5935_v49 = vsub.s32 32, %v1568_v41 }
 0x1ab   : > { %v1551_v6 = vsel %vm1549_vm4, %v9704_v26, %v5777_v57  ;;  %v5938_v52 = vsel %vm3874_vm2, %v3850_v50, 0.0  ;;  %vm1545_vm8 = vcmp.lt.s32.totalorder %v5705_v0, 2  ;;  %v5941_v19 = vadd.s32 %v1821_v2, %v1817_v8 }
 0x1ac   : > { %v1154_v57 = vshrl.u32 %v9620_v58, %v5768_v9  ;;  %v5945_v24 = vmul.f32 %v1033_v15, %v285_v27  ;;  %v1552_v21 = vsel %vm1545_vm8, %v1548_v56, %v1551_v6  ;;  %v5947_v12 = vand.u32 3, %v1127_v1 }
 0x1ad   : > { %v4203_v45 = vadd.s32 4294967169, %v1870_v7  ;;  %vm1542_vm9 = vweird.f32 %v5128_v42  ;;  %4511 = vsinq.f32 %v1122_v32  ;;  %vm620_vm10 = vcmp.lt.s32.totalorder %v5321_v31, 0 }
 0x1ae   : > { %v704_v37 = vsub.s32 4, %v5583_v30  ;;  %v1174_v0 = vsel %vm1170_vm0, %v1154_v57, %v5830_v11  ;;  %v1176_v9 = vsel %vm1172_vm1, %v5835_v48, %v1175_v38  ;;  %v702_v25 = vxor.u32 2147483648, %v701_v5 }
 0x1af   : > { %v582_v27 = vclz %v4152_v29  ;;  %v1196_v60 = vadd.s32 1, %v5907_v44  ;;  %v9705_v46 = vmov 920167782   ;;  %v1823_v32 = vadd.s32 536870912, %v5941_v19 }
 0x1b0   : > { %v1581_v47 = vshrl.u32 %v9705_v46, %v5935_v49  ;;  %vm1195_vm11 = vc.u32 %v5916_v61, %v5906_v33  ;;  %v9615_v36 = vand.u32 2147483647, %v5741_v62  ;;  %v9706_v11 = vmov 1326507024  }
 0x1b1   : > { %v1584_v51 = vshrl.u32 %v9706_v11, %v5935_v49  ;;  %v1177_v48 = vsel %vm1171_vm7, %v1174_v0, %v1176_v9  ;;  %v5969_v50 = vshrl.u32 %v1566_v34, 5  ;;  %v9707_v15 = vmov 2102212464  }
 0x1b2   : > { %v1580_v17 = vshll.u32 %v9707_v15, %v1568_v41  ;;  %v1876_v14 = vadd.s32 1, %v4203_v45  ;;  %v1572_v1 = vshrl.u32 %v9616_v53, %v5935_v49  ;;  %v1575_v54 = vshrl.u32 %v9618_v63, %v5935_v49 }
 0x1b3   : > { %v1578_v2 = vshrl.u32 %v9707_v15, %v5935_v49  ;;  %v1583_v7 = vshll.u32 %v9705_v46, %v1568_v41  ;;  %v9708_v56 = vand.u32 2147483647, %v5321_v31  ;;  %v4153_v34 = vadd.s32 4294967294, %v582_v27  ;;  %v4510_v29 = vpop.eup %4509 }
 0x1b4   : > { %v1197_v26 = vsel %vm1195_vm11, %v1196_v60, %v5907_v44  ;;  %v1582_v6 = vor.u32 %v1581_v47, %v1580_v17  ;;  %v467_v8 = vmul.f32 %v5832_v39, %v384_v28  ;;  %v1571_v38 = vshll.u32 %v9620_v58, %v1568_v41 }
 0x1b5   : > { %vm5981_vm12 = vcmp.le.f32.partialorder %v9708_v56, 0.7853982  ;;  %v1574_v57 = vshll.u32 %v9616_v53, %v1568_v41  ;;  %v1577_v45 = vshll.u32 %v9618_v63, %v1568_v41  ;;  %v1585_v0 = vor.u32 %v1584_v51, %v1583_v7 }
 0x1b6   : > { %v5990_v9 = vshrl.u32 %v1823_v32, 30  ;;  %v1193_v56 = vmul.u32 %v5894_v16, %v1177_v48  ;;  %v1561_v27 = vand.u32 8388607, %v9615_v36  ;;  %vm1877_vm13 = vcmp.gt.s32.totalorder %v1876_v14, 0 }
 0x1b7   : > { %v5995_v44 = vor.u32 %v1572_v1, %v1571_v38  ;;  %v5997_v60 = vor.u32 %v1575_v54, %v1574_v57  ;;  %v1579_v39 = vor.u32 %v1578_v2, %v1577_v45  ;;  %vm1589_vm14 = vcmp.lt.s32.totalorder %v5969_v50, 4  ;;  %v4512_v51 = vpop.eup %4511 }
 0x1b8   : > { %v1553_v47 = vsel %vm1542_vm9, nan, %v1552_v21  ;;  %v6005_v41 = vsel %vm620_vm10, %v704_v37, %v5583_v30  ;;  %v6007_v16 = vadd.s32 %v1197_v26, %v1193_v56  ;;  %v1595_v32 = vsel %vm1589_vm14, %v1582_v6, 920167782  ;;  %v6015_v21 = vld [vmem:[#allocation5 + $0x8] sm:$0xff] }
 0x1b9   : > { %v1134_v28 = vxor.u32 2147483648, %v4510_v29  ;;  %v703_v48 = vsel %vm620_vm10, %v702_v25, %v701_v5  ;;  %v1599_v17 = vsel %vm1589_vm14, %v1585_v0, 1326507024  ;;  %v1878_v42 = vsel %vm1877_vm13, %v1876_v14, 0 }
 0x1ba   : > { %vm1130_vm15 = vcmp.eq.s32.totalorder %v5947_v12, 0  ;;  %vm4154_vm0 = vcmp.lt.s32.totalorder %v4153_v34, 0  ;;  %vm1586_vm1 = vcmp.lt.s32.totalorder %v5969_v50, 1  ;;  %vm1588_vm3 = vcmp.lt.s32.totalorder %v5969_v50, 3 }
 0x1bb   : > { %v6021_v30 = vadd.f32 %v5864_v23, %v467_v8  ;;  %v1825_v37 = vshll.u32 %v5990_v9, 30  ;;  %v1562_v1 = vor.u32 8388608, %v1561_v27  ;;  %v1594_v5 = vsel %vm1586_vm1, %v5995_v44, %v5997_v60 }
 0x1bc   : > { %v1596_v25 = vsel %vm1588_vm3, %v1579_v39, %v1595_v32  ;;  %v1199_v14 = vadd.s32 536870912, %v6007_v16  ;;  %v1598_v54 = vsel %vm1586_vm1, %v5997_v60, %v1579_v39  ;;  %v1600_v23 = vsel %vm1588_vm3, %v1582_v6, %v1599_v17 }
 0x1bd   : > { %9711 = vst [vmem:[#allocation15_spill] sm:$0xff] %v6021_v30  ;;  %v1880_v2 = vand.u32 31, %v1878_v42  ;;  %v6037_v7 = vmul.f32 %v1553_v47, %v6015_v21  ;;  %vm1133_vm4 = vcmp.eq.s32.totalorder %v5947_v12, 2  ;;  %vm1587_vm5 = vcmp.lt.s32.totalorder %v5969_v50, 2 }
 0x1be   : > { %v570_v8 = vadd.s32 %v5649_v18, %v5657_v22  ;;  %v6047_v38 = vsel %vm4154_vm0, 0, %v4153_v34  ;;  %v1597_v6 = vsel %vm1587_vm5, %v1594_v5, %v1596_v25  ;;  %v2285_v57 = vand.u32 2139095040, %v6021_v30 }
 0x1bf   : > { %v1131_v45 = vxor.u32 2147483648, %v4512_v51  ;;  %v706_v0 = vsel %vm5981_vm12, %v5321_v31, %v703_v48  ;;  %v1601_v56 = vsel %vm1587_vm5, %v1598_v54, %v1600_v23  ;;  %v6057_v27 = vshll.u32 %v1562_v1, 8 }
 0x1c0   : > { %v6059_v47 = vsel %vm1133_vm4, %v1134_v28, %v4512_v51  ;;  %v6062_v18 = vsub.s32 %v5941_v19, %v1825_v37  ;;  %v6064_v22 = vshrl.u32 %v1199_v14, 30  ;;  %v6066_v34 = vsub.s32 32, %v1880_v2 }
 0x1c1   : > { %v586_v32 = vsub.s32 32, %v6047_v38  ;;  %v590_v17 = vsub.s32 4294967266, %v6047_v38  ;;  %v6071_v48 = vmul.u32.u64.low %v6057_v27, %v1597_v6  ;;  %v6072_v5 = vmul.u32.u64.high %v6057_v27, %v1597_v6, %v6071_v48 }
 0x1c2   : > { %4513 = vcosq.f32 %v706_v0  ;;  %v6076_v51 = vmul.u32.u64.low %v6057_v27, %v1601_v56  ;;  %v6077_v28 = vmul.u32.u64.high %v6057_v27, %v1601_v56, %v6076_v51  ;;  %v2286_v19 = vshrl.u32 %v2285_v57, 23 }
 0x1c3   : > { %v6081_v37 = vsel %vm1130_vm15, %v4510_v29, %v1131_v45  ;;  %4515 = vsinq.f32 %v706_v0  ;;  %v1591_v25 = vsel %vm1589_vm14, %v1579_v39, 2102212464  ;;  %v1828_v14 = vsub.s32 0, %v6062_v18 }
 0x1c4   : > { %v1201_v54 = vshll.u32 %v6064_v22, 30  ;;  %v1570_v23 = vshrl.u32 %v9620_v58, %v5935_v49  ;;  %v1896_v6 = vshrl.u32 %v9706_v11, %v6066_v34  ;;  %v588_v57 = vshrl.u32 %v570_v8, %v586_v32 }
 0x1c5   : > { %v591_v56 = vadd.s32 127, %v590_v17  ;;  %v1893_v45 = vshrl.u32 %v9705_v46, %v6066_v34  ;;  %v1592_v0 = vsel %vm1588_vm3, %v5997_v60, %v1591_v25  ;;  %v1895_v49 = vshll.u32 %v9705_v46, %v1880_v2 }
 0x1c6   : > { %v1590_v39 = vsel %vm1586_vm1, %v1570_v23, %v5995_v44  ;;  %v4219_v51 = vadd.s32 4294967169, %v2286_v19  ;;  %v6102_v36 = vshrl.u32 %v1878_v42, 5  ;;  %v1887_v8 = vshrl.u32 %v9618_v63, %v6066_v34 }
 0x1c7   : > { %v1890_v32 = vshrl.u32 %v9707_v15, %v6066_v34  ;;  %v1892_v17 = vshll.u32 %v9707_v15, %v1880_v2  ;;  %v4200_v1 = vmin.u32 %v1828_v14, %v6062_v18  ;;  %v6111_v44 = vsub.s32 %v6007_v16, %v1201_v54 }
 0x1c8   : > { %v1884_v60 = vshrl.u32 %v9616_v53, %v6066_v34  ;;  %v1897_v25 = vor.u32 %v1896_v6, %v1895_v49  ;;  %v1612_v42 = vadd.s32 1, %v6072_v5  ;;  %v1886_v19 = vshll.u32 %v9616_v53, %v1880_v2 }
 0x1c9   : > { %v1889_v23 = vshll.u32 %v9618_v63, %v1880_v2  ;;  %v1894_v26 = vor.u32 %v1893_v45, %v1892_v17  ;;  %vm1129_vm7 = vcmp.lt.s32.totalorder %v5947_v12, 2  ;;  %v1593_v29 = vsel %vm1587_vm5, %v1590_v39, %v1592_v0  ;;  %v380_v45 = vpop.permute.xlu0 %379 }
 0x1ca   : > { %vm1611_vm6 = vc.u32 %v6077_v28, %v6071_v48  ;;  %v1883_v16 = vshll.u32 %v9620_v58, %v1880_v2  ;;  %v2292_v14 = vadd.s32 1, %v4219_v51  ;;  %vm516_vm8 = vcmp.lt.s32.totalorder %v5437_v35, 0 }
 0x1cb   : > { %v9712_v54 = vand.u32 2147483647, %v5867_v3  ;;  %v6127_v49 = vor.u32 %v1887_v8, %v1886_v19  ;;  %v1891_v53 = vor.u32 %v1890_v32, %v1889_v23  ;;  %vm1901_vm9 = vcmp.lt.s32.totalorder %v6102_v36, 4 }
 0x1cc   : > { %v6130_v17 = vpop.eup %4513  ;;  %v592_v50 = vshll.u32 %v591_v56, 23  ;;  %v1830_v39 = vclz %v4200_v1  ;;  %v1885_v0 = vor.u32 %v1884_v60, %v1883_v16  ;;  %v1911_v2 = vsel %vm1901_vm9, %v1897_v25, 1326507024 }
 0x1cd   : > { %v1873_v6 = vand.u32 8388607, %v9712_v54  ;;  %v6134_v51 = vpop.eup %4515  ;;  %v1204_v63 = vsub.s32 0, %v6111_v44  ;;  %v1609_v54 = vmul.u32 %v6057_v27, %v1593_v29  ;;  %v1613_v8 = vsel %vm1611_vm6, %v1612_v42, %v6072_v5  ;;  %v6153_v27 = vld [vmem:[#allocation7] sm:$0xff] }
 0x1ce   : > { %v1907_v32 = vsel %vm1901_vm9, %v1894_v26, 920167782  ;;  %vm1126_vm10 = vweird.f32 %v5233_v10  ;;  %v9713_v1 = vand.u32 2147483647, %v5437_v35  ;;  %vm1898_vm13 = vcmp.lt.s32.totalorder %v6102_v36, 1 }
 0x1cf   : > { %vm1900_vm14 = vcmp.lt.s32.totalorder %v6102_v36, 3  ;;  %vm2293_vm15 = vcmp.gt.s32.totalorder %v2292_v14, 0  ;;  %v466_v5 = vmul.f32 %v6153_v27, %v380_v45  ;;  %v587_v29 = vshll.u32 %v5848_v59, %v6047_v38 }
 0x1d0   : > { %vm6147_vm11 = vcmp.le.f32.partialorder %v9713_v1, 0.7853982  ;;  %v1874_v60 = vor.u32 8388608, %v1873_v6  ;;  %v1910_v25 = vsel %vm1898_vm13, %v6127_v49, %v1891_v53  ;;  %v1912_v42 = vsel %vm1900_vm14, %v1894_v26, %v1911_v2  ;;  %v6176_v2 = vld [vmem:[#allocation8] sm:$0xff] }
 0x1d1   : > { %v593_v19 = vor.u32 4788187, %v592_v50  ;;  %v6163_v23 = vadd.s32 %v1613_v8, %v1609_v54  ;;  %v1906_v16 = vsel %vm1898_vm13, %v1885_v0, %v6127_v49  ;;  %v1908_v45 = vsel %vm1900_vm14, %v1891_v53, %v1907_v32  ;;  %9716 = vst [vmem:[#allocation16_spill] sm:$0xff] %v6176_v2 }
 0x1d2   : > { %v589_v1 = vor.u32 %v588_v57, %v587_v29  ;;  %v4176_v59 = vmin.u32 %v1204_v63, %v6111_v44  ;;  %vm1899_vm0 = vcmp.lt.s32.totalorder %v6102_v36, 2  ;;  %v2294_v38 = vsel %vm2293_vm15, %v2292_v14, 0 }
 0x1d3   : > { %v3902_v6 = vsel %vm3874_vm2, %v6037_v7, 0.0  ;;  %v4201_v26 = vadd.s32 4294967294, %v1830_v39  ;;  %v1913_v50 = vsel %vm1899_vm0, %v1910_v25, %v1912_v42  ;;  %v6179_v54 = vadd.f32 %v6176_v2, %v466_v5 }
 0x1d4   : > { %v1136_v63 = vsel %vm1129_vm7, %v6081_v37, %v6059_v47  ;;  %v9717_v57 = vsel %vm5981_vm12, 0, %v6005_v41  ;;  %v1909_v7 = vsel %vm1899_vm0, %v1906_v16, %v1908_v45  ;;  %v6191_v39 = vshll.u32 %v1874_v60, 8 }
 0x1d5   : > { %v711_v14 = vadd.s32 3, %v9717_v57  ;;  %v594_v8 = vand.u32 2147483647, %v593_v19  ;;  %v9718_v32 = vsub.s32 4, %v5793_v20  ;;  %v1615_v12 = vadd.s32 536870912, %v6163_v23 }
 0x1d6   : > { %v2296_v47 = vand.u32 31, %v2294_v38  ;;  %v596_v37 = vcvt.s32.f32 %v589_v1  ;;  %v1206_v4 = vclz %v4176_v59  ;;  %vm4202_vm12 = vcmp.lt.s32.totalorder %v4201_v26, 0 }
 0x1d7   : > { %v601_v5 = vsel %vm516_vm8, %v9718_v32, %v5793_v20  ;;  %v6200_v41 = vmul.u32.u64.low %v6191_v39, %v1913_v50  ;;  %v6201_v29 = vmul.u32.u64.high %v6191_v39, %v1913_v50, %v6200_v41  ;;  %v2181_v42 = vand.u32 2139095040, %v6179_v54 }
 0x1d8   : > { %v6204_v60 = vmul.u32.u64.low %v6191_v39, %v1909_v7  ;;  %v6205_v25 = vmul.u32.u64.high %v6191_v39, %v1909_v7, %v6204_v60  ;;  %v6211_v20 = vsel %vm3874_vm2, %v5945_v24, 0.0  ;;  %v1137_v19 = vsel %vm1126_vm10, nan, %v1136_v63 }
 0x1d9   : > { %9719 = vst [vmem:[#allocation17_spill] sm:$0xff] %v6211_v20  ;;  %v603_v16 = vsel %vm6147_vm11, 0, %v601_v5  ;;  %v1903_v45 = vsel %vm1901_vm9, %v1891_v53, 2102212464  ;;  %v597_v1 = vmul.f32 %v596_v37, %v594_v8  ;;  %v6219_v59 = vshrl.u32 %v1615_v12, 30 }
 0x1da   : > { %v1882_v50 = vshrl.u32 %v9620_v58, %v6066_v34  ;;  %v6223_v57 = vsub.s32 32, %v2296_v47  ;;  %v6226_v24 = vadd.f32 %v3902_v6, %v5938_v52  ;;  %v6228_v7 = vand.u32 3, %v711_v14 }
 0x1db   : > { %v6230_v10 = vsel %vm4202_vm12, 0, %v4201_v26  ;;  %v4177_v63 = vadd.s32 4294967294, %v1206_v4  ;;  %v6233_v32 = vmul.f32 %v1137_v19, %v6015_v21  ;;  %v1904_v34 = vsel %vm1900_vm14, %v6127_v49, %v1903_v45 }
 0x1dc   : > { %9720 = vst [vmem:[#allocation18_spill] sm:$0xff] %v6226_v24  ;;  %v1902_v53 = vsel %vm1898_vm13, %v1882_v50, %v1885_v0  ;;  %v2182_v8 = vshrl.u32 %v2181_v42, 23  ;;  %v6242_v6 = vadd.s32 3, %v603_v16  ;;  %v1818_v26 = vadd.s32 %v5826_v55, %v5840_v13 }
 0x1dd   : > { %9721 = vst [vmem:[#allocation19_spill] sm:$0xff] %v6233_v32  ;;  %v598_v14 = vxor.u32 2147483648, %v597_v1  ;;  %v1838_v12 = vsub.s32 4294967266, %v6230_v10  ;;  %v1617_v37 = vshll.u32 %v6219_v59, 30  ;;  %v2312_v0 = vshrl.u32 %v9706_v11, %v6223_v57 }
 0x1de   : > { %vm4178_vm1 = vcmp.lt.s32.totalorder %v4177_v63, 0  ;;  %v1905_v49 = vsel %vm1899_vm0, %v1902_v53, %v1904_v34  ;;  %v2309_v41 = vshrl.u32 %v9705_v46, %v6223_v57  ;;  %vm1923_vm3 = vc.u32 %v6201_v29, %v6204_v60 }
 0x1df   : > { %v1924_v55 = vadd.s32 1, %v6205_v25  ;;  %v2311_v13 = vshll.u32 %v9705_v46, %v2296_v47  ;;  %v4215_v42 = vadd.s32 4294967169, %v2182_v8  ;;  %v6259_v19 = vshrl.u32 %v2294_v38, 5 }
 0x1e0   : > { %v9722_v16 = vmov 2131351028   ;;  %v2306_v36 = vshrl.u32 %v9707_v15, %v6223_v57  ;;  %v2308_v50 = vshll.u32 %v9707_v15, %v2296_v47  ;;  %v1839_v53 = vadd.s32 127, %v1838_v12 }
 0x1e1   : > { %v2303_v45 = vshrl.u32 %v9722_v16, %v6223_v57  ;;  %v6267_v34 = vsub.s32 %v6163_v23, %v1617_v37  ;;  %v9723_v5 = vmov 2475754826   ;;  %v2313_v4 = vor.u32 %v2312_v0, %v2311_v13 }
 0x1e2   : > { %v2300_v52 = vshrl.u32 %v9723_v5, %v6223_v57  ;;  %v6272_v8 = vsel %vm4178_vm1, 0, %v4177_v63  ;;  %v2302_v38 = vshll.u32 %v9723_v5, %v2296_v47  ;;  %v2305_v58 = vshll.u32 %v9722_v16, %v2296_v47 }
 0x1e3   : > { %v2310_v24 = vor.u32 %v2309_v41, %v2308_v50  ;;  %v1921_v20 = vmul.u32 %v6191_v39, %v1905_v49  ;;  %v1925_v23 = vsel %vm1923_vm3, %v1924_v55, %v6205_v25  ;;  %v9724_v12 = vmov 683565275   ;;  %v6292_v55 = vld [vmem:[#allocation7 + $0x18] sm:$0xff] }
 0x1e4   : > { %v2299_v37 = vshll.u32 %v9724_v12, %v2296_v47  ;;  %v2188_v2 = vadd.s32 1, %v4215_v42  ;;  %v9725_v0 = vand.u32 2147483647, %v6021_v30  ;;  %v6284_v63 = vor.u32 %v2303_v45, %v2302_v38  ;;  %9726 = vst [vmem:[#allocation20_spill] sm:$0xff] %v6292_v55  ;;  %v335_v47 = vpop.permute.xlu1 %334 }
 0x1e5   : > { %v2307_v32 = vor.u32 %v2306_v36, %v2305_v58  ;;  %vm2317_vm4 = vcmp.lt.s32.totalorder %v6259_v19, 4  ;;  %v599_v41 = vsel %vm516_vm8, %v598_v14, %v597_v1  ;;  %v1620_v39 = vsub.s32 0, %v6267_v34 }
 0x1e6   : > { %v2289_v13 = vand.u32 8388607, %v9725_v0  ;;  %v2301_v49 = vor.u32 %v2300_v52, %v2299_v37  ;;  %v2327_v25 = vsel %vm2317_vm4, %v2313_v4, 1326507024  ;;  %v1834_v42 = vsub.s32 32, %v6230_v10  ;;  %v6316_v37 = vld [vmem:[#allocation8 + $0x18] sm:$0xff] }
 0x1e7   : > { %v1840_v50 = vshll.u32 %v1839_v53, 23  ;;  %v6295_v45 = vadd.s32 %v1925_v23, %v1921_v20  ;;  %v2323_v58 = vsel %vm2317_vm4, %v2310_v24, 920167782  ;;  %v1214_v36 = vsub.s32 4294967266, %v6272_v8  ;;  %9727 = vst [vmem:[#allocation21_spill] sm:$0xff] %v6316_v37 }
 0x1e8   : > { %vm2314_vm5 = vcmp.lt.s32.totalorder %v6259_v19, 1  ;;  %vm2316_vm7 = vcmp.lt.s32.totalorder %v6259_v19, 3  ;;  %vm2189_vm6 = vcmp.gt.s32.totalorder %v2188_v2, 0  ;;  %v2290_v1 = vor.u32 8388608, %v2289_v13 }
 0x1e9   : > { %v2326_v52 = vsel %vm2314_vm5, %v6284_v63, %v2307_v32  ;;  %v2328_v14 = vsel %vm2316_vm7, %v2310_v24, %v2327_v25  ;;  %v457_v20 = vmul.f32 %v335_v47, %v6292_v55  ;;  %vm717_vm8 = vcmp.eq.s32.totalorder %v6228_v7, 2 }
 0x1ea   : > { %v1210_v4 = vsub.s32 32, %v6272_v8  ;;  %v4192_v53 = vmin.u32 %v1620_v39, %v6267_v34  ;;  %v2322_v38 = vsel %vm2314_vm5, %v2301_v49, %v6284_v63  ;;  %v2324_v23 = vsel %vm2316_vm7, %v2307_v32, %v2323_v58 }
 0x1eb   : > { %vm714_vm9 = vcmp.eq.s32.totalorder %v6228_v7, 0  ;;  %v1836_v24 = vshrl.u32 %v1818_v26, %v1834_v42  ;;  %v1927_v0 = vadd.s32 536870912, %v6295_v45  ;;  %vm2315_vm10 = vcmp.lt.s32.totalorder %v6259_v19, 2 }
 0x1ec   : > { %v2190_v13 = vsel %vm2189_vm6, %v2188_v2, 0  ;;  %vm1764_vm13 = vcmp.lt.s32.totalorder %v5553_v40, 0  ;;  %v1835_v39 = vshll.u32 %v6062_v18, %v6230_v10  ;;  %v1841_v25 = vor.u32 4788187, %v1840_v50 }
 0x1ed   : > { %v1194_v47 = vadd.s32 %v5906_v33, %v5916_v61  ;;  %v2329_v58 = vsel %vm2315_vm10, %v2326_v52, %v2328_v14  ;;  %v1215_v55 = vadd.s32 127, %v1214_v36  ;;  %v2325_v26 = vsel %vm2315_vm10, %v2322_v38, %v2324_v23 }
 0x1ee   : > { %v6330_v42 = vshll.u32 %v2290_v1, 8  ;;  %v6333_v2 = vadd.f32 %v457_v20, %v6316_v37  ;;  %v602_v18 = vsel %vm6147_vm11, %v5437_v35, %v599_v41  ;;  %v1622_v50 = vclz %v4192_v53 }
 0x1ef   : > { %v1212_v10 = vshrl.u32 %v1194_v47, %v1210_v4  ;;  %v2192_v30 = vand.u32 31, %v2190_v13  ;;  %v1837_v33 = vor.u32 %v1836_v24, %v1835_v39  ;;  %v6338_v61 = vshrl.u32 %v1927_v0, 30 }
 0x1f0   : > { %v6341_v36 = vmul.u32.u64.low %v6330_v42, %v2329_v58  ;;  %v6342_v52 = vmul.u32.u64.high %v6330_v42, %v2329_v58, %v6341_v36  ;;  %v1848_v1 = vsub.s32 4, %v5990_v9  ;;  %v1211_v14 = vshll.u32 %v6111_v44, %v6272_v8 }
 0x1f1   : > { %v6348_v20 = vmul.u32.u64.low %v6330_v42, %v2325_v26  ;;  %v6349_v38 = vmul.u32.u64.high %v6330_v42, %v2325_v26, %v6348_v20  ;;  %v1842_v56 = vand.u32 2147483647, %v1841_v25  ;;  %v1216_v41 = vshll.u32 %v1215_v55, 23 }
 0x1f2   : > { %v2319_v4 = vsel %vm2317_vm4, %v2307_v32, 2102212464  ;;  %v1245_v53 = vand.u32 2139095040, %v6333_v2  ;;  %v1213_v23 = vor.u32 %v1212_v10, %v1211_v14  ;;  %v4193_v24 = vadd.s32 4294967294, %v1622_v50 }
 0x1f3   : > { %v2298_v0 = vshrl.u32 %v9724_v12, %v6223_v57  ;;  %v6357_v39 = vsub.s32 32, %v2192_v30  ;;  %v9728_v44 = vxor.u32 2147483648, %v6130_v17  ;;  %4517 = vcosq.f32 %v602_v18 }
 0x1f4   : > { %v1844_v55 = vcvt.s32.f32 %v1837_v33  ;;  %v1929_v25 = vshll.u32 %v6338_v61, 30  ;;  %v9729_v32 = vxor.u32 2147483648, %v6134_v51  ;;  %4519 = vsinq.f32 %v602_v18 }
 0x1f5   : > { %v719_v8 = vsel %vm717_vm8, %v9728_v44, %v6134_v51  ;;  %v2318_v57 = vsel %vm2314_vm5, %v2298_v0, %v2301_v49  ;;  %v2320_v58 = vsel %vm2316_vm7, %v6284_v63, %v2319_v4  ;;  %vm713_vm11 = vcmp.lt.s32.totalorder %v6228_v7, 2 }
 0x1f6   : > { %v716_v47 = vsel %vm714_vm9, %v6130_v17, %v9729_v32  ;;  %v6376_v26 = vmul.f32 %v1844_v55, %v1842_v56  ;;  %v6381_v51 = vsel %vm1764_vm13, %v1848_v1, %v5990_v9  ;;  %v1217_v10 = vor.u32 4788187, %v1216_v41 }
 0x1f7   : > { %v1246_v50 = vshrl.u32 %v1245_v53, 23  ;;  %v9730_v17 = vand.u32 2147483647, %v5553_v40  ;;  %v1220_v49 = vcvt.s32.f32 %v1213_v23  ;;  %vm4194_vm15 = vcmp.lt.s32.totalorder %v4193_v24, 0 }
 0x1f8   : > { %v9626_v63 = vand.u32 2147483647, %v6179_v54  ;;  %v2205_v33 = vshrl.u32 %v9705_v46, %v6357_v39  ;;  %v6393_v36 = vsub.s32 %v6295_v45, %v1929_v25  ;;  %v2321_v9 = vsel %vm2315_vm10, %v2318_v57, %v2320_v58 }
 0x1f9   : > { %vm6385_vm14 = vcmp.le.f32.partialorder %v9730_v17, 0.7853982  ;;  %vm2339_vm0 = vc.u32 %v6342_v52, %v6348_v20  ;;  %v2208_v1 = vshrl.u32 %v9706_v11, %v6357_v39  ;;  %v2340_v14 = vadd.s32 1, %v6349_v38 }
 0x1fa   : > { %v6402_v56 = vshrl.u32 %v2190_v13, 5  ;;  %v2196_v41 = vshrl.u32 %v9723_v5, %v6357_v39  ;;  %v2204_v4 = vshll.u32 %v9707_v15, %v2192_v30  ;;  %v2199_v45 = vshrl.u32 %v9722_v16, %v6357_v39 }
 0x1fb   : > { %v2202_v19 = vshrl.u32 %v9707_v15, %v6357_v39  ;;  %v2207_v53 = vshll.u32 %v9705_v46, %v2192_v30  ;;  %v4179_v23 = vadd.s32 4294967169, %v1246_v50  ;;  %vm710_vm12 = vweird.f32 %v5321_v31 }
 0x1fc   : > { %v1218_v0 = vand.u32 2147483647, %v1217_v10  ;;  %v6414_v13 = vsel %vm4194_vm15, 0, %v4193_v24  ;;  %v2195_v44 = vshll.u32 %v9724_v12, %v2192_v30  ;;  %v2206_v55 = vor.u32 %v2205_v33, %v2204_v4 }
 0x1fd   : > { %v2185_v25 = vand.u32 8388607, %v9626_v63  ;;  %v2198_v32 = vshll.u32 %v9723_v5, %v2192_v30  ;;  %v2201_v57 = vshll.u32 %v9722_v16, %v2192_v30  ;;  %v2209_v58 = vor.u32 %v2208_v1, %v2207_v53  ;;  %v6429_v33 = vpop.eup %4517 }
 0x1fe   : > { %v1932_v17 = vsub.s32 0, %v6393_v36  ;;  %v2337_v50 = vmul.u32 %v6330_v42, %v2321_v9  ;;  %v2341_v24 = vsel %vm2339_vm0, %v2340_v14, %v6349_v38  ;;  %v6427_v10 = vor.u32 %v2196_v41, %v2195_v44  ;;  %v6435_v1 = vpop.eup %4519 }
 0x1ff   : > { %vm1140_vm1 = vcmp.lt.s32.totalorder %v5605_v43, 0  ;;  %v6432_v4 = vor.u32 %v2199_v45, %v2198_v32  ;;  %v2203_v63 = vor.u32 %v2202_v19, %v2201_v57  ;;  %vm2213_vm3 = vcmp.lt.s32.totalorder %v6402_v56, 4 }
 0x200   : > { %v1252_v30 = vadd.s32 1, %v4179_v23  ;;  %v720_v42 = vsel %vm713_vm11, %v716_v47, %v719_v8  ;;  %v6440_v9 = vand.u32 3, %v6242_v6  ;;  %v1221_v38 = vmul.f32 %v1220_v49, %v1218_v0 }
 0x201   : > { %v2219_v14 = vsel %vm2213_vm3, %v2206_v55, 920167782  ;;  %v1846_v41 = vxor.u32 2147483648, %v6376_v26  ;;  %v1851_v45 = vsel %vm6385_vm14, 0, %v6381_v51  ;;  %v6448_v19 = vadd.s32 %v2341_v24, %v2337_v50 }
 0x202   : > { %v2223_v53 = vsel %vm2213_vm3, %v2209_v58, 1326507024  ;;  %v1630_v7 = vsub.s32 4294967266, %v6414_v13  ;;  %v4204_v6 = vmin.u32 %v1932_v17, %v6393_v36  ;;  %vm2210_vm4 = vcmp.lt.s32.totalorder %v6402_v56, 1 }
 0x203   : > { %vm2212_vm5 = vcmp.lt.s32.totalorder %v6402_v56, 3  ;;  %v9733_v8 = vand.u32 2147483647, %v5605_v43  ;;  %v2186_v51 = vor.u32 8388608, %v2185_v25  ;;  %v2218_v49 = vsel %vm2210_vm4, %v6427_v10, %v6432_v4 }
 0x204   : > { %v2220_v23 = vsel %vm2212_vm5, %v2203_v63, %v2219_v14  ;;  %vm1253_vm6 = vcmp.gt.s32.totalorder %v1252_v30, 0  ;;  %v1222_v0 = vxor.u32 2147483648, %v1221_v38  ;;  %v1626_v44 = vsub.s32 32, %v6414_v13 }
 0x205   : > { %vm6458_vm7 = vcmp.le.f32.partialorder %v9733_v8, 0.7853982  ;;  %v2222_v32 = vsel %vm2210_vm4, %v6432_v4, %v2203_v63  ;;  %v2224_v57 = vsel %vm2212_vm5, %v2206_v55, %v2223_v53  ;;  %v721_v25 = vsel %vm710_vm12, nan, %v720_v42 }
 0x206   : > { %vm613_vm8 = vcmp.eq.s32.totalorder %v6440_v9, 2  ;;  %v2343_v58 = vadd.s32 536870912, %v6448_v19  ;;  %vm2211_vm9 = vcmp.lt.s32.totalorder %v6402_v56, 2  ;;  %vm610_vm10 = vcmp.eq.s32.totalorder %v6440_v9, 0 }
 0x207   : > { %v1610_v17 = vadd.s32 %v6071_v48, %v6077_v28  ;;  %v1631_v50 = vadd.s32 127, %v1630_v7  ;;  %v2221_v24 = vsel %vm2211_vm9, %v2218_v49, %v2220_v23  ;;  %v1254_v14 = vsel %vm1253_vm6, %v1252_v30, 0 }
 0x208   : > { %v1855_v55 = vadd.s32 3, %v1851_v45  ;;  %v1934_v53 = vclz %v4204_v6  ;;  %v2225_v31 = vsel %vm2211_vm9, %v2222_v32, %v2224_v57  ;;  %v6486_v42 = vshll.u32 %v2186_v51, 8 }
 0x209   : > { %v1847_v8 = vsel %vm1764_vm13, %v1846_v41, %v6376_v26  ;;  %v1223_v37 = vsel %vm1140_vm1, %v1222_v0, %v1221_v38  ;;  %v1224_v48 = vsub.s32 4, %v6064_v22  ;;  %v1628_v28 = vshrl.u32 %v1610_v17, %v1626_v44 }
 0x20a   : > { %v6494_v7 = vshrl.u32 %v2343_v58, 30  ;;  %v6497_v30 = vmul.u32.u64.low %v6486_v42, %v2221_v24  ;;  %v6498_v45 = vmul.u32.u64.high %v6486_v42, %v2221_v24, %v6497_v30  ;;  %v1256_v6 = vand.u32 31, %v1254_v14 }
 0x20b   : > { %v614_v51 = vxor.u32 2147483648, %v6429_v33  ;;  %v1632_v49 = vshll.u32 %v1631_v50, 23  ;;  %v6503_v23 = vmul.u32.u64.low %v6486_v42, %v2225_v31  ;;  %v6504_v26 = vmul.u32.u64.high %v6486_v42, %v2225_v31, %v6503_v23 }
 0x20c   : > { %v611_v38 = vxor.u32 2147483648, %v6435_v1  ;;  %v1850_v41 = vsel %vm6385_vm14, %v5553_v40, %v1847_v8  ;;  %v1627_v0 = vshll.u32 %v6267_v34, %v6414_v13  ;;  %v4205_v44 = vadd.s32 4294967294, %v1934_v53 }
 0x20d   : > { %v6513_v32 = vmul.f32 %v721_v25, %v6015_v21  ;;  %v6515_v57 = vand.u32 3, %v1855_v55  ;;  %v6520_v58 = vsel %vm1140_vm1, %v1224_v48, %v6064_v22  ;;  %v1226_v17 = vsel %vm6458_vm7, %v5605_v43, %v1223_v37  ;;  %v312_v21 = vpop.permute.xlu0 %311 }
 0x20e   : > { %v1629_v18 = vor.u32 %v1628_v28, %v1627_v0  ;;  %v2345_v50 = vshll.u32 %v6494_v7, 30  ;;  %v2215_v34 = vsel %vm2213_vm3, %v2203_v63, 2102212464  ;;  %v6528_v13 = vsub.s32 32, %v1256_v6 }
 0x20f   : > { %v615_v25 = vsel %vm613_vm8, %v614_v51, %v6435_v1  ;;  %4521 = vcosq.f32 %v1850_v41  ;;  %v1633_v22 = vor.u32 4788187, %v1632_v49  ;;  %v2194_v24 = vshrl.u32 %v9724_v12, %v6357_v39  ;;  %v6547_v39 = vld [vmem:[#allocation7 + $0x10] sm:$0xff] }
 0x210   : > { %v612_v37 = vsel %vm610_vm10, %v6429_v33, %v611_v38  ;;  %4523 = vsinq.f32 %v1850_v41  ;;  %v1227_v63 = vsel %vm6458_vm7, 0, %v6520_v58  ;;  %vm4206_vm13 = vcmp.lt.s32.totalorder %v4205_v44, 0 }
 0x211   : > { %4525 = vcosq.f32 %v1226_v17  ;;  %v2214_v1 = vsel %vm2210_vm4, %v2194_v24, %v6427_v10  ;;  %v2216_v55 = vsel %vm2212_vm5, %v6432_v4, %v2215_v34  ;;  %v452_v53 = vmul.f32 %v6547_v39, %v312_v21 }
 0x212   : > { %vm609_vm11 = vcmp.lt.s32.totalorder %v6440_v9, 2  ;;  %v1636_v33 = vcvt.s32.f32 %v1629_v18  ;;  %v6552_v47 = vsub.s32 %v6448_v19, %v2345_v50  ;;  %v2236_v31 = vadd.s32 1, %v6498_v45 }
 0x213   : > { %v1269_v8 = vshrl.u32 %v9705_v46, %v6528_v13  ;;  %v1634_v10 = vand.u32 2147483647, %v1633_v22  ;;  %v6557_v48 = vsel %vm4206_vm13, 0, %v4205_v44  ;;  %vm2235_vm14 = vc.u32 %v6504_v26, %v6497_v30 }
 0x214   : > { %v1272_v4 = vshrl.u32 %v9706_v11, %v6528_v13  ;;  %v2217_v28 = vsel %vm2211_vm9, %v2214_v1, %v2216_v55  ;;  %v9628_v19 = vand.u32 2147483647, %v6333_v2  ;;  %v6566_v51 = vshrl.u32 %v1254_v14, 5  ;;  %v6586_v55 = vld [vmem:[#allocation8 + $0x10] sm:$0xff] }
 0x215   : > { %v1268_v49 = vshll.u32 %v9707_v15, %v1256_v6  ;;  %v1260_v23 = vshrl.u32 %v9723_v5, %v6528_v13  ;;  %v1263_v38 = vshrl.u32 %v9722_v16, %v6528_v13  ;;  %v1266_v41 = vshrl.u32 %v9707_v15, %v6528_v13 }
 0x216   : > { %v1271_v0 = vshll.u32 %v9705_v46, %v1256_v6  ;;  %v1942_v56 = vsub.s32 4294967266, %v6557_v48  ;;  %v2348_v44 = vsub.s32 0, %v6552_v47  ;;  %v2237_v14 = vsel %vm2235_vm14, %v2236_v31, %v6498_v45 }
 0x217   : > { %v1270_v58 = vor.u32 %v1269_v8, %v1268_v49  ;;  %vm606_vm15 = vweird.f32 %v5437_v35  ;;  %v1259_v18 = vshll.u32 %v9724_v12, %v1256_v6  ;;  %v1262_v50 = vshll.u32 %v9723_v5, %v1256_v6 }
 0x218   : > { %v1265_v34 = vshll.u32 %v9722_v16, %v1256_v6  ;;  %v1273_v21 = vor.u32 %v1272_v4, %v1271_v0  ;;  %v1637_v22 = vmul.f32 %v1636_v33, %v1634_v10  ;;  %v2233_v24 = vmul.u32 %v6486_v42, %v2217_v28 }
 0x219   : > { %v1249_v1 = vand.u32 8388607, %v9628_v19  ;;  %v6589_v45 = vadd.f32 %v6586_v55, %v452_v53  ;;  %v6591_v31 = vpop.eup %4521  ;;  %vm1556_vm0 = vcmp.lt.s32.totalorder %v5741_v62, 0  ;;  %v6594_v8 = vor.u32 %v1260_v23, %v1259_v18 }
 0x21a   : > { %v6596_v49 = vor.u32 %v1263_v38, %v1262_v50  ;;  %v1267_v6 = vor.u32 %v1266_v41, %v1265_v34  ;;  %vm1277_vm12 = vcmp.lt.s32.totalorder %v6566_v51, 4  ;;  %v6599_v42 = vpop.eup %4523  ;;  %4527 = vsinq.f32 %v1226_v17 }
 0x21b   : > { %v4220_v33 = vmin.u32 %v2348_v44, %v6552_v47  ;;  %v6602_v10 = vadd.s32 %v2237_v14, %v2233_v24  ;;  %v1283_v53 = vsel %vm1277_vm12, %v1270_v58, 920167782  ;;  %v6606_v4 = vpop.eup %4525  ;;  %v616_v28 = vsel %vm609_vm11, %v612_v37, %v615_v25 }
 0x21c   : > { %v1231_v23 = vadd.s32 3, %v1227_v63  ;;  %v1943_v38 = vadd.s32 127, %v1942_v56  ;;  %v1287_v41 = vsel %vm1277_vm12, %v1273_v21, 1326507024  ;;  %v1638_v0 = vxor.u32 2147483648, %v1637_v22 }
 0x21d   : > { %vm1274_vm1 = vcmp.lt.s32.totalorder %v6566_v51, 1  ;;  %vm1276_vm3 = vcmp.lt.s32.totalorder %v6566_v51, 3  ;;  %v725_v17 = vand.u32 2139095040, %v6589_v45  ;;  %v1938_v44 = vsub.s32 32, %v6557_v48 }
 0x21e   : > { %v1250_v14 = vor.u32 8388608, %v1249_v1  ;;  %v1282_v9 = vsel %vm1274_vm1, %v6594_v8, %v6596_v49  ;;  %v1284_v25 = vsel %vm1276_vm3, %v1267_v6, %v1283_v53  ;;  %v2350_v37 = vclz %v4220_v33 }
 0x21f   : > { %v2239_v63 = vadd.s32 536870912, %v6602_v10  ;;  %v1286_v56 = vsel %vm1274_vm1, %v6596_v49, %v1267_v6  ;;  %v1288_v18 = vsel %vm1276_vm3, %v1270_v58, %v1287_v41  ;;  %v9736_v50 = vand.u32 2147483647, %v5741_v62 }
 0x220   : > { %v1922_v21 = vadd.s32 %v6204_v60, %v6201_v29  ;;  %v1944_v24 = vshll.u32 %v1943_v38, 23  ;;  %vm1275_vm5 = vcmp.lt.s32.totalorder %v6566_v51, 2  ;;  %v6639_v1 = vsel %vm606_vm15, nan, %v616_v28 }
 0x221   : > { %vm6630_vm4 = vcmp.le.f32.partialorder %v9736_v50, 0.7853982  ;;  %vm1858_vm7 = vcmp.eq.s32.totalorder %v6515_v57, 0  ;;  %vm1861_vm6 = vcmp.eq.s32.totalorder %v6515_v57, 2  ;;  %v1285_v58 = vsel %vm1275_vm5, %v1282_v9, %v1284_v25 }
 0x222   : > { %v726_v33 = vshrl.u32 %v725_v17, 23  ;;  %v1232_v53 = vand.u32 3, %v1231_v23  ;;  %v1940_v41 = vshrl.u32 %v1922_v21, %v1938_v44  ;;  %v1289_v29 = vsel %vm1275_vm5, %v1286_v56, %v1288_v18 }
 0x223   : > { %v6647_v60 = vshll.u32 %v1250_v14, 8  ;;  %v1639_v35 = vsel %vm1556_vm0, %v1638_v0, %v1637_v22  ;;  %v1640_v28 = vsub.s32 4, %v6219_v59  ;;  %v4221_v38 = vadd.s32 4294967294, %v2350_v37 }
 0x224   : > { %v6652_v50 = vshrl.u32 %v2239_v63, 30  ;;  %v1939_v19 = vshll.u32 %v6393_v36, %v6557_v48  ;;  %v1945_v9 = vor.u32 4788187, %v1944_v24  ;;  %v4528_v44 = vpop.eup %4527  ;;  %vm1857_vm8 = vcmp.lt.s32.totalorder %v6515_v57, 2 }
 0x225   : > { %v6657_v23 = vmul.u32.u64.low %v6647_v60, %v1285_v58  ;;  %v6658_v17 = vmul.u32.u64.high %v6647_v60, %v1285_v58, %v6657_v23  ;;  %v1862_v14 = vxor.u32 2147483648, %v6591_v31  ;;  %v4159_v25 = vadd.s32 4294967169, %v726_v33 }
 0x226   : > { %v6664_v22 = vmul.u32.u64.low %v6647_v60, %v1289_v29  ;;  %v6665_v0 = vmul.u32.u64.high %v6647_v60, %v1289_v29, %v6664_v22  ;;  %v1859_v37 = vxor.u32 2147483648, %v6599_v42  ;;  %vm1234_vm9 = vcmp.eq.s32.totalorder %v1232_v53, 0 }
 0x227   : > { %v1642_v36 = vsel %vm6630_vm4, %v5741_v62, %v1639_v35  ;;  %v1941_v48 = vor.u32 %v1940_v41, %v1939_v19  ;;  %vm1237_vm10 = vcmp.eq.s32.totalorder %v1232_v53, 2  ;;  %v1641_v63 = vsel %vm1556_vm0, %v1640_v28, %v6219_v59 }
 0x228   : > { %vm4222_vm13 = vcmp.lt.s32.totalorder %v4221_v38, 0  ;;  %v2241_v56 = vshll.u32 %v6652_v50, 30  ;;  %vm1854_vm11 = vweird.f32 %v5553_v40  ;;  %v1235_v18 = vxor.u32 2147483648, %v4528_v44 }
 0x229   : > { %v1238_v21 = vxor.u32 2147483648, %v6606_v4  ;;  %v1946_v24 = vand.u32 2147483647, %v1945_v9  ;;  %v1279_v58 = vsel %vm1277_vm12, %v1267_v6, 2102212464  ;;  %v1863_v19 = vsel %vm1861_vm6, %v1862_v14, %v6599_v42 }
 0x22a   : > { %vm1230_vm14 = vweird.f32 %v5605_v43  ;;  %4529 = vcosq.f32 %v1642_v36  ;;  %v1258_v59 = vshrl.u32 %v9724_v12, %v6528_v13  ;;  %v732_v33 = vadd.s32 1, %v4159_v25 }
 0x22b   : > { %v1860_v41 = vsel %vm1858_vm7, %v6591_v31, %v1859_v37  ;;  %v1643_v29 = vsel %vm6630_vm4, 0, %v1641_v63  ;;  %v1948_v35 = vcvt.s32.f32 %v1941_v48  ;;  %v6691_v6 = vsel %vm4222_vm13, 0, %v4221_v38 }
 0x22c   : > { %v1952_v42 = vsub.s32 4, %v6338_v61  ;;  %v6695_v28 = vsub.s32 %v6602_v10, %v2241_v56  ;;  %v1278_v13 = vsel %vm1274_vm1, %v1258_v59, %v6594_v8  ;;  %v1280_v31 = vsel %vm1276_vm3, %v6596_v49, %v1279_v58  ;;  %v399_v8 = vpop.permute.xlu1 %398  ;;  %v6732_v58 = vld [vmem:[#allocation5 + $0x10] sm:$0xff] }
 0x22d   : > { %v1236_v34 = vsel %vm1234_vm9, %v6606_v4, %v1235_v18  ;;  %v1239_v9 = vsel %vm1237_vm10, %v1238_v21, %v4528_v44  ;;  %v1949_v38 = vmul.f32 %v1948_v35, %v1946_v24  ;;  %v1300_v14 = vadd.s32 1, %v6658_v17  ;;  %v9743_v35 = vld [vmem:[#allocation16_spill] sm:$0xff] }
 0x22e   : > { %4531 = vsinq.f32 %v1642_v36  ;;  %v2358_v10 = vsub.s32 4294967266, %v6691_v6  ;;  %vm1299_vm15 = vc.u32 %v6665_v0, %v6657_v23  ;;  %vm733_vm0 = vcmp.gt.s32.totalorder %v732_v33, 0 }
 0x22f   : > { %v1864_v22 = vsel %vm1857_vm8, %v1860_v41, %v1863_v19  ;;  %vm1233_vm12 = vcmp.lt.s32.totalorder %v1232_v53, 2  ;;  %vm1868_vm1 = vcmp.lt.s32.totalorder %v5867_v3, 0  ;;  %v1281_v49 = vsel %vm1275_vm5, %v1278_v13, %v1280_v31  ;;  %v6721_v53 = vld [vmem:[#allocation5] sm:$0xff] }
 0x230   : > { %v1240_v4 = vsel %vm1233_vm12, %v1236_v34, %v1239_v9  ;;  %v1647_v44 = vadd.s32 3, %v1643_v29  ;;  %v1953_v25 = vsel %vm1868_vm1, %v1952_v42, %v6338_v61  ;;  %v2244_v37 = vsub.s32 0, %v6695_v28  ;;  %v9739_v61 = vld [vmem:[#allocation19_spill] sm:$0xff] }
 0x231   : > { %v1950_v36 = vxor.u32 2147483648, %v1949_v38  ;;  %v1301_v48 = vsel %vm1299_vm15, %v1300_v14, %v6658_v17  ;;  %v734_v63 = vsel %vm733_vm0, %v732_v33, 0  ;;  %v470_v57 = vmul.f32 %v6153_v27, %v399_v8  ;;  %v9744_v14 = vld [vmem:[#allocation17_spill] sm:$0xff] }
 0x232   : > { %v3842_v51 = vmul.f32 %v6721_v53, %v6639_v1  ;;  %v1865_v56 = vsel %vm1854_vm11, nan, %v1864_v22  ;;  %v2359_v18 = vadd.s32 127, %v2358_v10  ;;  %v1297_v21 = vmul.u32 %v6647_v60, %v1281_v49 }
 0x233   : > { %v3889_v24 = vsel %vm3874_vm2, %v9739_v61, 0.0  ;;  %v3876_v17 = vsel %vm3874_vm2, %v6513_v32, 0.0  ;;  %v1241_v27 = vsel %vm1230_vm14, nan, %v1240_v4  ;;  %v9740_v19 = vand.u32 2147483647, %v5867_v3 }
 0x234   : > { %v6742_v40 = vpop.eup %4529  ;;  %v4216_v59 = vmin.u32 %v2244_v37, %v6695_v28  ;;  %v6747_v33 = vadd.s32 %v1301_v48, %v1297_v21  ;;  %v736_v32 = vand.u32 31, %v734_v63  ;;  %v3854_v41 = vmul.f32 %v6721_v53, %v1865_v56 }
 0x235   : > { %vm6738_vm3 = vcmp.le.f32.partialorder %v9740_v19, 0.7853982  ;;  %v6750_v43 = vand.u32 3, %v1647_v44  ;;  %v1951_v29 = vsel %vm1868_vm1, %v1950_v36, %v1949_v38  ;;  %v6755_v42 = vadd.f32 %v9743_v35, %v470_v57 }
 0x236   : > { %v1955_v60 = vsel %vm6738_vm3, 0, %v1953_v25  ;;  %v3875_v13 = vsel %vm3874_vm2, %v3842_v51, 0.0  ;;  %v3848_v31 = vmul.f32 %v1241_v27, %v6732_v58  ;;  %v2354_v34 = vsub.s32 32, %v6691_v6 }
 0x237   : > { %v2360_v9 = vshll.u32 %v2359_v18, 23  ;;  %v6761_v10 = vadd.f32 %v3889_v24, %v9744_v14  ;;  %v1654_v8 = vxor.u32 2147483648, %v6742_v40  ;;  %v1959_v22 = vadd.s32 3, %v1955_v60 }
 0x238   : > { %v2338_v49 = vadd.s32 %v6348_v20, %v6342_v52  ;;  %v4532_v38 = vpop.eup %4531  ;;  %v1954_v4 = vsel %vm6738_vm3, %v5867_v3, %v1951_v29  ;;  %v2246_v44 = vclz %v4216_v59  ;;  %v1303_v25 = vadd.s32 536870912, %v6747_v33 }
 0x239   : > { %v6770_v37 = vsub.s32 32, %v736_v32  ;;  %v6772_v36 = vadd.f32 %v3876_v17, %v3875_v13  ;;  %v6775_v48 = vsel %vm3874_vm2, %v3854_v41, 0.0  ;;  %vm1650_vm4 = vcmp.eq.s32.totalorder %v6750_v43, 0 }
 0x23a   : > { %v2597_v57 = vand.u32 2139095040, %v6755_v42  ;;  %v6780_v52 = vsel %vm3874_vm2, %v3848_v31, 0.0  ;;  %vm1653_vm5 = vcmp.eq.s32.totalorder %v6750_v43, 2  ;;  %v2356_v20 = vshrl.u32 %v2338_v49, %v2354_v34  ;;  %v369_v34 = vpop.permute.xlu0 %368 }
 0x23b   : > { %9745 = vst [vmem:[#allocation19_spill] sm:$0xff] %v6772_v36  ;;  %v2361_v51 = vor.u32 4788187, %v2360_v9  ;;  %v1651_v56 = vxor.u32 2147483648, %v4532_v38  ;;  %v1655_v18 = vsel %vm1653_vm5, %v1654_v8, %v4532_v38  ;;  %4533 = vcosq.f32 %v1954_v4  ;;  %v9746_v9 = vld [vmem:[#allocation15_spill] sm:$0xff] }
 0x23c   : > { %v6783_v21 = vand.u32 3, %v1959_v22  ;;  %v2355_v61 = vshll.u32 %v6552_v47, %v6691_v6  ;;  %v4217_v24 = vadd.s32 4294967294, %v2246_v44  ;;  %v6787_v17 = vshrl.u32 %v1303_v25, 30 }
 0x23d   : > { %v749_v27 = vshrl.u32 %v9705_v46, %v6770_v37  ;;  %vm1649_vm7 = vcmp.lt.s32.totalorder %v6750_v43, 2  ;;  %4535 = vsinq.f32 %v1954_v4  ;;  %v9630_v19 = vand.u32 2147483647, %v6589_v45 }
 0x23e   : > { %v752_v1 = vshrl.u32 %v9706_v11, %v6770_v37  ;;  %v2598_v60 = vshrl.u32 %v2597_v57, 23  ;;  %v2357_v59 = vor.u32 %v2356_v20, %v2355_v61  ;;  %v2362_v41 = vand.u32 2147483647, %v2361_v51 }
 0x23f   : > { %v6795_v29 = vshrl.u32 %v734_v63, 5  ;;  %v748_v47 = vshll.u32 %v9707_v15, %v736_v32  ;;  %v740_v6 = vshrl.u32 %v9723_v5, %v6770_v37  ;;  %v743_v35 = vshrl.u32 %v9722_v16, %v6770_v37 }
 0x240   : > { %v746_v13 = vshrl.u32 %v9707_v15, %v6770_v37  ;;  %v751_v31 = vshll.u32 %v9705_v46, %v736_v32  ;;  %vm2284_vm6 = vcmp.lt.s32.totalorder %v9746_v9, 0  ;;  %vm4218_vm8 = vcmp.lt.s32.totalorder %v4217_v24, 0 }
 0x241   : > { %v1305_v63 = vshll.u32 %v6787_v17, 30  ;;  %v739_v14 = vshll.u32 %v9724_v12, %v736_v32  ;;  %v750_v8 = vor.u32 %v749_v27, %v748_v47  ;;  %vm1646_vm9 = vweird.f32 %v5741_v62 }
 0x242   : > { %v742_v22 = vshll.u32 %v9723_v5, %v736_v32  ;;  %v745_v49 = vshll.u32 %v9722_v16, %v736_v32  ;;  %v753_v38 = vor.u32 %v752_v1, %v751_v31  ;;  %v4231_v4 = vadd.s32 4294967169, %v2598_v60 }
 0x243   : > { %v1652_v44 = vsel %vm1650_vm4, %v6742_v40, %v1651_v56  ;;  %v2364_v25 = vcvt.s32.f32 %v2357_v59  ;;  %v729_v57 = vand.u32 8388607, %v9630_v19  ;;  %v464_v20 = vmul.f32 %v6547_v39, %v369_v34 }
 0x244   : > { %v9747_v51 = vand.u32 2147483647, %v9746_v9  ;;  %v6823_v27 = vor.u32 %v740_v6, %v739_v14  ;;  %v6825_v32 = vor.u32 %v743_v35, %v742_v22  ;;  %v747_v1 = vor.u32 %v746_v13, %v745_v49 }
 0x245   : > { %vm757_vm13 = vcmp.lt.s32.totalorder %v6795_v29, 4  ;;  %vm1965_vm11 = vcmp.eq.s32.totalorder %v6783_v21, 2  ;;  %v6830_v40 = vsel %vm4218_vm8, 0, %v4217_v24  ;;  %v6833_v39 = vsub.s32 %v6747_v33, %v1305_v63  ;;  %v4534_v60 = vpop.eup %4533 }
 0x246   : > { %vm6819_vm10 = vcmp.le.f32.partialorder %v9747_v51, 0.7853982  ;;  %v763_v56 = vsel %vm757_vm13, %v750_v8, 920167782  ;;  %vm1962_vm14 = vcmp.eq.s32.totalorder %v6783_v21, 0  ;;  %v2365_v59 = vmul.f32 %v2364_v25, %v2362_v41 }
 0x247   : > { %v2368_v47 = vsub.s32 4, %v6494_v7  ;;  %v767_v6 = vsel %vm757_vm13, %v753_v38, 1326507024  ;;  %v2604_v35 = vadd.s32 1, %v4231_v4  ;;  %v1656_v24 = vsel %vm1649_vm7, %v1652_v44, %v1655_v18  ;;  %v4536_v13 = vpop.eup %4535 }
 0x248   : > { %vm754_vm15 = vcmp.lt.s32.totalorder %v6795_v29, 1  ;;  %vm756_vm0 = vcmp.lt.s32.totalorder %v6795_v29, 3  ;;  %v6846_v33 = vadd.f32 %v6586_v55, %v464_v20  ;;  %v2254_v31 = vsub.s32 4294967266, %v6830_v40 }
 0x249   : > { %v730_v41 = vor.u32 8388608, %v729_v57  ;;  %v762_v34 = vsel %vm754_vm15, %v6823_v27, %v6825_v32  ;;  %v764_v43 = vsel %vm756_vm0, %v747_v1, %v763_v56  ;;  %vm1961_vm12 = vcmp.lt.s32.totalorder %v6783_v21, 2 }
 0x24a   : > { %9750 = vst [vmem:[#allocation16_spill] sm:$0xff] %v6846_v33  ;;  %v1966_v18 = vxor.u32 2147483648, %v4534_v60  ;;  %v1308_v63 = vsub.s32 0, %v6833_v39  ;;  %v766_v55 = vsel %vm754_vm15, %v6825_v32, %v747_v1  ;;  %v768_v14 = vsel %vm756_vm0, %v750_v8, %v767_v6 }
 0x24b   : > { %v2366_v22 = vxor.u32 2147483648, %v2365_v59  ;;  %v2369_v49 = vsel %vm2284_vm6, %v2368_v47, %v6494_v7  ;;  %vm755_vm1 = vcmp.lt.s32.totalorder %v6795_v29, 2  ;;  %vm2605_vm3 = vcmp.gt.s32.totalorder %v2604_v35, 0 }
 0x24c   : > { %v1657_v38 = vsel %vm1646_vm9, nan, %v1656_v24  ;;  %v1963_v4 = vxor.u32 2147483648, %v4536_v13  ;;  %v765_v44 = vsel %vm755_vm1, %v762_v34, %v764_v43  ;;  %v1973_v25 = vand.u32 2139095040, %v6846_v33 }
 0x24d   : > { %vm2180_vm4 = vcmp.lt.s32.totalorder %v6179_v54, 0  ;;  %v2250_v8 = vsub.s32 32, %v6830_v40  ;;  %v2255_v57 = vadd.s32 127, %v2254_v31  ;;  %v769_v7 = vsel %vm755_vm1, %v766_v55, %v768_v14  ;;  %v354_v14 = vpop.permute.xlu1 %353 }
 0x24e   : > { %v6875_v20 = vshll.u32 %v730_v41, 8  ;;  %v1967_v62 = vsel %vm1965_vm11, %v1966_v18, %v4536_v13  ;;  %v2371_v51 = vsel %vm6819_vm10, 0, %v2369_v49  ;;  %v4180_v56 = vmin.u32 %v1308_v63, %v6833_v39 }
 0x24f   : > { %v2606_v47 = vsel %vm2605_vm3, %v2604_v35, 0  ;;  %vm1958_vm5 = vweird.f32 %v5867_v3  ;;  %v2367_v6 = vsel %vm2284_vm6, %v2366_v22, %v2365_v59  ;;  %v2234_v24 = vadd.s32 %v6497_v30, %v6504_v26 }
 0x250   : > { %v6888_v31 = vmul.u32.u64.low %v6875_v20, %v765_v44  ;;  %v6889_v41 = vmul.u32.u64.high %v6875_v20, %v765_v44, %v6888_v31  ;;  %v1964_v13 = vsel %vm1962_vm14, %v4534_v60, %v1963_v4  ;;  %v9751_v34 = vand.u32 2147483647, %v6179_v54 }
 0x251   : > { %v6901_v43 = vmul.u32.u64.low %v6875_v20, %v769_v7  ;;  %v6902_v59 = vmul.u32.u64.high %v6875_v20, %v769_v7, %v6901_v43  ;;  %v1974_v18 = vshrl.u32 %v1973_v25, 23  ;;  %v2252_v30 = vshrl.u32 %v2234_v24, %v2250_v8  ;;  %v9756_v24 = vld [vmem:[#allocation21_spill] sm:$0xff] }
 0x252   : > { %vm6896_vm7 = vcmp.le.f32.partialorder %v9751_v34, 0.7853982  ;;  %v2256_v26 = vshll.u32 %v2255_v57, 23  ;;  %v759_v63 = vsel %vm757_vm13, %v747_v1, 2102212464  ;;  %v2608_v55 = vand.u32 31, %v2606_v47 }
 0x253   : > { %v2370_v60 = vsel %vm6819_vm10, %v9746_v9, %v2367_v6  ;;  %v2264_v22 = vsub.s32 4, %v6652_v50  ;;  %v1310_v49 = vclz %v4180_v56  ;;  %v738_v4 = vshrl.u32 %v9724_v12, %v6770_v37  ;;  %v9754_v56 = vld [vmem:[#allocation20_spill] sm:$0xff] }
 0x254   : > { %v3852_v44 = vmul.f32 %v1657_v38, %v6732_v58  ;;  %v1968_v25 = vsel %vm1961_vm12, %v1964_v13, %v1967_v62  ;;  %v2375_v8 = vadd.s32 3, %v2371_v51  ;;  %v2251_v1 = vshll.u32 %v6695_v28, %v6830_v40 }
 0x255   : > { %v758_v61 = vsel %vm754_vm15, %v738_v4, %v6823_v27  ;;  %v760_v57 = vsel %vm756_vm0, %v6825_v32, %v759_v63  ;;  %v4207_v7 = vadd.s32 4294967169, %v1974_v18  ;;  %v461_v37 = vmul.f32 %v354_v14, %v9754_v56 }
 0x256   : > { %4537 = vcosq.f32 %v2370_v60  ;;  %v2253_v58 = vor.u32 %v2252_v30, %v2251_v1  ;;  %v2257_v38 = vor.u32 4788187, %v2256_v26  ;;  %v6924_v21 = vsub.s32 32, %v2608_v55 }
 0x257   : > { %v6928_v62 = vadd.f32 %v6780_v52, %v6761_v10  ;;  %4539 = vsinq.f32 %v2370_v60  ;;  %v2265_v28 = vsel %vm2180_vm4, %v2264_v22, %v6652_v50  ;;  %v4181_v27 = vadd.s32 4294967294, %v1310_v49 }
 0x258   : > { %v6934_v32 = vsel %vm3874_vm2, %v3852_v44, 0.0  ;;  %v6936_v40 = vand.u32 3, %v2375_v8  ;;  %v761_v51 = vsel %vm755_vm1, %v758_v61, %v760_v57  ;;  %v780_v6 = vadd.s32 1, %v6889_v41 }
 0x259   : > { %9755 = vst [vmem:[#allocation17_spill] sm:$0xff] %v6928_v62  ;;  %v1969_v10 = vsel %vm1958_vm5, nan, %v1968_v25  ;;  %vm779_vm6 = vc.u32 %v6902_v59, %v6888_v31  ;;  %v1980_v52 = vadd.s32 1, %v4207_v7  ;;  %v6946_v50 = vadd.f32 %v461_v37, %v9756_v24  ;;  %v6975_v7 = vld [vmem:[#allocation5 + $0x8] sm:$0xff] }
 0x25a   : > { %v2258_v13 = vand.u32 2147483647, %v2257_v38  ;;  %v2260_v34 = vcvt.s32.f32 %v2253_v58  ;;  %v2267_v43 = vsel %vm6896_vm7, 0, %v2265_v28  ;;  %v2624_v29 = vshrl.u32 %v9706_v11, %v6924_v21 }
 0x25b   : > { %vm4182_vm8 = vcmp.lt.s32.totalorder %v4181_v27, 0  ;;  %v777_v18 = vmul.u32 %v6875_v20, %v761_v51  ;;  %v9629_v3 = vand.u32 2147483647, %v6755_v42  ;;  %v2621_v30 = vshrl.u32 %v9705_v46, %v6924_v21 }
 0x25c   : > { %v781_v26 = vsel %vm779_vm6, %v780_v6, %v6889_v41  ;;  %v6957_v63 = vshrl.u32 %v2606_v47, 5  ;;  %v2620_v14 = vshll.u32 %v9707_v15, %v2608_v55  ;;  %v2623_v60 = vshll.u32 %v9705_v46, %v2608_v55 }
 0x25d   : > { %v2615_v22 = vshrl.u32 %v9722_v16, %v6924_v21  ;;  %v2618_v49 = vshrl.u32 %v9707_v15, %v6924_v21  ;;  %vm1981_vm9 = vcmp.gt.s32.totalorder %v1980_v52, 0  ;;  %v1661_v20 = vand.u32 2139095040, %v6946_v50 }
 0x25e   : > { %v2261_v4 = vmul.f32 %v2260_v34, %v2258_v13  ;;  %v6966_v44 = vsel %vm4182_vm8, 0, %v4181_v27  ;;  %v2612_v47 = vshrl.u32 %v9723_v5, %v6924_v21  ;;  %v2625_v41 = vor.u32 %v2624_v29, %v2623_v60 }
 0x25f   : > { %vm2381_vm10 = vcmp.eq.s32.totalorder %v6936_v40, 2  ;;  %v6971_v25 = vadd.s32 %v781_v26, %v777_v18  ;;  %v2614_v8 = vshll.u32 %v9723_v5, %v2608_v55  ;;  %v2617_v1 = vshll.u32 %v9722_v16, %v2608_v55 }
 0x260   : > { %v2622_v61 = vor.u32 %v2621_v30, %v2620_v14  ;;  %v4538_v57 = vpop.eup %4537  ;;  %v6978_v56 = vmul.f32 %v6975_v7, %v1969_v10  ;;  %vm2378_vm13 = vcmp.eq.s32.totalorder %v6936_v40, 0  ;;  %v2601_v37 = vand.u32 8388607, %v9629_v3 }
 0x261   : > { %v2611_v58 = vshll.u32 %v9724_v12, %v2608_v55  ;;  %v1982_v38 = vsel %vm1981_vm9, %v1980_v52, 0  ;;  %v4540_v28 = vpop.eup %4539  ;;  %v6985_v27 = vor.u32 %v2615_v22, %v2614_v8  ;;  %v6987_v51 = vor.u32 %v2618_v49, %v2617_v1 }
 0x262   : > { %vm2629_vm11 = vcmp.lt.s32.totalorder %v6957_v63, 4  ;;  %v1662_v6 = vshrl.u32 %v1661_v20, 23  ;;  %v2271_v24 = vadd.s32 3, %v2267_v43  ;;  %v1318_v10 = vsub.s32 4294967266, %v6966_v44 }
 0x263   : > { %v6991_v13 = vor.u32 %v2612_v47, %v2611_v58  ;;  %v2639_v34 = vsel %vm2629_vm11, %v2625_v41, 1326507024  ;;  %v2262_v29 = vxor.u32 2147483648, %v2261_v4  ;;  %v783_v55 = vadd.s32 536870912, %v6971_v25 }
 0x264   : > { %v2635_v52 = vsel %vm2629_vm11, %v2622_v61, 920167782  ;;  %v1984_v18 = vand.u32 31, %v1982_v38  ;;  %v2379_v30 = vxor.u32 2147483648, %v4540_v28  ;;  %v2382_v26 = vxor.u32 2147483648, %v4538_v57 }
 0x265   : > { %vm2626_vm14 = vcmp.lt.s32.totalorder %v6957_v63, 1  ;;  %vm2628_vm15 = vcmp.lt.s32.totalorder %v6957_v63, 3  ;;  %v2602_v43 = vor.u32 8388608, %v2601_v37  ;;  %v4195_v22 = vadd.s32 4294967169, %v1662_v6 }
 0x266   : > { %v2638_v14 = vsel %vm2626_vm14, %v6985_v27, %v6987_v51  ;;  %v2640_v60 = vsel %vm2628_vm15, %v2622_v61, %v2639_v34  ;;  %v7006_v49 = vand.u32 3, %v2271_v24  ;;  %v1319_v20 = vadd.s32 127, %v1318_v10 }
 0x267   : > { %v2634_v47 = vsel %vm2626_vm14, %v6991_v13, %v6985_v27  ;;  %v2636_v41 = vsel %vm2628_vm15, %v6987_v51, %v2635_v52  ;;  %v2263_v8 = vsel %vm2180_vm4, %v2262_v29, %v2261_v4  ;;  %v7017_v1 = vshrl.u32 %v783_v55, 30 }
 0x268   : > { %vm2627_vm0 = vcmp.lt.s32.totalorder %v6957_v63, 2  ;;  %v7020_v61 = vsub.s32 32, %v1984_v18  ;;  %v7024_v37 = vsel %vm2381_vm10, %v2382_v26, %v4540_v28  ;;  %v1298_v58 = vadd.s32 %v6657_v23, %v6665_v0 }
 0x269   : > { %v1314_v6 = vsub.s32 32, %v6966_v44  ;;  %v2641_v24 = vsel %vm2627_vm0, %v2638_v14, %v2640_v60  ;;  %v7033_v4 = vsel %vm2378_vm13, %v4538_v57, %v2379_v30  ;;  %v2637_v10 = vsel %vm2627_vm0, %v2634_v47, %v2636_v41 }
 0x26a   : > { %v7037_v34 = vshll.u32 %v2602_v43, 8  ;;  %v1668_v29 = vadd.s32 1, %v4195_v22  ;;  %v7042_v28 = vsel %vm6896_vm7, %v6179_v54, %v2263_v8  ;;  %v1315_v23 = vshll.u32 %v6833_v39, %v6966_v44  ;;  %v403_v43 = vpop.permute.xlu0 %402 }
 0x26b   : > { %v1320_v0 = vshll.u32 %v1319_v20, 23  ;;  %v785_v57 = vshll.u32 %v7017_v1, 30  ;;  %v1997_v26 = vshrl.u32 %v9705_v46, %v7020_v61  ;;  %v1316_v14 = vshrl.u32 %v1298_v58, %v1314_v6  ;;  %v7071_v58 = vld [vmem:[#allocation7 + $0x8] sm:$0xff] }
 0x26c   : > { %v7049_v52 = vmul.u32.u64.low %v7037_v34, %v2641_v24  ;;  %v7050_v30 = vmul.u32.u64.high %v7037_v34, %v2641_v24, %v7049_v52  ;;  %v7055_v35 = vmul.u32.u64.low %v7037_v34, %v2637_v10  ;;  %v7056_v60 = vmul.u32.u64.high %v7037_v34, %v2637_v10, %v7055_v35  ;;  %9757 = vst [vmem:[#allocation15_spill] sm:$0xff] %v7071_v58 }
 0x26d   : > { %v2000_v39 = vshrl.u32 %v9706_v11, %v7020_v61  ;;  %v7061_v44 = vshrl.u32 %v1982_v38, 5  ;;  %v1988_v22 = vshrl.u32 %v9723_v5, %v7020_v61  ;;  %v1996_v20 = vshll.u32 %v9707_v15, %v1984_v18 }
 0x26e   : > { %vm1669_vm12 = vcmp.gt.s32.totalorder %v1668_v29, 0  ;;  %v1991_v47 = vshrl.u32 %v9722_v16, %v7020_v61  ;;  %v1994_v41 = vshrl.u32 %v9707_v15, %v7020_v61  ;;  %v1999_v8 = vshll.u32 %v9705_v46, %v1984_v18 }
 0x26f   : > { %v471_v6 = vmul.f32 %v7071_v58, %v403_v43  ;;  %vm2377_vm1 = vcmp.lt.s32.totalorder %v6936_v40, 2  ;;  %v1321_v38 = vor.u32 4788187, %v1320_v0  ;;  %v7076_v24 = vsub.s32 %v6971_v25, %v785_v57 }
 0x270   : > { %v1987_v10 = vshll.u32 %v9724_v12, %v1984_v18  ;;  %v1998_v52 = vor.u32 %v1997_v26, %v1996_v20  ;;  %v1990_v3 = vshll.u32 %v9723_v5, %v1984_v18  ;;  %v1993_v19 = vshll.u32 %v9722_v16, %v1984_v18  ;;  %v7093_v18 = vld [vmem:[#allocation8 + $0x8] sm:$0xff] }
 0x271   : > { %v2001_v55 = vor.u32 %v2000_v39, %v1999_v8  ;;  %v1670_v36 = vsel %vm1669_vm12, %v1668_v29, 0  ;;  %v2610_v62 = vshrl.u32 %v9724_v12, %v6924_v21  ;;  %v2631_v43 = vsel %vm2629_vm11, %v6987_v51, 2102212464  ;;  %9759 = vst [vmem:[#allocation20_spill] sm:$0xff] %v7093_v18 }
 0x272   : > { %v9758_v0 = vand.u32 2147483647, %v6846_v33  ;;  %v7088_v57 = vor.u32 %v1988_v22, %v1987_v10  ;;  %v7090_v58 = vor.u32 %v1991_v47, %v1990_v3  ;;  %v1995_v26 = vor.u32 %v1994_v41, %v1993_v19 }
 0x273   : > { %vm2005_vm3 = vcmp.lt.s32.totalorder %v7061_v44, 4  ;;  %v7096_v29 = vadd.f32 %v7093_v18, %v471_v6  ;;  %v1317_v21 = vor.u32 %v1316_v14, %v1315_v23  ;;  %v1322_v39 = vand.u32 2147483647, %v1321_v38 }
 0x274   : > { %v1977_v25 = vand.u32 8388607, %v9758_v0  ;;  %v2011_v51 = vsel %vm2005_vm3, %v1998_v52, 920167782  ;;  %v1672_v20 = vand.u32 31, %v1670_v36  ;;  %v788_v8 = vsub.s32 0, %v7076_v24 }
 0x275   : > { %v2630_v3 = vsel %vm2626_vm14, %v2610_v62, %v6991_v13  ;;  %v2632_v19 = vsel %vm2628_vm15, %v6985_v27, %v2631_v43  ;;  %v2015_v22 = vsel %vm2005_vm3, %v2001_v55, 1326507024  ;;  %v2652_v23 = vadd.s32 1, %v7056_v60 }
 0x276   : > { %v1978_v14 = vor.u32 8388608, %v1977_v25  ;;  %vm2002_vm4 = vcmp.lt.s32.totalorder %v7061_v44, 1  ;;  %vm2004_vm5 = vcmp.lt.s32.totalorder %v7061_v44, 3  ;;  %vm2651_vm7 = vc.u32 %v7050_v30, %v7055_v35 }
 0x277   : > { %v2010_v62 = vsel %vm2002_vm4, %v7088_v57, %v7090_v58  ;;  %v2012_v27 = vsel %vm2004_vm5, %v1995_v26, %v2011_v51  ;;  %v2701_v13 = vand.u32 2139095040, %v7096_v29  ;;  %v2633_v55 = vsel %vm2627_vm0, %v2630_v3, %v2632_v19 }
 0x278   : > { %v2014_v47 = vsel %vm2002_vm4, %v7090_v58, %v1995_v26  ;;  %v2016_v41 = vsel %vm2004_vm5, %v1998_v52, %v2015_v22  ;;  %v7128_v6 = vsub.s32 32, %v1672_v20  ;;  %v7134_v38 = vsel %vm2377_vm1, %v7033_v4, %v7024_v37 }
 0x279   : > { %4541 = vcosq.f32 %v7042_v28  ;;  %v1328_v63 = vsub.s32 4, %v6787_v17  ;;  %vm2003_vm6 = vcmp.lt.s32.totalorder %v7061_v44, 2  ;;  %v1324_v10 = vcvt.s32.f32 %v1317_v21 }
 0x27a   : > { %v2653_v43 = vsel %vm2651_vm7, %v2652_v23, %v7056_v60  ;;  %v2013_v52 = vsel %vm2003_vm6, %v2010_v62, %v2012_v27  ;;  %v2702_v0 = vshrl.u32 %v2701_v13, 23  ;;  %4543 = vsinq.f32 %v7042_v28 }
 0x27b   : > { %v2649_v25 = vmul.u32 %v7037_v34, %v2633_v55  ;;  %v2017_v40 = vsel %vm2003_vm6, %v2014_v47, %v2016_v41  ;;  %v7146_v37 = vshll.u32 %v1978_v14, 8  ;;  %vm1244_vm8 = vcmp.lt.s32.totalorder %v6333_v2, 0 }
 0x27c   : > { %v1325_v4 = vmul.f32 %v1324_v10, %v1322_v39  ;;  %v4160_v21 = vmin.u32 %v788_v8, %v7076_v24  ;;  %v9635_v60 = vand.u32 2147483647, %v6946_v50  ;;  %v1688_v51 = vshrl.u32 %v9706_v11, %v7128_v6 }
 0x27d   : > { %v7153_v3 = vadd.s32 %v2653_v43, %v2649_v25  ;;  %v7156_v28 = vmul.u32.u64.low %v7146_v37, %v2013_v52  ;;  %v7157_v34 = vmul.u32.u64.high %v7146_v37, %v2013_v52, %v7156_v28  ;;  %v1685_v19 = vshrl.u32 %v9705_v46, %v7128_v6 }
 0x27e   : > { %v7163_v22 = vmul.u32.u64.low %v7146_v37, %v2017_v40  ;;  %v7164_v39 = vmul.u32.u64.high %v7146_v37, %v2017_v40, %v7163_v22  ;;  %v1687_v8 = vshll.u32 %v9705_v46, %v1672_v20  ;;  %v4235_v23 = vadd.s32 4294967169, %v2702_v0 }
 0x27f   : > { %v7167_v14 = vshrl.u32 %v1670_v36, 5  ;;  %v1679_v62 = vshrl.u32 %v9722_v16, %v7128_v6  ;;  %v1682_v27 = vshrl.u32 %v9707_v15, %v7128_v6  ;;  %v1684_v13 = vshll.u32 %v9707_v15, %v1672_v20 }
 0x280   : > { %v1326_v55 = vxor.u32 2147483648, %v1325_v4  ;;  %v790_v47 = vclz %v4160_v21  ;;  %v1676_v41 = vshrl.u32 %v9723_v5, %v7128_v6  ;;  %v1689_v10 = vor.u32 %v1688_v51, %v1687_v8 }
 0x281   : > { %v9760_v43 = vand.u32 2147483647, %v6333_v2  ;;  %v2007_v36 = vsel %vm2005_vm3, %v1995_v26, 2102212464  ;;  %v1678_v0 = vshll.u32 %v9723_v5, %v1672_v20  ;;  %v1681_v25 = vshll.u32 %v9722_v16, %v1672_v20 }
 0x282   : > { %v1686_v40 = vor.u32 %v1685_v19, %v1684_v13  ;;  %vm2374_vm10 = vweird.f32 %v9746_v9  ;;  %v2655_v21 = vadd.s32 536870912, %v7153_v3  ;;  %v1986_v51 = vshrl.u32 %v9724_v12, %v7020_v61 }
 0x283   : > { %vm7178_vm9 = vcmp.le.f32.partialorder %v9760_v43, 0.7853982  ;;  %v1675_v22 = vshll.u32 %v9724_v12, %v1672_v20  ;;  %v2708_v8 = vadd.s32 1, %v4235_v23  ;;  %v7191_v43 = vpop.eup %4541  ;;  %v1665_v26 = vand.u32 8388607, %v9635_v60 }
 0x284   : > { %v7195_v18 = vor.u32 %v1679_v62, %v1678_v0  ;;  %v1683_v33 = vor.u32 %v1682_v27, %v1681_v25  ;;  %vm1693_vm13 = vcmp.lt.s32.totalorder %v7167_v14, 4  ;;  %v2006_v19 = vsel %vm2002_vm4, %v1986_v51, %v7088_v57  ;;  %v7206_v13 = vpop.eup %4543 }
 0x285   : > { %v2008_v61 = vsel %vm2004_vm5, %v7090_v58, %v2007_v36  ;;  %v1677_v20 = vor.u32 %v1676_v41, %v1675_v22  ;;  %v1703_v23 = vsel %vm1693_vm13, %v1689_v10, 1326507024  ;;  %v1329_v62 = vsel %vm1244_vm8, %v1328_v63, %v6787_v17 }
 0x286   : > { %v4161_v27 = vadd.s32 4294967294, %v790_v47  ;;  %v2028_v0 = vadd.s32 1, %v7157_v34  ;;  %v1699_v57 = vsel %vm1693_vm13, %v1686_v40, 920167782  ;;  %vm2027_vm11 = vc.u32 %v7164_v39, %v7156_v28  ;;  %v418_v47 = vpop.permute.xlu1 %417 }
 0x287   : > { %vm1690_vm14 = vcmp.lt.s32.totalorder %v7167_v14, 1  ;;  %vm1692_vm15 = vcmp.lt.s32.totalorder %v7167_v14, 3  ;;  %vm2709_vm0 = vcmp.gt.s32.totalorder %v2708_v8, 0  ;;  %v2009_v58 = vsel %vm2003_vm6, %v2006_v19, %v2008_v61 }
 0x288   : > { %v1666_v41 = vor.u32 8388608, %v1665_v26  ;;  %v1702_v17 = vsel %vm1690_vm14, %v7195_v18, %v1683_v33  ;;  %v1704_v63 = vsel %vm1692_vm15, %v1686_v40, %v1703_v23  ;;  %v1327_v10 = vsel %vm1244_vm8, %v1326_v55, %v1325_v4 }
 0x289   : > { %v7227_v36 = vshrl.u32 %v2655_v21, 30  ;;  %v1698_v25 = vsel %vm1690_vm14, %v1677_v20, %v7195_v18  ;;  %v1700_v44 = vsel %vm1692_vm15, %v1683_v33, %v1699_v57  ;;  %vm4162_vm12 = vcmp.lt.s32.totalorder %v4161_v27, 0  ;;  %v4635_v21 = vld [vmem:[#allocation7] sm:$0xff] }
 0x28a   : > { %v2029_v51 = vsel %vm2027_vm11, %v2028_v0, %v7157_v34  ;;  %vm1691_vm1 = vcmp.lt.s32.totalorder %v7167_v14, 2  ;;  %v2710_v22 = vsel %vm2709_vm0, %v2708_v8, 0  ;;  %vm2274_vm3 = vcmp.eq.s32.totalorder %v7006_v49, 0 }
 0x28b   : > { %v1331_v4 = vsel %vm7178_vm9, 0, %v1329_v62  ;;  %v2025_v55 = vmul.u32 %v7146_v37, %v2009_v58  ;;  %v1705_v40 = vsel %vm1691_vm1, %v1702_v17, %v1704_v63  ;;  %v474_v26 = vmul.f32 %v4635_v21, %v418_v47 }
 0x28c   : > { %v2385_v19 = vsel %vm2374_vm10, nan, %v7134_v38  ;;  %v1330_v34 = vsel %vm7178_vm9, %v6333_v2, %v1327_v10  ;;  %v1701_v8 = vsel %vm1691_vm1, %v1698_v25, %v1700_v44  ;;  %v7250_v61 = vshll.u32 %v1666_v41, 8 }
 0x28d   : > { %v7252_v23 = vsel %vm4162_vm12, 0, %v4161_v27  ;;  %v2657_v37 = vshll.u32 %v7227_v36, 30  ;;  %v7255_v62 = vadd.s32 %v2029_v51, %v2025_v55  ;;  %v2712_v0 = vand.u32 31, %v2710_v22  ;;  %v4636_v27 = vld [vmem:[#allocation8] sm:$0xff] }
 0x28e   : > { %v2278_v57 = vxor.u32 2147483648, %v7191_v43  ;;  %v1335_v9 = vadd.s32 3, %v1331_v4  ;;  %v7259_v38 = vmul.u32.u64.low %v7250_v61, %v1705_v40  ;;  %v7260_v58 = vmul.u32.u64.high %v7250_v61, %v1705_v40, %v7259_v38 }
 0x28f   : > { %v2275_v52 = vxor.u32 2147483648, %v7206_v13  ;;  %v7264_v17 = vmul.u32.u64.low %v7250_v61, %v1701_v8  ;;  %v7265_v41 = vmul.u32.u64.high %v7250_v61, %v1701_v8, %v7264_v17  ;;  %v7268_v63 = vadd.f32 %v4636_v27, %v474_v26 }
 0x290   : > { %4545 = vcosq.f32 %v1330_v34  ;;  %v794_v47 = vsub.s32 32, %v7252_v23  ;;  %v798_v10 = vsub.s32 4294967266, %v7252_v23  ;;  %v1695_v25 = vsel %vm1693_vm13, %v1683_v33, 2102212464 }
 0x291   : > { %9763 = vst [vmem:[#allocation21_spill] sm:$0xff] %v7268_v63  ;;  %v7275_v44 = vsub.s32 %v7153_v3, %v2657_v37  ;;  %v2031_v51 = vadd.s32 536870912, %v7255_v62  ;;  %v1674_v4 = vshrl.u32 %v9724_v12, %v7128_v6  ;;  %v7280_v55 = vsub.s32 32, %v2712_v0 }
 0x292   : > { %v7283_v40 = vmul.f32 %v6975_v7, %v2385_v19  ;;  %vm2277_vm4 = vcmp.eq.s32.totalorder %v7006_v49, 2  ;;  %v7286_v21 = vand.u32 3, %v1335_v9  ;;  %v778_v33 = vadd.s32 %v6888_v31, %v6902_v59 }
 0x293   : > { %v2279_v3 = vsel %vm2277_vm4, %v2278_v57, %v7206_v13  ;;  %v1694_v26 = vsel %vm1690_vm14, %v1674_v4, %v1677_v20  ;;  %v1696_v6 = vsel %vm1692_vm15, %v7195_v18, %v1695_v25  ;;  %v3013_v8 = vand.u32 2139095040, %v7268_v63 }
 0x294   : > { %vm2273_vm5 = vcmp.lt.s32.totalorder %v7006_v49, 2  ;;  %v2276_v7 = vsel %vm2274_vm3, %v7191_v43, %v2275_v52  ;;  %4547 = vsinq.f32 %v1330_v34  ;;  %v795_v31 = vshll.u32 %v7076_v24, %v7252_v23 }
 0x295   : > { %v796_v59 = vshrl.u32 %v778_v33, %v794_v47  ;;  %v799_v13 = vadd.s32 127, %v798_v10  ;;  %v2660_v20 = vsub.s32 0, %v7275_v44  ;;  %v7304_v19 = vshrl.u32 %v2031_v51, 30 }
 0x296   : > { %v2725_v18 = vshrl.u32 %v9705_v46, %v7280_v55  ;;  %v1697_v37 = vsel %vm1691_vm1, %v1694_v26, %v1696_v6  ;;  %vm1715_vm7 = vc.u32 %v7260_v58, %v7264_v17  ;;  %v9636_v43 = vand.u32 2147483647, %v7096_v29 }
 0x297   : > { %v2728_v24 = vshrl.u32 %v9706_v11, %v7280_v55  ;;  %v1716_v34 = vadd.s32 1, %v7265_v41  ;;  %v7316_v23 = vshrl.u32 %v2710_v22, 5  ;;  %v2724_v57 = vshll.u32 %v9707_v15, %v2712_v0 }
 0x298   : > { %v3014_v9 = vshrl.u32 %v3013_v8, 23  ;;  %v2716_v38 = vshrl.u32 %v9723_v5, %v7280_v55  ;;  %v2719_v14 = vshrl.u32 %v9722_v16, %v7280_v55  ;;  %v2722_v52 = vshrl.u32 %v9707_v15, %v7280_v55 }
 0x299   : > { %v2727_v27 = vshll.u32 %v9705_v46, %v2712_v0  ;;  %vm2270_vm6 = vweird.f32 %v6179_v54  ;;  %v800_v47 = vshll.u32 %v799_v13, 23  ;;  %v4232_v22 = vmin.u32 %v2660_v20, %v7275_v44 }
 0x29a   : > { %v2033_v10 = vshll.u32 %v7304_v19, 30  ;;  %v2726_v25 = vor.u32 %v2725_v18, %v2724_v57  ;;  %v4546_v51 = vpop.eup %4545  ;;  %v2715_v4 = vshll.u32 %v9724_v12, %v2712_v0  ;;  %v2718_v33 = vshll.u32 %v9723_v5, %v2712_v0 }
 0x29b   : > { %v2721_v26 = vshll.u32 %v9722_v16, %v2712_v0  ;;  %v2729_v6 = vor.u32 %v2728_v24, %v2727_v27  ;;  %vm724_vm8 = vcmp.lt.s32.totalorder %v6589_v45, 0  ;;  %v1713_v8 = vmul.u32 %v7250_v61, %v1697_v37 }
 0x29c   : > { %v1717_v13 = vsel %vm1715_vm7, %v1716_v34, %v7265_v41  ;;  %v2705_v20 = vand.u32 8388607, %v9636_v43  ;;  %v4247_v18 = vadd.s32 4294967169, %v3014_v9  ;;  %vm1338_vm9 = vcmp.eq.s32.totalorder %v7286_v21, 0 }
 0x29d   : > { %v7341_v57 = vor.u32 %v2716_v38, %v2715_v4  ;;  %v7343_v60 = vor.u32 %v2719_v14, %v2718_v33  ;;  %v2723_v0 = vor.u32 %v2722_v52, %v2721_v26  ;;  %vm2733_vm10 = vcmp.lt.s32.totalorder %v7316_v23, 4 }
 0x29e   : > { %v2280_v61 = vsel %vm2273_vm5, %v2276_v7, %v2279_v3  ;;  %v808_v37 = vsub.s32 4, %v7017_v1  ;;  %v7350_v41 = vsub.s32 %v7255_v62, %v2033_v10  ;;  %v2739_v24 = vsel %vm2733_vm10, %v2726_v25, 920167782  ;;  %v4548_v34 = vpop.eup %4547 }
 0x29f   : > { %v1342_v9 = vxor.u32 2147483648, %v4546_v51  ;;  %v797_v38 = vor.u32 %v796_v59, %v795_v31  ;;  %v7354_v27 = vadd.s32 %v1717_v13, %v1713_v8  ;;  %v2743_v14 = vsel %vm2733_vm10, %v2729_v6, 1326507024  ;;  %v388_v59 = vpop.permute.xlu0 %387  ;;  %v7379_v13 = vld [vmem:[#allocation7 + $0x10] sm:$0xff] }
 0x2a0   : > { %v2662_v52 = vclz %v4232_v22  ;;  %vm2730_vm13 = vcmp.lt.s32.totalorder %v7316_v23, 1  ;;  %vm2732_vm11 = vcmp.lt.s32.totalorder %v7316_v23, 3  ;;  %v3020_v49 = vadd.s32 1, %v4247_v18 }
 0x2a1   : > { %v801_v3 = vor.u32 4788187, %v800_v47  ;;  %v2706_v62 = vor.u32 8388608, %v2705_v20  ;;  %v2738_v7 = vsel %vm2730_vm13, %v7341_v57, %v7343_v60  ;;  %v2740_v31 = vsel %vm2732_vm11, %v2723_v0, %v2739_v24 }
 0x2a2   : > { %v1339_v10 = vxor.u32 2147483648, %v4548_v34  ;;  %v2036_v4 = vsub.s32 0, %v7350_v41  ;;  %v2742_v22 = vsel %vm2730_vm13, %v7343_v60, %v2723_v0  ;;  %v2744_v47 = vsel %vm2732_vm11, %v2726_v25, %v2743_v14 }
 0x2a3   : > { %v2281_v33 = vsel %vm2270_vm6, nan, %v2280_v61  ;;  %vm1341_vm14 = vcmp.eq.s32.totalorder %v7286_v21, 2  ;;  %v1719_v26 = vadd.s32 536870912, %v7354_v27  ;;  %vm2731_vm15 = vcmp.lt.s32.totalorder %v7316_v23, 2 }
 0x2a4   : > { %v4233_v6 = vadd.s32 4294967294, %v2662_v52  ;;  %v2741_v8 = vsel %vm2731_vm15, %v2738_v7, %v2740_v31  ;;  %vm3021_vm0 = vcmp.gt.s32.totalorder %v3020_v49, 0  ;;  %v468_v20 = vmul.f32 %v7379_v13, %v388_v59 }
 0x2a5   : > { %v802_v18 = vand.u32 2147483647, %v801_v3  ;;  %v809_v54 = vsel %vm724_vm8, %v808_v37, %v7017_v1  ;;  %v2745_v25 = vsel %vm2731_vm15, %v2742_v22, %v2744_v47  ;;  %v7387_v61 = vshll.u32 %v2706_v62, 8  ;;  %v7403_v22 = vld [vmem:[#allocation8 + $0x10] sm:$0xff] }
 0x2a6   : > { %v1340_v24 = vsel %vm1338_vm9, %v4546_v51, %v1339_v10  ;;  %v1343_v14 = vsel %vm1341_vm14, %v1342_v9, %v4548_v34  ;;  %v804_v52 = vcvt.s32.f32 %v797_v38  ;;  %v4208_v7 = vmin.u32 %v2036_v4, %v7350_v41 }
 0x2a7   : > { %v7392_v31 = vshrl.u32 %v1719_v26, 30  ;;  %v7395_v3 = vmul.u32.u64.low %v7387_v61, %v2741_v8  ;;  %v7396_v59 = vmul.u32.u64.high %v7387_v61, %v2741_v8, %v7395_v3  ;;  %v3022_v1 = vsel %vm3021_vm0, %v3020_v49, 0 }
 0x2a8   : > { %vm4234_vm12 = vcmp.lt.s32.totalorder %v4233_v6, 0  ;;  %v7400_v37 = vmul.u32.u64.low %v7387_v61, %v2745_v25  ;;  %v7401_v62 = vmul.u32.u64.high %v7387_v61, %v2745_v25, %v7400_v37  ;;  %v7406_v51 = vadd.f32 %v7403_v22, %v468_v20 }
 0x2a9   : > { %v3858_v34 = vmul.f32 %v6721_v53, %v2281_v33  ;;  %vm1337_vm1 = vcmp.lt.s32.totalorder %v7286_v21, 2  ;;  %v9765_v9 = vand.u32 2147483647, %v6589_v45  ;;  %v805_v49 = vmul.f32 %v804_v52, %v802_v18 }
 0x2aa   : > { %9764 = vst [vmem:[#allocation22_spill] sm:$0xff] %v7406_v51  ;;  %vm1334_vm4 = vweird.f32 %v6333_v2  ;;  %v1344_v10 = vsel %vm1337_vm1, %v1340_v24, %v1343_v14  ;;  %v3024_v47 = vand.u32 31, %v3022_v1  ;;  %v7419_v26 = vsel %vm4234_vm12, 0, %v4233_v6  ;;  %v288_v14 = vld [vmem:[#allocation5 + $0x18] sm:$0xff] }
 0x2ab   : > { %vm7412_vm3 = vcmp.le.f32.partialorder %v9765_v9, 0.7853982  ;;  %v2038_v8 = vclz %v4208_v7  ;;  %v1721_v53 = vshll.u32 %v7392_v31, 30  ;;  %v2735_v21 = vsel %vm2733_vm10, %v2723_v0, 2102212464 }
 0x2ac   : > { %v811_v4 = vsel %vm7412_vm3, 0, %v809_v54  ;;  %v3915_v33 = vsel %vm3874_vm2, %v6978_v56, 0.0  ;;  %v3928_v20 = vsel %vm3874_vm2, %v7283_v40, 0.0  ;;  %v2714_v2 = vshrl.u32 %v9724_v12, %v7280_v55  ;;  %v9768_v55 = vld [vmem:[#allocation18_spill] sm:$0xff] }
 0x2ad   : > { %v2389_v18 = vand.u32 2139095040, %v7406_v51  ;;  %v3927_v6 = vsel %vm3874_vm2, %v3858_v34, 0.0  ;;  %v1345_v54 = vsel %vm1334_vm4, nan, %v1344_v10  ;;  %v806_v25 = vxor.u32 2147483648, %v805_v49 }
 0x2ae   : > { %v815_v24 = vadd.s32 3, %v811_v4  ;;  %v2670_v52 = vsub.s32 4294967266, %v7419_v26  ;;  %v2734_v56 = vsel %vm2730_vm13, %v2714_v2, %v7341_v57  ;;  %v2736_v40 = vsel %vm2732_vm11, %v7343_v60, %v2735_v21 }
 0x2af   : > { %v7439_v0 = vsub.s32 32, %v3024_v47  ;;  %v7443_v7 = vadd.f32 %v6934_v32, %v9768_v55  ;;  %v4209_v37 = vadd.s32 4294967294, %v2038_v8  ;;  %v7446_v34 = vsub.s32 %v7354_v27, %v1721_v53 }
 0x2b0   : > { %v2756_v9 = vadd.s32 1, %v7396_v59  ;;  %v7450_v10 = vadd.f32 %v3915_v33, %v6775_v48  ;;  %v7452_v57 = vadd.f32 %v3928_v20, %v3927_v6  ;;  %vm2755_vm5 = vc.u32 %v7401_v62, %v7395_v3 }
 0x2b1   : > { %9769 = vst [vmem:[#allocation18_spill] sm:$0xff] %v7443_v7  ;;  %v2390_v60 = vshrl.u32 %v2389_v18, 23  ;;  %v7456_v4 = vmul.f32 %v1345_v54, %v288_v14  ;;  %v7458_v21 = vand.u32 3, %v815_v24  ;;  %v2650_v32 = vadd.s32 %v7055_v35, %v7050_v30 }
 0x2b2   : > { %9770 = vst [vmem:[#allocation23_spill] sm:$0xff] %v7450_v10  ;;  %9771 = vst [vmem:[#allocation24_spill] sm:$0xff] %v7452_v57  ;;  %v2737_v27 = vsel %vm2731_vm15, %v2734_v56, %v2736_v40  ;;  %v7466_v48 = vsel %vm724_vm8, %v806_v25, %v805_v49  ;;  %v2666_v8 = vsub.s32 32, %v7419_v26  ;;  %v2671_v53 = vadd.s32 127, %v2670_v52 }
 0x2b3   : > { %v3037_v33 = vshrl.u32 %v9705_v46, %v7439_v0  ;;  %vm4210_vm7 = vcmp.lt.s32.totalorder %v4209_v37, 0  ;;  %v1724_v20 = vsub.s32 0, %v7446_v34  ;;  %v2757_v2 = vsel %vm2755_vm5, %v2756_v9, %v7396_v59 }
 0x2b4   : > { %v9637_v30 = vand.u32 2147483647, %v7268_v63  ;;  %v2753_v35 = vmul.u32 %v7387_v61, %v2737_v27  ;;  %v3036_v23 = vshll.u32 %v9707_v15, %v3024_v47  ;;  %v3040_v49 = vshrl.u32 %v9706_v11, %v7439_v0 }
 0x2b5   : > { %v4223_v18 = vadd.s32 4294967169, %v2390_v60  ;;  %v7478_v6 = vshrl.u32 %v3022_v1, 5  ;;  %v3028_v54 = vshrl.u32 %v9723_v5, %v7439_v0  ;;  %v3031_v25 = vshrl.u32 %v9722_v16, %v7439_v0 }
 0x2b6   : > { %v3034_v59 = vshrl.u32 %v9707_v15, %v7439_v0  ;;  %v2672_v24 = vshll.u32 %v2671_v53, 23  ;;  %v7486_v14 = vadd.s32 %v2757_v2, %v2753_v35  ;;  %v3038_v61 = vor.u32 %v3037_v33, %v3036_v23 }
 0x2b7   : > { %v3039_v52 = vshll.u32 %v9705_v46, %v3024_v47  ;;  %v4196_v56 = vmin.u32 %v1724_v20, %v7446_v34  ;;  %v3027_v1 = vshll.u32 %v9724_v12, %v3024_v47  ;;  %v3030_v40 = vshll.u32 %v9723_v5, %v3024_v47 }
 0x2b8   : > { %v3033_v55 = vshll.u32 %v9722_v16, %v3024_v47  ;;  %vm2596_vm6 = vcmp.lt.s32.totalorder %v6755_v42, 0  ;;  %v2041_v9 = vsel %vm4210_vm7, 0, %v4209_v37  ;;  %v3017_v60 = vand.u32 8388607, %v9637_v30 }
 0x2b9   : > { %v3041_v27 = vor.u32 %v3040_v49, %v3039_v52  ;;  %v2396_v53 = vadd.s32 1, %v4223_v18  ;;  %v7497_v33 = vor.u32 %v3028_v54, %v3027_v1  ;;  %v7499_v2 = vor.u32 %v3031_v25, %v3030_v40 }
 0x2ba   : > { %v3035_v20 = vor.u32 %v3034_v59, %v3033_v55  ;;  %vm3045_vm8 = vcmp.lt.s32.totalorder %v7478_v6, 4  ;;  %v2668_v35 = vshrl.u32 %v2650_v32, %v2666_v8  ;;  %v2680_v23 = vsub.s32 4, %v7227_v36  ;;  %v316_v8 = vpop.permute.xlu1 %315 }
 0x2bb   : > { %v2759_v47 = vadd.s32 536870912, %v7486_v14  ;;  %v3051_v37 = vsel %vm3045_vm8, %v3038_v61, 920167782  ;;  %v9772_v43 = vand.u32 2147483647, %v6755_v42  ;;  %v2667_v18 = vshll.u32 %v7275_v44, %v7419_v26 }
 0x2bc   : > { %v2673_v54 = vor.u32 4788187, %v2672_v24  ;;  %v2042_v25 = vsub.s32 32, %v2041_v9  ;;  %v1726_v59 = vclz %v4196_v56  ;;  %vm3042_vm10 = vcmp.lt.s32.totalorder %v7478_v6, 1 }
 0x2bd   : > { %vm7508_vm9 = vcmp.le.f32.partialorder %v9772_v43, 0.7853982  ;;  %vm3044_vm13 = vcmp.lt.s32.totalorder %v7478_v6, 3  ;;  %v3055_v32 = vsel %vm3045_vm8, %v3041_v27, 1326507024  ;;  %vm2397_vm11 = vcmp.gt.s32.totalorder %v2396_v53, 0 }
 0x2be   : > { %v2046_v52 = vsub.s32 4294967266, %v2041_v9  ;;  %v3018_v43 = vor.u32 8388608, %v3017_v60  ;;  %v3050_v1 = vsel %vm3042_vm10, %v7497_v33, %v7499_v2  ;;  %v3052_v44 = vsel %vm3044_vm13, %v3035_v20, %v3051_v37  ;;  %v7534_v27 = vld [vmem:[#allocation7 + $0x18] sm:$0xff] }
 0x2bf   : > { %v2669_v26 = vor.u32 %v2668_v35, %v2667_v18  ;;  %v2026_v24 = vadd.s32 %v7156_v28, %v7164_v39  ;;  %v7526_v56 = vshrl.u32 %v2759_v47, 30  ;;  %vm3043_vm14 = vcmp.lt.s32.totalorder %v7478_v6, 2  ;;  %9775 = vst [vmem:[#allocation25_spill] sm:$0xff] %v7534_v27 }
 0x2c0   : > { %v3054_v40 = vsel %vm3042_vm10, %v7499_v2, %v3035_v20  ;;  %v3056_v55 = vsel %vm3044_vm13, %v3038_v61, %v3055_v32  ;;  %v2398_v60 = vsel %vm2397_vm11, %v2396_v53, 0  ;;  %v453_v37 = vmul.f32 %v7534_v27, %v316_v8 }
 0x2c1   : > { %v2674_v35 = vand.u32 2147483647, %v2673_v54  ;;  %v2044_v18 = vshrl.u32 %v2026_v24, %v2042_v25  ;;  %v4197_v30 = vadd.s32 4294967294, %v1726_v59  ;;  %v3053_v28 = vsel %vm3043_vm14, %v3050_v1, %v3052_v44 }
 0x2c2   : > { %v810_v39 = vsel %vm7412_vm3, %v6589_v45, %v7466_v48  ;;  %v2681_v61 = vsel %vm2596_vm6, %v2680_v23, %v7227_v36  ;;  %v2047_v53 = vadd.s32 127, %v2046_v52  ;;  %v7546_v47 = vshll.u32 %v3018_v43, 8  ;;  %v7557_v48 = vld [vmem:[#allocation8 + $0x18] sm:$0xff] }
 0x2c3   : > { %v2676_v32 = vcvt.s32.f32 %v2669_v26  ;;  %v2043_v54 = vshll.u32 %v7350_v41, %v2041_v9  ;;  %v3057_v25 = vsel %vm3043_vm14, %v3054_v40, %v3056_v55  ;;  %v2400_v59 = vand.u32 31, %v2398_v60  ;;  %9776 = vst [vmem:[#allocation26_spill] sm:$0xff] %v7557_v48 }
 0x2c4   : > { %v2761_v8 = vshll.u32 %v7526_v56, 30  ;;  %v7553_v1 = vmul.u32.u64.low %v7546_v47, %v3053_v28  ;;  %v7554_v38 = vmul.u32.u64.high %v7546_v47, %v3053_v28, %v7553_v1  ;;  %v7560_v36 = vadd.f32 %v7557_v48, %v453_v37 }
 0x2c5   : > { %v7562_v23 = vmul.f32 %v2676_v32, %v2674_v35  ;;  %v2683_v41 = vsel %vm7508_vm9, 0, %v2681_v61  ;;  %v7566_v9 = vor.u32 %v2044_v18, %v2043_v54  ;;  %vm4198_vm15 = vcmp.lt.s32.totalorder %v4197_v30, 0 }
 0x2c6   : > { %v2048_v52 = vshll.u32 %v2047_v53, 23  ;;  %v3047_v43 = vsel %vm3045_vm8, %v3035_v20, 2102212464  ;;  %v7571_v44 = vmul.u32.u64.low %v7546_v47, %v3057_v25  ;;  %v7572_v26 = vmul.u32.u64.high %v7546_v47, %v3057_v25, %v7571_v44 }
 0x2c7   : > { %v7576_v24 = vsel %vm3874_vm2, %v7456_v4, 0.0  ;;  %4549 = vcosq.f32 %v810_v39  ;;  %v3026_v40 = vshrl.u32 %v9724_v12, %v7439_v0  ;;  %v7580_v55 = vsub.s32 32, %v2400_v59 }
 0x2c8   : > { %4551 = vsinq.f32 %v810_v39  ;;  %v7582_v37 = vsel %vm4198_vm15, 0, %v4197_v30  ;;  %v7585_v35 = vsub.s32 %v7486_v14, %v2761_v8  ;;  %v829_v20 = vand.u32 2139095040, %v7560_v36 }
 0x2c9   : > { %v2678_v18 = vxor.u32 2147483648, %v7562_v23  ;;  %v7589_v28 = vadd.s32 3, %v2683_v41  ;;  %v3046_v4 = vsel %vm3042_vm10, %v3026_v40, %v7497_v33  ;;  %v3048_v0 = vsel %vm3044_vm13, %v7499_v2, %v3047_v43 }
 0x2ca   : > { %v2049_v39 = vor.u32 4788187, %v2048_v52  ;;  %v2052_v30 = vcvt.s32.f32 %v7566_v9  ;;  %v1714_v14 = vadd.s32 %v7264_v17, %v7260_v58  ;;  %v830_v61 = vshrl.u32 %v829_v20, 23 }
 0x2cb   : > { %v1734_v53 = vsub.s32 4294967266, %v7582_v37  ;;  %v2413_v54 = vshrl.u32 %v9705_v46, %v7580_v55  ;;  %v2416_v33 = vshrl.u32 %v9706_v11, %v7580_v55  ;;  %v2764_v25 = vsub.s32 0, %v7585_v35 }
 0x2cc   : > { %v3049_v2 = vsel %vm3043_vm14, %v3046_v4, %v3048_v0  ;;  %v3068_v8 = vadd.s32 1, %v7554_v38  ;;  %v4163_v41 = vadd.s32 4294967169, %v830_v61  ;;  %v2404_v58 = vshrl.u32 %v9723_v5, %v7580_v55 }
 0x2cd   : > { %v2407_v17 = vshrl.u32 %v9722_v16, %v7580_v55  ;;  %v2412_v9 = vshll.u32 %v9707_v15, %v2400_v59  ;;  %v2415_v52 = vshll.u32 %v9705_v46, %v2400_v59  ;;  %vm3067_vm0 = vc.u32 %v7572_v26, %v7553_v1 }
 0x2ce   : > { %v7618_v43 = vshrl.u32 %v2398_v60, 5  ;;  %v2410_v6 = vshrl.u32 %v9707_v15, %v7580_v55  ;;  %v836_v44 = vadd.s32 1, %v4163_v41  ;;  %v2403_v40 = vshll.u32 %v9724_v12, %v2400_v59 }
 0x2cf   : > { %v2406_v20 = vshll.u32 %v9723_v5, %v2400_v59  ;;  %v2414_v4 = vor.u32 %v2413_v54, %v2412_v9  ;;  %v2417_v0 = vor.u32 %v2416_v33, %v2415_v52  ;;  %v2050_v61 = vand.u32 2147483647, %v2049_v39 }
 0x2d0   : > { %v1730_v32 = vsub.s32 32, %v7582_v37  ;;  %v2409_v57 = vshll.u32 %v9722_v16, %v2400_v59  ;;  %vm837_vm12 = vcmp.gt.s32.totalorder %v836_v44, 0  ;;  %v1735_v60 = vadd.s32 127, %v1734_v53 }
 0x2d1   : > { %v7626_v7 = vpop.eup %4549  ;;  %v9777_v10 = vand.u32 2147483647, %v7406_v51  ;;  %v7630_v48 = vor.u32 %v2404_v58, %v2403_v40  ;;  %v7632_v41 = vor.u32 %v2407_v17, %v2406_v20  ;;  %vm821_vm1 = vcmp.eq.s32.totalorder %v7458_v21, 2 }
 0x2d2   : > { %v7634_v27 = vpop.eup %4551  ;;  %v3065_v39 = vmul.u32 %v7546_v47, %v3049_v2  ;;  %v3069_v59 = vsel %vm3067_vm0, %v3068_v8, %v7554_v38  ;;  %v2411_v54 = vor.u32 %v2410_v6, %v2409_v57  ;;  %vm2421_vm3 = vcmp.lt.s32.totalorder %v7618_v43, 4  ;;  %v9778_v2 = vld [vmem:[#allocation16_spill] sm:$0xff] }
 0x2d3   : > { %v2393_v63 = vand.u32 8388607, %v9777_v10  ;;  %v4236_v10 = vmin.u32 %v2764_v25, %v7585_v35  ;;  %v2427_v53 = vsel %vm2421_vm3, %v2414_v4, 920167782  ;;  %v2431_v33 = vsel %vm2421_vm3, %v2417_v0, 1326507024 }
 0x2d4   : > { %v838_v58 = vsel %vm837_vm12, %v836_v44, 0  ;;  %v2679_v47 = vsel %vm2596_vm6, %v2678_v18, %v7562_v23  ;;  %vm1972_vm4 = vcmp.lt.s32.totalorder %v9778_v2, 0  ;;  %v2053_v17 = vmul.f32 %v2052_v30, %v2050_v61 }
 0x2d5   : > { %v1732_v38 = vshrl.u32 %v1714_v14, %v1730_v32  ;;  %vm2418_vm5 = vcmp.lt.s32.totalorder %v7618_v43, 1  ;;  %v7653_v57 = vadd.s32 %v3069_v59, %v3065_v39  ;;  %v2394_v25 = vor.u32 8388608, %v2393_v63  ;;  %v9779_v14 = vld [vmem:[#allocation17_spill] sm:$0xff] }
 0x2d6   : > { %vm2420_vm7 = vcmp.lt.s32.totalorder %v7618_v43, 3  ;;  %v2426_v8 = vsel %vm2418_vm5, %v7630_v48, %v7632_v41  ;;  %v2430_v23 = vsel %vm2418_vm5, %v7632_v41, %v2411_v54  ;;  %v840_v30 = vand.u32 31, %v838_v58 }
 0x2d7   : > { %v2428_v9 = vsel %vm2420_vm7, %v2411_v54, %v2427_v53  ;;  %v2432_v18 = vsel %vm2420_vm7, %v2414_v4, %v2431_v33  ;;  %v7669_v63 = vadd.f32 %v7576_v24, %v9779_v14  ;;  %v822_v32 = vxor.u32 2147483648, %v7626_v7 }
 0x2d8   : > { %v1736_v52 = vshll.u32 %v1735_v60, 23  ;;  %v2766_v6 = vclz %v4236_v10  ;;  %v2682_v44 = vsel %vm7508_vm9, %v6755_v42, %v2679_v47  ;;  %v7676_v40 = vand.u32 3, %v7589_v28 }
 0x2d9   : > { %v1731_v20 = vshll.u32 %v7446_v34, %v7582_v37  ;;  %vm2419_vm6 = vcmp.lt.s32.totalorder %v7618_v43, 2  ;;  %v819_v4 = vxor.u32 2147483648, %v7634_v27  ;;  %v2054_v24 = vxor.u32 2147483648, %v2053_v17 }
 0x2da   : > { %v2429_v0 = vsel %vm2419_vm6, %v2426_v8, %v2428_v9  ;;  %v2433_v61 = vsel %vm2419_vm6, %v2430_v23, %v2432_v18  ;;  %v3071_v49 = vadd.s32 536870912, %v7653_v57  ;;  %v7687_v39 = vshll.u32 %v2394_v25, 8 }
 0x2db   : > { %v1733_v60 = vor.u32 %v1732_v38, %v1731_v20  ;;  %v7689_v28 = vsub.s32 32, %v840_v30  ;;  %v7694_v34 = vsel %vm821_vm1, %v822_v32, %v7634_v27  ;;  %4553 = vcosq.f32 %v2682_v44 }
 0x2dc   : > { %v1737_v37 = vor.u32 4788187, %v1736_v52  ;;  %v4237_v59 = vadd.s32 4294967294, %v2766_v6  ;;  %v7697_v10 = vmul.u32.u64.low %v7687_v39, %v2433_v61  ;;  %v7698_v53 = vmul.u32.u64.high %v7687_v39, %v2433_v61, %v7697_v10 }
 0x2dd   : > { %v7701_v33 = vmul.u32.u64.low %v7687_v39, %v2429_v0  ;;  %v7702_v47 = vmul.u32.u64.high %v7687_v39, %v2429_v0, %v7701_v33  ;;  %vm818_vm8 = vcmp.eq.s32.totalorder %v7458_v21, 0  ;;  %4555 = vsinq.f32 %v2682_v44  ;;  %v422_v44 = vpop.permute.xlu0 %421 }
 0x2de   : > { %v9780_v38 = vand.u32 2147483647, %v9778_v2  ;;  %v2055_v25 = vsel %vm1972_vm4, %v2054_v24, %v2053_v17  ;;  %v2056_v8 = vsub.s32 4, %v7304_v19  ;;  %v2423_v9 = vsel %vm2421_vm3, %v2411_v54, 2102212464 }
 0x2df   : > { %v1740_v23 = vcvt.s32.f32 %v1733_v60  ;;  %v7717_v18 = vshrl.u32 %v3071_v49, 30  ;;  %v2402_v14 = vshrl.u32 %v9724_v12, %v7580_v55  ;;  %v853_v32 = vshrl.u32 %v9705_v46, %v7689_v28 }
 0x2e0   : > { %vm7708_vm9 = vcmp.le.f32.partialorder %v9780_v38, 0.7853982  ;;  %v1738_v52 = vand.u32 2147483647, %v1737_v37  ;;  %vm4238_vm10 = vcmp.lt.s32.totalorder %v4237_v59, 0  ;;  %v856_v17 = vshrl.u32 %v9706_v11, %v7689_v28 }
 0x2e1   : > { %9783 = vst [vmem:[#allocation16_spill] sm:$0xff] %v7717_v18  ;;  %v2422_v54 = vsel %vm2418_vm5, %v2402_v14, %v7630_v48  ;;  %v2424_v20 = vsel %vm2420_vm7, %v7632_v41, %v2423_v9  ;;  %v7732_v55 = vshrl.u32 %v838_v58, 5  ;;  %v852_v24 = vshll.u32 %v9707_v15, %v840_v30  ;;  %v9784_v58 = vld [vmem:[#allocation15_spill] sm:$0xff] }
 0x2e2   : > { %v844_v0 = vshrl.u32 %v9723_v5, %v7689_v28  ;;  %v847_v61 = vshrl.u32 %v9722_v16, %v7689_v28  ;;  %v850_v60 = vshrl.u32 %v9707_v15, %v7689_v28  ;;  %v855_v49 = vshll.u32 %v9705_v46, %v840_v30 }
 0x2e3   : > { %v7742_v48 = vsel %vm4238_vm10, 0, %v4237_v59  ;;  %v3073_v37 = vshll.u32 %v7717_v18, 30  ;;  %v854_v41 = vor.u32 %v853_v32, %v852_v24  ;;  %v475_v10 = vmul.f32 %v9784_v58, %v422_v44 }
 0x2e4   : > { %v843_v38 = vshll.u32 %v9724_v12, %v840_v30  ;;  %v846_v9 = vshll.u32 %v9723_v5, %v840_v30  ;;  %v849_v14 = vshll.u32 %v9722_v16, %v840_v30  ;;  %v857_v6 = vor.u32 %v856_v17, %v855_v49 }
 0x2e5   : > { %v2425_v51 = vsel %vm2419_vm6, %v2422_v54, %v2424_v20  ;;  %vm2443_vm13 = vc.u32 %v7698_v53, %v7701_v33  ;;  %v2444_v59 = vadd.s32 1, %v7702_v47  ;;  %v9785_v18 = vand.u32 2147483647, %v7560_v36  ;;  %v7756_v24 = vpop.eup %4553 }
 0x2e6   : > { %vm817_vm11 = vcmp.lt.s32.totalorder %v7458_v21, 2  ;;  %v7759_v44 = vor.u32 %v844_v0, %v843_v38  ;;  %v7761_v58 = vor.u32 %v847_v61, %v846_v9  ;;  %v851_v30 = vor.u32 %v850_v60, %v849_v14 }
 0x2e7   : > { %v833_v32 = vand.u32 8388607, %v9785_v18  ;;  %vm861_vm14 = vcmp.lt.s32.totalorder %v7732_v55, 4  ;;  %v820_v43 = vsel %vm818_vm8, %v7626_v7, %v819_v4  ;;  %v2057_v17 = vsel %vm1972_vm4, %v2056_v8, %v7304_v19  ;;  %v7775_v20 = vpop.eup %4555 }
 0x2e8   : > { %v2058_v18 = vsel %vm7708_vm9, %v9778_v2, %v2055_v25  ;;  %v867_v54 = vsel %vm861_vm14, %v854_v41, 920167782  ;;  %v1741_v0 = vmul.f32 %v1740_v23, %v1738_v52  ;;  %v2774_v61 = vsub.s32 4294967266, %v7742_v48  ;;  %v407_v23 = vpop.permute.xlu1 %406 }
 0x2e9   : > { %v7779_v60 = vsub.s32 %v7653_v57, %v3073_v37  ;;  %v871_v7 = vsel %vm861_vm14, %v857_v6, 1326507024  ;;  %vm1660_vm15 = vcmp.lt.s32.totalorder %v6946_v50, 0  ;;  %v2441_v19 = vmul.u32 %v7687_v39, %v2425_v51  ;;  %v9786_v39 = vld [vmem:[#allocation20_spill] sm:$0xff] }
 0x2ea   : > { %v2445_v4 = vsel %vm2443_vm13, %v2444_v59, %v7702_v47  ;;  %vm858_vm0 = vcmp.lt.s32.totalorder %v7732_v55, 1  ;;  %vm860_vm12 = vcmp.lt.s32.totalorder %v7732_v55, 3  ;;  %vm814_vm1 = vweird.f32 %v6589_v45 }
 0x2eb   : > { %v834_v57 = vor.u32 8388608, %v833_v32  ;;  %v866_v25 = vsel %vm858_vm0, %v7759_v44, %v7761_v58  ;;  %v868_v51 = vsel %vm860_vm12, %v851_v30, %v867_v54  ;;  %v7799_v8 = vadd.f32 %v9786_v39, %v475_v10 }
 0x2ec   : > { %v2059_v47 = vsel %vm7708_vm9, 0, %v2057_v17  ;;  %4557 = vcosq.f32 %v2058_v18  ;;  %v870_v52 = vsel %vm858_vm0, %v7761_v58, %v851_v30  ;;  %v872_v6 = vsel %vm860_vm12, %v854_v41, %v871_v7 }
 0x2ed   : > { %9787 = vst [vmem:[#allocation17_spill] sm:$0xff] %v7799_v8  ;;  %4559 = vsinq.f32 %v2058_v18  ;;  %v2775_v49 = vadd.s32 127, %v2774_v61  ;;  %v7808_v37 = vadd.s32 %v2445_v4, %v2441_v19  ;;  %vm859_vm3 = vcmp.lt.s32.totalorder %v7732_v55, 2 }
 0x2ee   : > { %v1742_v10 = vxor.u32 2147483648, %v1741_v0  ;;  %v3076_v38 = vsub.s32 0, %v7779_v60  ;;  %v869_v27 = vsel %vm859_vm3, %v866_v25, %v868_v51  ;;  %v472_v9 = vmul.f32 %v7379_v13, %v407_v23 }
 0x2ef   : > { %vm2690_vm4 = vcmp.eq.s32.totalorder %v7676_v40, 0  ;;  %v2770_v14 = vsub.s32 32, %v7742_v48  ;;  %v873_v41 = vsel %vm859_vm3, %v870_v52, %v872_v6  ;;  %v7819_v59 = vshll.u32 %v834_v57, 8 }
 0x2f0   : > { %v3117_v32 = vand.u32 2139095040, %v7799_v8  ;;  %v824_v17 = vsel %vm817_vm11, %v820_v43, %v7694_v34  ;;  %vm2693_vm5 = vcmp.eq.s32.totalorder %v7676_v40, 2  ;;  %v2063_v18 = vadd.s32 3, %v2059_v47 }
 0x2f1   : > { %v2754_v13 = vadd.s32 %v7395_v3, %v7401_v62  ;;  %v2776_v54 = vshll.u32 %v2775_v49, 23  ;;  %v2447_v61 = vadd.s32 536870912, %v7808_v37  ;;  %v1744_v4 = vsub.s32 4, %v7392_v31 }
 0x2f2   : > { %v7830_v7 = vmul.u32.u64.low %v7819_v59, %v869_v27  ;;  %v7831_v19 = vmul.u32.u64.high %v7819_v59, %v869_v27, %v7830_v7  ;;  %v4248_v57 = vmin.u32 %v3076_v38, %v7779_v60  ;;  %vm2689_vm7 = vcmp.lt.s32.totalorder %v7676_v40, 2 }
 0x2f3   : > { %v7837_v21 = vmul.u32.u64.low %v7819_v59, %v873_v41  ;;  %v7838_v34 = vmul.u32.u64.high %v7819_v59, %v873_v41, %v7837_v21  ;;  %v1743_v3 = vsel %vm1660_vm15, %v1742_v10, %v1741_v0  ;;  %v2772_v62 = vshrl.u32 %v2754_v13, %v2770_v14 }
 0x2f4   : > { %v3118_v43 = vshrl.u32 %v3117_v32, 23  ;;  %v7844_v25 = vadd.f32 %v7403_v22, %v472_v9  ;;  %v825_v51 = vsel %vm814_vm1, nan, %v824_v17  ;;  %v2691_v39 = vxor.u32 2147483648, %v7775_v20 }
 0x2f5   : > { %v2694_v23 = vxor.u32 2147483648, %v7756_v24  ;;  %v9789_v47 = vand.u32 2147483647, %v6946_v50  ;;  %v2771_v0 = vshll.u32 %v7585_v35, %v7742_v48  ;;  %v2777_v6 = vor.u32 4788187, %v2776_v54 }
 0x2f6   : > { %9788 = vst [vmem:[#allocation15_spill] sm:$0xff] %v7844_v25  ;;  %v7858_v49 = vshrl.u32 %v2447_v61, 30  ;;  %v863_v45 = vsel %vm861_vm14, %v851_v30, 2102212464  ;;  %v4558_v22 = vpop.eup %4557  ;;  %vm2686_vm8 = vweird.f32 %v6755_v42  ;;  %v2064_v10 = vand.u32 3, %v2063_v18 }
 0x2f7   : > { %vm7852_vm6 = vcmp.le.f32.partialorder %v9789_v47, 0.7853982  ;;  %v3078_v27 = vclz %v4248_v57  ;;  %v842_v9 = vshrl.u32 %v9724_v12, %v7689_v28  ;;  %v4560_v14 = vpop.eup %4559  ;;  %v1745_v35 = vsel %vm1660_vm15, %v1744_v4, %v7392_v31 }
 0x2f8   : > { %v1746_v38 = vsel %vm7852_vm6, %v6946_v50, %v1743_v3  ;;  %v2773_v48 = vor.u32 %v2772_v62, %v2771_v0  ;;  %v4251_v41 = vadd.s32 4294967169, %v3118_v43  ;;  %v2805_v30 = vand.u32 2139095040, %v7844_v25  ;;  %v4641_v43 = vld [vmem:[#allocation5 + $0x10] sm:$0xff] }
 0x2f9   : > { %v2692_v32 = vsel %vm2690_vm4, %v7756_v24, %v2691_v39  ;;  %v2695_v17 = vsel %vm2693_vm5, %v2694_v23, %v7775_v20  ;;  %v862_v28 = vsel %vm858_vm0, %v842_v9, %v7759_v44  ;;  %v864_v31 = vsel %vm860_vm12, %v7761_v58, %v863_v45 }
 0x2fa   : > { %4561 = vcosq.f32 %v1746_v38  ;;  %v2778_v18 = vand.u32 2147483647, %v2777_v6  ;;  %v2449_v13 = vshll.u32 %v7858_v49, 30  ;;  %v884_v54 = vadd.s32 1, %v7831_v19 }
 0x2fb   : > { %v1747_v24 = vsel %vm7852_vm6, 0, %v1745_v35  ;;  %4563 = vsinq.f32 %v1746_v38  ;;  %v4249_v61 = vadd.s32 4294967294, %v3078_v27  ;;  %vm883_vm9 = vc.u32 %v7838_v34, %v7830_v7 }
 0x2fc   : > { %v2780_v20 = vcvt.s32.f32 %v2773_v48  ;;  %v865_v44 = vsel %vm859_vm3, %v862_v28, %v864_v31  ;;  %v3124_v4 = vadd.s32 1, %v4251_v41  ;;  %v2806_v58 = vshrl.u32 %v2805_v30, 23 }
 0x2fd   : > { %v3895_v57 = vrot.slane %v7669_v63, 4  ;;  %v2696_v21 = vsel %vm2689_vm7, %v2692_v32, %v2695_v17  ;;  %v2067_v3 = vxor.u32 2147483648, %v4560_v14  ;;  %v2070_v62 = vxor.u32 2147483648, %v4558_v22 }
 0x2fe   : > { %v3844_v39 = vmul.f32 %v4641_v43, %v825_v51  ;;  %v2781_v23 = vmul.f32 %v2780_v20, %v2778_v18  ;;  %v7896_v47 = vsub.s32 %v7808_v37, %v2449_v13  ;;  %v885_v52 = vsel %vm883_vm9, %v884_v54, %v7831_v19  ;;  %v9793_v18 = vld [vmem:[#allocation19_spill] sm:$0xff] }
 0x2ff   : > { %vm2066_vm10 = vcmp.eq.s32.totalorder %v2064_v10, 0  ;;  %v1751_v55 = vadd.s32 3, %v1747_v24  ;;  %vm4250_vm13 = vcmp.lt.s32.totalorder %v4249_v61, 0  ;;  %v881_v0 = vmul.u32 %v7819_v59, %v865_v44  ;;  %v4642_v59 = vld [vmem:[#allocation5] sm:$0xff] }
 0x300   : > { %v2697_v6 = vsel %vm2686_vm8, nan, %v2696_v21  ;;  %vm2069_vm11 = vcmp.eq.s32.totalorder %v2064_v10, 2  ;;  %vm3125_vm14 = vcmp.gt.s32.totalorder %v3124_v4, 0  ;;  %v4239_v40 = vadd.s32 4294967169, %v2806_v58 }
 0x301   : > { %v2068_v45 = vsel %vm2066_vm10, %v4558_v22, %v2067_v3  ;;  %v2071_v38 = vsel %vm2069_vm11, %v2070_v62, %v4560_v14  ;;  %v2784_v51 = vsub.s32 4, %v7526_v56  ;;  %v7903_v27 = vadd.s32 %v885_v52, %v881_v0 }
 0x302   : > { %v3878_v37 = vsel %vm3874_vm2, %v3844_v39, 0.0  ;;  %v2782_v19 = vxor.u32 2147483648, %v2781_v23  ;;  %v7906_v9 = vsel %vm4250_vm13, 0, %v4249_v61  ;;  %v2452_v35 = vsub.s32 0, %v7896_v47 }
 0x303   : > { %v3862_v48 = vmul.f32 %v4642_v59, %v2697_v6  ;;  %vm2065_vm15 = vcmp.lt.s32.totalorder %v2064_v10, 2  ;;  %v7909_v42 = vand.u32 3, %v1751_v55  ;;  %v3126_v41 = vsel %vm3125_vm14, %v3124_v4, 0 }
 0x304   : > { %v4562_v30 = vpop.eup %4561  ;;  %vm2062_vm0 = vweird.f32 %v9778_v2  ;;  %v2072_v22 = vsel %vm2065_vm15, %v2068_v45, %v2071_v38  ;;  %vm2700_vm12 = vcmp.lt.s32.totalorder %v7096_v29, 0  ;;  %v2812_v14 = vadd.s32 1, %v4239_v40  ;;  %v9798_v45 = vld [vmem:[#allocation25_spill] sm:$0xff] }
 0x305   : > { %v4564_v32 = vpop.eup %4563  ;;  %v7914_v17 = vadd.f32 %v3895_v57, %v7669_v63  ;;  %v2785_v28 = vsel %vm2700_vm12, %v2784_v51, %v7526_v56  ;;  %v3086_v31 = vsub.s32 4294967266, %v7906_v9  ;;  %v887_v10 = vadd.s32 536870912, %v7903_v27  ;;  %v373_v57 = vpop.permute.xlu0 %372 }
 0x306   : > { %v7920_v13 = vadd.f32 %v3878_v37, %v9793_v18  ;;  %v2783_v54 = vsel %vm2700_vm12, %v2782_v19, %v2781_v23  ;;  %v4224_v2 = vmin.u32 %v2452_v35, %v7896_v47  ;;  %v3128_v24 = vand.u32 31, %v3126_v41 }
 0x307   : > { %9792 = vst [vmem:[#allocation20_spill] sm:$0xff] %v7914_v17  ;;  %v7924_v61 = vsel %vm3874_vm2, %v3862_v48, 0.0  ;;  %v2073_v20 = vsel %vm2062_vm0, nan, %v2072_v22  ;;  %vm1754_vm1 = vcmp.eq.s32.totalorder %v7909_v42, 0  ;;  %v9795_v63 = vand.u32 2147483647, %v7096_v29 }
 0x308   : > { %9794 = vst [vmem:[#allocation19_spill] sm:$0xff] %v7920_v13  ;;  %v1755_v44 = vxor.u32 2147483648, %v4564_v32  ;;  %v1758_v4 = vxor.u32 2147483648, %v4562_v30  ;;  %vm2813_vm4 = vcmp.gt.s32.totalorder %v2812_v14, 0  ;;  %v3082_v3 = vsub.s32 32, %v7906_v9 }
 0x309   : > { %vm7929_vm3 = vcmp.le.f32.partialorder %v9795_v63, 0.7853982  ;;  %v3087_v62 = vadd.s32 127, %v3086_v31  ;;  %v7939_v39 = vshrl.u32 %v887_v10, 30  ;;  %vm1757_vm5 = vcmp.eq.s32.totalorder %v7909_v42, 2 }
 0x30a   : > { %v2787_v58 = vsel %vm7929_vm3, 0, %v2785_v28  ;;  %v2786_v21 = vsel %vm7929_vm3, %v7096_v29, %v2783_v54  ;;  %v2454_v23 = vclz %v4224_v2  ;;  %v9647_v52 = vand.u32 2147483647, %v7799_v8  ;;  %v9799_v28 = vld [vmem:[#allocation26_spill] sm:$0xff] }
 0x30b   : > { %v7943_v55 = vsub.s32 32, %v3128_v24  ;;  %v7945_v0 = vmul.f32 %v4641_v43, %v2073_v20  ;;  %v3066_v6 = vadd.s32 %v7553_v1, %v7572_v26  ;;  %v2814_v40 = vsel %vm2813_vm4, %v2812_v14, 0 }
 0x30c   : > { %v465_v38 = vmul.f32 %v9798_v45, %v373_v57  ;;  %v7952_v51 = vsel %vm1754_vm1, %v4562_v30, %v1755_v44  ;;  %v7954_v37 = vsel %vm1757_vm5, %v1758_v4, %v4564_v32  ;;  %4565 = vcosq.f32 %v2786_v21 }
 0x30d   : > { %v7956_v19 = vadd.s32 3, %v2787_v58  ;;  %4567 = vsinq.f32 %v2786_v21  ;;  %v3084_v35 = vshrl.u32 %v3066_v6, %v3082_v3  ;;  %v3088_v59 = vshll.u32 %v3087_v62, 23 }
 0x30e   : > { %v889_v43 = vshll.u32 %v7939_v39, 30  ;;  %v7959_v48 = vadd.s32 4294967294, %v2454_v23  ;;  %v3121_v1 = vand.u32 8388607, %v9647_v52  ;;  %v3141_v26 = vshrl.u32 %v9705_v46, %v7943_v55 }
 0x30f   : > { %v2816_v30 = vand.u32 31, %v2814_v40  ;;  %v3132_v22 = vshrl.u32 %v9723_v5, %v7943_v55  ;;  %v3135_v14 = vshrl.u32 %v9722_v16, %v7943_v55  ;;  %v3144_v32 = vshrl.u32 %v9706_v11, %v7943_v55 }
 0x310   : > { %v7972_v31 = vadd.f32 %v9799_v28, %v465_v38  ;;  %v7974_v10 = vshrl.u32 %v3126_v41, 5  ;;  %v3131_v18 = vshll.u32 %v9724_v12, %v3128_v24  ;;  %v3140_v54 = vshll.u32 %v9707_v15, %v3128_v24 }
 0x311   : > { %v9646_v2 = vand.u32 2147483647, %v7844_v25  ;;  %v7980_v20 = vsub.s32 %v7903_v27, %v889_v43  ;;  %v3134_v63 = vshll.u32 %v9723_v5, %v3128_v24  ;;  %v3138_v56 = vshrl.u32 %v9707_v15, %v7943_v55 }
 0x312   : > { %v3143_v44 = vshll.u32 %v9705_v46, %v3128_v24  ;;  %v3083_v41 = vshll.u32 %v7779_v60, %v7906_v9  ;;  %v3137_v4 = vshll.u32 %v9722_v16, %v3128_v24  ;;  %v3142_v58 = vor.u32 %v3141_v26, %v3140_v54 }
 0x313   : > { %v7989_v57 = vsub.s32 32, %v2816_v30  ;;  %v7991_v21 = vor.u32 %v3132_v22, %v3131_v18  ;;  %v7993_v3 = vor.u32 %v3135_v14, %v3134_v63  ;;  %v2077_v62 = vand.u32 2139095040, %v7972_v31 }
 0x314   : > { %v3145_v27 = vor.u32 %v3144_v32, %v3143_v44  ;;  %v7996_v23 = vor.u32 %v3084_v35, %v3083_v41  ;;  %v7998_v6 = vor.u32 4788187, %v3088_v59  ;;  %vm4226_vm7 = vcmp.lt.s32.totalorder %v7959_v48, 0 }
 0x315   : > { %v3122_v45 = vor.u32 8388608, %v3121_v1  ;;  %v892_v60 = vsub.s32 0, %v7980_v20  ;;  %v3139_v9 = vor.u32 %v3138_v56, %v3137_v4  ;;  %vm3149_vm6 = vcmp.lt.s32.totalorder %v7974_v10, 4 }
 0x316   : > { %v8005_v24 = vand.u32 8388607, %v9646_v2  ;;  %v8007_v38 = vpop.eup %4565  ;;  %vm3146_vm8 = vcmp.lt.s32.totalorder %v7974_v10, 1  ;;  %v3155_v35 = vsel %vm3149_vm6, %v3142_v58, 920167782  ;;  %v2829_v59 = vshrl.u32 %v9705_v46, %v7989_v57 }
 0x317   : > { %v2832_v43 = vshrl.u32 %v9706_v11, %v7989_v57  ;;  %v8016_v1 = vpop.eup %4567  ;;  %vm3148_vm9 = vcmp.lt.s32.totalorder %v7974_v10, 3  ;;  %v3154_v26 = vsel %vm3146_vm8, %v7991_v21, %v7993_v3  ;;  %v3159_v22 = vsel %vm3149_vm6, %v3145_v27, 1326507024 }
 0x318   : > { %v2078_v14 = vshrl.u32 %v2077_v62, 23  ;;  %v2820_v32 = vshrl.u32 %v9723_v5, %v7989_v57  ;;  %v2823_v28 = vshrl.u32 %v9722_v16, %v7989_v57  ;;  %v2828_v18 = vshll.u32 %v9707_v15, %v2816_v30 }
 0x319   : > { %v2831_v54 = vshll.u32 %v9705_v46, %v2816_v30  ;;  %vm1753_vm10 = vcmp.lt.s32.totalorder %v7909_v42, 2  ;;  %v3156_v63 = vsel %vm3148_vm9, %v3139_v9, %v3155_v35  ;;  %v8034_v56 = vshrl.u32 %v2814_v40, 5 }
 0x31a   : > { %v2826_v44 = vshrl.u32 %v9707_v15, %v7989_v57  ;;  %v4211_v41 = vadd.s32 4294967169, %v2078_v14  ;;  %v2819_v4 = vshll.u32 %v9724_v12, %v2816_v30  ;;  %v2822_v27 = vshll.u32 %v9723_v5, %v2816_v30 }
 0x31b   : > { %v2830_v62 = vor.u32 %v2829_v59, %v2828_v18  ;;  %v2833_v2 = vor.u32 %v2832_v43, %v2831_v54  ;;  %vm3147_vm13 = vcmp.lt.s32.totalorder %v7974_v10, 2  ;;  %v3158_v52 = vsel %vm3146_vm8, %v7993_v3, %v3139_v9 }
 0x31c   : > { %v2825_v35 = vshll.u32 %v9722_v16, %v2816_v30  ;;  %v2084_v40 = vadd.s32 1, %v4211_v41  ;;  %v3157_v17 = vsel %vm3147_vm13, %v3154_v26, %v3156_v63  ;;  %v3160_v14 = vsel %vm3148_vm9, %v3142_v58, %v3159_v22 }
 0x31d   : > { %v2821_v13 = vor.u32 %v2820_v32, %v2819_v4  ;;  %v2824_v25 = vor.u32 %v2823_v28, %v2822_v27  ;;  %v8049_v8 = vshll.u32 %v3122_v45, 8  ;;  %vm2837_vm11 = vcmp.lt.s32.totalorder %v8034_v56, 4  ;;  %v9800_v4 = vld [vmem:[#allocation16_spill] sm:$0xff] }
 0x31e   : > { %v2827_v59 = vor.u32 %v2826_v44, %v2825_v35  ;;  %vm2085_vm14 = vcmp.gt.s32.totalorder %v2084_v40, 0  ;;  %v8055_v43 = vsel %vm4226_vm7, 0, %v7959_v48  ;;  %v2843_v30 = vsel %vm2837_vm11, %v2830_v62, 920167782 }
 0x31f   : > { %v2847_v26 = vsel %vm2837_vm11, %v2833_v2, 1326507024  ;;  %v2086_v58 = vsel %vm2085_vm14, %v2084_v40, 0  ;;  %v3161_v45 = vsel %vm3147_vm13, %v3158_v52, %v3160_v14  ;;  %vm2834_vm15 = vcmp.lt.s32.totalorder %v8034_v56, 1 }
 0x320   : > { %v8064_v22 = vmul.u32.u64.low %v8049_v8, %v3157_v17  ;;  %v8065_v32 = vmul.u32.u64.high %v8049_v8, %v3157_v17, %v8064_v22  ;;  %v4164_v48 = vmin.u32 %v892_v60, %v7980_v20  ;;  %v2810_v28 = vor.u32 8388608, %v8005_v24 }
 0x321   : > { %vm2836_vm0 = vcmp.lt.s32.totalorder %v8034_v56, 3  ;;  %v2842_v2 = vsel %vm2834_vm15, %v2821_v13, %v2824_v25  ;;  %v2846_v52 = vsel %vm2834_vm15, %v2824_v25, %v2827_v59  ;;  %v2088_v54 = vand.u32 31, %v2086_v58 }
 0x322   : > { %v2844_v18 = vsel %vm2836_vm0, %v2827_v59, %v2843_v30  ;;  %v2848_v17 = vsel %vm2836_vm0, %v2830_v62, %v2847_v26  ;;  %v8084_v60 = vsel %vm1753_vm10, %v7952_v51, %v7954_v37  ;;  %v8087_v24 = vand.u32 3, %v7956_v19 }
 0x323   : > { %v8090_v63 = vmul.u32.u64.low %v8049_v8, %v3161_v45  ;;  %v8091_v44 = vmul.u32.u64.high %v8049_v8, %v3161_v45, %v8090_v63  ;;  %v3090_v41 = vand.u32 2147483647, %v7998_v6  ;;  %v3096_v27 = vsub.s32 4, %v9800_v4 }
 0x324   : > { %v3151_v62 = vsel %vm3149_vm6, %v3139_v9, 2102212464  ;;  %vm2835_vm12 = vcmp.lt.s32.totalorder %v8034_v56, 2  ;;  %v2462_v42 = vsub.s32 4294967266, %v8055_v43  ;;  %v3130_v51 = vshrl.u32 %v9724_v12, %v7943_v55 }
 0x325   : > { %v2845_v37 = vsel %vm2835_vm12, %v2842_v2, %v2844_v18  ;;  %v2849_v19 = vsel %vm2835_vm12, %v2846_v52, %v2848_v17  ;;  %v3092_v6 = vcvt.s32.f32 %v7996_v23  ;;  %v894_v35 = vclz %v4164_v48  ;;  %v441_v52 = vpop.permute.xlu1 %440 }
 0x326   : > { %v8106_v40 = vshll.u32 %v2810_v28, 8  ;;  %v8108_v14 = vsub.s32 32, %v2088_v54  ;;  %v3150_v30 = vsel %vm3146_vm8, %v3130_v51, %v7991_v21  ;;  %v3152_v55 = vsel %vm3148_vm9, %v7993_v3, %v3151_v62 }
 0x327   : > { %v2839_v26 = vsel %vm2837_vm11, %v2827_v59, 2102212464  ;;  %v8129_v18 = vmul.f32 %v3092_v6, %v3090_v41  ;;  %v8131_v21 = vadd.s32 127, %v2462_v42  ;;  %v2818_v3 = vshrl.u32 %v9724_v12, %v7989_v57 }
 0x328   : > { %v8120_v23 = vmul.u32.u64.low %v8106_v40, %v2849_v19  ;;  %v8121_v45 = vmul.u32.u64.high %v8106_v40, %v2849_v19, %v8120_v23  ;;  %v8124_v48 = vmul.u32.u64.low %v8106_v40, %v2845_v37  ;;  %v8125_v28 = vmul.u32.u64.high %v8106_v40, %v2845_v37, %v8124_v48  ;;  %v4643_v19 = vld [vmem:[#allocation7 + $0x8] sm:$0xff] }
 0x329   : > { %v4165_v59 = vadd.s32 4294967294, %v894_v35  ;;  %v3153_v17 = vsel %vm3147_vm13, %v3150_v30, %v3152_v55  ;;  %v3172_v63 = vadd.s32 1, %v8065_v32  ;;  %v2101_v62 = vshrl.u32 %v9705_v46, %v8108_v14 }
 0x32a   : > { %vm3171_vm1 = vc.u32 %v8091_v44, %v8064_v22  ;;  %v2838_v41 = vsel %vm2834_vm15, %v2818_v3, %v2821_v13  ;;  %v2840_v42 = vsel %vm2836_vm0, %v2824_v25, %v2839_v26  ;;  %v2104_v57 = vshrl.u32 %v9706_v11, %v8108_v14  ;;  %v9801_v3 = vld [vmem:[#allocation21_spill] sm:$0xff] }
 0x32b   : > { %v9654_v10 = vand.u32 2147483647, %v7972_v31  ;;  %v8149_v51 = vshrl.u32 %v2086_v58, 5  ;;  %v2100_v37 = vshll.u32 %v9707_v15, %v2088_v54  ;;  %v479_v6 = vmul.f32 %v4643_v19, %v441_v52 }
 0x32c   : > { %v2092_v35 = vshrl.u32 %v9723_v5, %v8108_v14  ;;  %v2095_v13 = vshrl.u32 %v9722_v16, %v8108_v14  ;;  %v2098_v25 = vshrl.u32 %v9707_v15, %v8108_v14  ;;  %v2103_v30 = vshll.u32 %v9705_v46, %v2088_v54 }
 0x32d   : > { %v3169_v55 = vmul.u32 %v8049_v8, %v3153_v17  ;;  %v3173_v58 = vsel %vm3171_vm1, %v3172_v63, %v8065_v32  ;;  %v2841_v26 = vsel %vm2835_vm12, %v2838_v41, %v2840_v42  ;;  %v2102_v23 = vor.u32 %v2101_v62, %v2100_v37  ;;  %v4644_v32 = vld [vmem:[#allocation8 + $0x8] sm:$0xff] }
 0x32e   : > { %vm3012_vm3 = vcmp.lt.s32.totalorder %v9801_v3, 0  ;;  %v2091_v52 = vshll.u32 %v9724_v12, %v2088_v54  ;;  %v2094_v19 = vshll.u32 %v9723_v5, %v2088_v54  ;;  %v2097_v2 = vshll.u32 %v9722_v16, %v2088_v54 }
 0x32f   : > { %v2105_v9 = vor.u32 %v2104_v57, %v2103_v30  ;;  %vm2797_vm4 = vcmp.eq.s32.totalorder %v8087_v24, 2  ;;  %vm2859_vm5 = vc.u32 %v8121_v45, %v8124_v48  ;;  %v2860_v8 = vadd.s32 1, %v8125_v28 }
 0x330   : > { %v2081_v56 = vand.u32 8388607, %v9654_v10  ;;  %v8176_v17 = vadd.f32 %v4644_v32, %v479_v6  ;;  %vm2794_vm7 = vcmp.eq.s32.totalorder %v8087_v24, 0  ;;  %v8179_v63 = vor.u32 %v2092_v35, %v2091_v52 }
 0x331   : > { %v8181_v62 = vor.u32 %v2095_v13, %v2094_v19  ;;  %v2099_v54 = vor.u32 %v2098_v25, %v2097_v2  ;;  %vm2109_vm6 = vcmp.lt.s32.totalorder %v8149_v51, 4  ;;  %v3094_v41 = vxor.u32 2147483648, %v8129_v18 }
 0x332   : > { %v2442_v42 = vadd.s32 %v7701_v33, %v7698_v53  ;;  %v2458_v57 = vsub.s32 32, %v8055_v43  ;;  %v2115_v37 = vsel %vm2109_vm6, %v2102_v23, 920167782  ;;  %v2464_v6 = vshll.u32 %v8131_v21, 23 }
 0x333   : > { %vm4166_vm8 = vcmp.lt.s32.totalorder %v4165_v59, 0  ;;  %v8191_v35 = vadd.s32 %v3173_v58, %v3169_v55  ;;  %v2119_v2 = vsel %vm2109_vm6, %v2105_v9, 1326507024  ;;  %v9802_v13 = vand.u32 2147483647, %v9801_v3 }
 0x334   : > { %v2857_v53 = vmul.u32 %v8106_v40, %v2841_v26  ;;  %v2861_v33 = vsel %vm2859_vm5, %v2860_v8, %v8125_v28  ;;  %vm2106_vm10 = vcmp.lt.s32.totalorder %v8149_v51, 1  ;;  %vm2108_vm13 = vcmp.lt.s32.totalorder %v8149_v51, 3 }
 0x335   : > { %vm8197_vm9 = vcmp.le.f32.partialorder %v9802_v13, 0.7853982  ;;  %vm1750_vm11 = vweird.f32 %v6946_v50  ;;  %v2082_v9 = vor.u32 8388608, %v2081_v56  ;;  %v2114_v21 = vsel %vm2106_vm10, %v8179_v63, %v8181_v62 }
 0x336   : > { %v2116_v40 = vsel %vm2108_vm13, %v2099_v54, %v2115_v37  ;;  %v3533_v30 = vand.u32 2139095040, %v8176_v17  ;;  %v2460_v55 = vshrl.u32 %v2442_v42, %v2458_v57  ;;  %v8216_v58 = vsel %vm4166_vm8, 0, %v4165_v59 }
 0x337   : > { %v2118_v28 = vsel %vm2106_vm10, %v8181_v62, %v2099_v54  ;;  %v2120_v26 = vsel %vm2108_vm13, %v2102_v23, %v2119_v2  ;;  %v3175_v52 = vadd.s32 536870912, %v8191_v35  ;;  %v8224_v19 = vadd.s32 %v2861_v33, %v2857_v53  ;;  %v437_v53 = vpop.permute.xlu0 %436 }
 0x338   : > { %vm2107_vm14 = vcmp.lt.s32.totalorder %v8149_v51, 2  ;;  %v3534_v8 = vshrl.u32 %v3533_v30, 23  ;;  %vm2790_vm15 = vweird.f32 %v7096_v29  ;;  %v3097_v59 = vsel %vm3012_vm3, %v3096_v27, %v9800_v4 }
 0x339   : > { %v2459_v56 = vshll.u32 %v7896_v47, %v8055_v43  ;;  %v2465_v32 = vor.u32 4788187, %v2464_v6  ;;  %v2117_v23 = vsel %vm2107_vm14, %v2114_v21, %v2116_v40  ;;  %v9805_v42 = vxor.u32 2147483648, %v8007_v38 }
 0x33a   : > { %v2121_v37 = vsel %vm2107_vm14, %v2118_v28, %v2120_v26  ;;  %v8244_v2 = vshll.u32 %v2082_v9, 8  ;;  %v4267_v13 = vadd.s32 4294967169, %v3534_v8  ;;  %v9806_v4 = vxor.u32 2147483648, %v8016_v1 }
 0x33b   : > { %v2799_v57 = vsel %vm2797_vm4, %v9805_v42, %v8016_v1  ;;  %v3095_v43 = vsel %vm3012_vm3, %v3094_v41, %v8129_v18  ;;  %v2461_v27 = vor.u32 %v2460_v55, %v2459_v56  ;;  %v902_v6 = vsub.s32 4294967266, %v8216_v58  ;;  %v9807_v41 = vld [vmem:[#allocation22_spill] sm:$0xff]  ;;  %v4645_v55 = vld [vmem:[#allocation7] sm:$0xff] }
 0x33c   : > { %v2796_v47 = vsel %vm2794_vm7, %v8007_v38, %v9806_v4  ;;  %v8255_v33 = vshrl.u32 %v3175_v52, 30  ;;  %v2863_v9 = vadd.s32 536870912, %v8224_v19  ;;  %v2466_v1 = vand.u32 2147483647, %v2465_v32 }
 0x33d   : > { %v8259_v21 = vmul.u32.u64.low %v8244_v2, %v2117_v23  ;;  %v8260_v40 = vmul.u32.u64.high %v8244_v2, %v2117_v23, %v8259_v21  ;;  %v8264_v38 = vmul.u32.u64.low %v8244_v2, %v2121_v37  ;;  %v8265_v30 = vmul.u32.u64.high %v8244_v2, %v2121_v37, %v8264_v38 }
 0x33e   : > { %v3540_v28 = vadd.s32 1, %v4267_v13  ;;  %vm2793_vm0 = vcmp.lt.s32.totalorder %v8087_v24, 2  ;;  %v3098_v18 = vsel %vm8197_vm9, %v9801_v3, %v3095_v43  ;;  %vm2388_vm12 = vcmp.lt.s32.totalorder %v9807_v41, 0 }
 0x33f   : > { %v478_v26 = vmul.f32 %v4645_v55, %v437_v53  ;;  %v1761_v52 = vsel %vm1750_vm11, nan, %v8084_v60  ;;  %v2800_v8 = vsel %vm2793_vm0, %v2796_v47, %v2799_v57  ;;  %v2468_v56 = vcvt.s32.f32 %v2461_v27 }
 0x340   : > { %v903_v32 = vadd.s32 127, %v902_v6  ;;  %v3099_v23 = vsel %vm8197_vm9, 0, %v3097_v59  ;;  %v3177_v24 = vshll.u32 %v8255_v33, 30  ;;  %v8278_v42 = vshrl.u32 %v2863_v9, 30  ;;  %v4646_v59 = vld [vmem:[#allocation8] sm:$0xff]  ;;  %v8303_v9 = vld [vmem:[#allocation5 + $0x18] sm:$0xff] }
 0x341   : > { %v2111_v37 = vsel %vm2109_vm6, %v2099_v54, 2102212464  ;;  %4569 = vcosq.f32 %v3098_v18  ;;  %v2469_v13 = vmul.f32 %v2468_v56, %v2466_v1  ;;  %v2090_v4 = vshrl.u32 %v9724_v12, %v8108_v14 }
 0x342   : > { %vm3541_vm1 = vcmp.gt.s32.totalorder %v3540_v28, 0  ;;  %v2801_v50 = vsel %vm2790_vm15, nan, %v2800_v8  ;;  %v2472_v60 = vsub.s32 4, %v7858_v49  ;;  %v898_v25 = vsub.s32 32, %v8216_v58 }
 0x343   : > { %v8288_v57 = vadd.f32 %v4646_v59, %v478_v26  ;;  %v882_v47 = vadd.s32 %v7830_v7, %v7838_v34  ;;  %v904_v54 = vshll.u32 %v903_v32, 23  ;;  %v2110_v43 = vsel %vm2106_vm10, %v2090_v4, %v8179_v63  ;;  %v4648_v63 = vld [vmem:[#allocation5 + $0x8] sm:$0xff] }
 0x344   : > { %v2112_v29 = vsel %vm2108_vm13, %v8181_v62, %v2111_v37  ;;  %v8299_v14 = vsub.s32 %v8191_v35, %v3177_v24  ;;  %v2865_v27 = vshll.u32 %v8278_v42, 30  ;;  %v2132_v6 = vadd.s32 1, %v8260_v40 }
 0x345   : > { %v3542_v53 = vsel %vm3541_vm1, %v3540_v28, 0  ;;  %v3853_v7 = vmul.f32 %v8303_v9, %v1761_v52  ;;  %v3103_v34 = vadd.s32 3, %v3099_v23  ;;  %v2470_v1 = vxor.u32 2147483648, %v2469_v13 }
 0x346   : > { %vm2131_vm3 = vc.u32 %v8265_v30, %v8259_v21  ;;  %v3863_v38 = vmul.f32 %v4648_v63, %v2801_v50  ;;  %v900_v62 = vshrl.u32 %v882_v47, %v898_v25  ;;  %v2113_v35 = vsel %vm2107_vm14, %v2110_v43, %v2112_v29  ;;  %v9813_v29 = vld [vmem:[#allocation18_spill] sm:$0xff] }
 0x347   : > { %v3429_v55 = vand.u32 2139095040, %v8288_v57  ;;  %4571 = vsinq.f32 %v3098_v18  ;;  %v2473_v28 = vsel %vm2388_vm12, %v2472_v60, %v7858_v49  ;;  %v899_v26 = vshll.u32 %v7980_v20, %v8216_v58 }
 0x348   : > { %v3544_v52 = vand.u32 31, %v3542_v53  ;;  %v905_v8 = vor.u32 4788187, %v904_v54  ;;  %v3180_v56 = vsub.s32 0, %v8299_v14  ;;  %v8318_v32 = vsub.s32 %v8224_v19, %v2865_v27  ;;  %v9811_v54 = vld [vmem:[#allocation23_spill] sm:$0xff] }
 0x349   : > { %v2133_v51 = vsel %vm2131_vm3, %v2132_v6, %v8260_v40  ;;  %v3917_v23 = vsel %vm3874_vm2, %v7945_v0, 0.0  ;;  %v9808_v18 = vand.u32 2147483647, %v9807_v41  ;;  %v2471_v49 = vsel %vm2388_vm12, %v2470_v1, %v2469_v13 }
 0x34a   : > { %v2129_v20 = vmul.u32 %v8244_v2, %v2113_v35  ;;  %v3906_v58 = vsel %vm3874_vm2, %v3853_v7, 0.0  ;;  %v3941_v19 = vsel %vm3874_vm2, %v3863_v38, 0.0  ;;  %v901_v37 = vor.u32 %v900_v62, %v899_v26 }
 0x34b   : > { %vm8325_vm4 = vcmp.le.f32.partialorder %v9808_v18, 0.7853982  ;;  %v3430_v40 = vshrl.u32 %v3429_v55, 23  ;;  %v4570_v4 = vpop.eup %4569  ;;  %v8334_v50 = vand.u32 3, %v3103_v34  ;;  %v8340_v25 = vsub.s32 32, %v3544_v52 }
 0x34c   : > { %v2475_v0 = vsel %vm8325_vm4, 0, %v2473_v28  ;;  %v8338_v60 = vadd.s32 %v2133_v51, %v2129_v20  ;;  %v2474_v2 = vsel %vm8325_vm4, %v9807_v41, %v2471_v49  ;;  %v906_v13 = vand.u32 2147483647, %v905_v8 }
 0x34d   : > { %v4252_v59 = vmin.u32 %v3180_v56, %v8299_v14  ;;  %v2868_v47 = vsub.s32 0, %v8318_v32  ;;  %v8348_v43 = vadd.f32 %v3917_v23, %v9811_v54  ;;  %v8351_v27 = vadd.f32 %v3906_v58, %v9813_v29 }
 0x34e   : > { %v8354_v6 = vadd.f32 %v3941_v19, %v7924_v61  ;;  %vm828_vm5 = vcmp.lt.s32.totalorder %v7560_v36, 0  ;;  %v3110_v7 = vxor.u32 2147483648, %v4570_v4  ;;  %v2479_v34 = vadd.s32 3, %v2475_v0 }
 0x34f   : > { %9812 = vst [vmem:[#allocation25_spill] sm:$0xff] %v8348_v43  ;;  %9814 = vst [vmem:[#allocation26_spill] sm:$0xff] %v8351_v27  ;;  %v908_v1 = vcvt.s32.f32 %v901_v37  ;;  %v4263_v63 = vadd.s32 4294967169, %v3430_v40  ;;  %vm3106_vm7 = vcmp.eq.s32.totalorder %v8334_v50, 0  ;;  %vm3109_vm6 = vcmp.eq.s32.totalorder %v8334_v50, 2 }
 0x350   : > { %9815 = vst [vmem:[#allocation16_spill] sm:$0xff] %v8354_v6  ;;  %4573 = vcosq.f32 %v2474_v2  ;;  %v9816_v38 = vand.u32 2147483647, %v7560_v36  ;;  %v912_v61 = vsub.s32 4, %v7939_v39  ;;  %v2135_v35 = vadd.s32 536870912, %v8338_v60 }
 0x351   : > { %v3557_v55 = vshrl.u32 %v9705_v46, %v8340_v25  ;;  %4575 = vsinq.f32 %v2474_v2  ;;  %v909_v28 = vmul.f32 %v908_v1, %v906_v13  ;;  %v3182_v26 = vclz %v4252_v59  ;;  %v4572_v56 = vpop.eup %4571 }
 0x352   : > { %vm8361_vm8 = vcmp.le.f32.partialorder %v9816_v38, 0.7853982  ;;  %v4240_v8 = vmin.u32 %v2868_v47, %v8318_v32  ;;  %v9653_v51 = vand.u32 2147483647, %v8176_v17  ;;  %v3548_v23 = vshrl.u32 %v9723_v5, %v8340_v25 }
 0x353   : > { %v3556_v18 = vshll.u32 %v9707_v15, %v3544_v52  ;;  %v3560_v24 = vshrl.u32 %v9706_v11, %v8340_v25  ;;  %v8376_v49 = vshrl.u32 %v3542_v53, 5  ;;  %v3551_v20 = vshrl.u32 %v9722_v16, %v8340_v25 }
 0x354   : > { %v3554_v58 = vshrl.u32 %v9707_v15, %v8340_v25  ;;  %v3436_v19 = vadd.s32 1, %v4263_v63  ;;  %v8382_v37 = vshrl.u32 %v2135_v35, 30  ;;  %v3547_v40 = vshll.u32 %v9724_v12, %v3544_v52 }
 0x355   : > { %v3558_v0 = vor.u32 %v3557_v55, %v3556_v18  ;;  %v3559_v2 = vshll.u32 %v9705_v46, %v3544_v52  ;;  %v3107_v13 = vxor.u32 2147483648, %v4572_v56  ;;  %v913_v53 = vsel %vm828_vm5, %v912_v61, %v7939_v39 }
 0x356   : > { %v3550_v59 = vshll.u32 %v9723_v5, %v3544_v52  ;;  %v3553_v47 = vshll.u32 %v9722_v16, %v3544_v52  ;;  %v2870_v54 = vclz %v4240_v8  ;;  %v3537_v29 = vand.u32 8388607, %v9653_v51 }
 0x357   : > { %v8393_v1 = vor.u32 %v3548_v23, %v3547_v40  ;;  %v3561_v63 = vor.u32 %v3560_v24, %v3559_v2  ;;  %vm3105_vm9 = vcmp.lt.s32.totalorder %v8334_v50, 2  ;;  %vm3565_vm10 = vcmp.lt.s32.totalorder %v8376_v49, 4  ;;  %v426_v50 = vpop.permute.xlu1 %425 }
 0x358   : > { %v8396_v38 = vor.u32 %v3551_v20, %v3550_v59  ;;  %v3555_v35 = vor.u32 %v3554_v58, %v3553_v47  ;;  %vm3437_vm13 = vcmp.gt.s32.totalorder %v3436_v19, 0  ;;  %v910_v39 = vxor.u32 2147483648, %v909_v28 }
 0x359   : > { %v4253_v61 = vadd.s32 4294967294, %v3182_v26  ;;  %v2137_v55 = vshll.u32 %v8382_v37, 30  ;;  %v3571_v52 = vsel %vm3565_vm10, %v3558_v0, 920167782  ;;  %v3108_v8 = vsel %vm3106_vm7, %v4570_v4, %v3107_v13 }
 0x35a   : > { %v3111_v23 = vsel %vm3109_vm6, %v3110_v7, %v4572_v56  ;;  %v8406_v18 = vand.u32 3, %v2479_v34  ;;  %v915_v24 = vsel %vm8361_vm8, 0, %v913_v53  ;;  %v4574_v20 = vpop.eup %4573  ;;  %vm3562_vm11 = vcmp.lt.s32.totalorder %v8376_v49, 1 }
 0x35b   : > { %vm3564_vm14 = vcmp.lt.s32.totalorder %v8376_v49, 3  ;;  %v3575_v26 = vsel %vm3565_vm10, %v3561_v63, 1326507024  ;;  %v3438_v58 = vsel %vm3437_vm13, %v3436_v19, 0  ;;  %v4576_v40 = vpop.eup %4575  ;;  %v4241_v2 = vadd.s32 4294967294, %v2870_v54 }
 0x35c   : > { %v3538_v4 = vor.u32 8388608, %v3537_v29  ;;  %v3570_v7 = vsel %vm3562_vm11, %v8393_v1, %v8396_v38  ;;  %v3572_v34 = vsel %vm3564_vm14, %v3555_v35, %v3571_v52  ;;  %v911_v56 = vsel %vm828_vm5, %v910_v39, %v909_v28 }
 0x35d   : > { %v919_v13 = vadd.s32 3, %v915_v24  ;;  %vm4254_vm15 = vcmp.lt.s32.totalorder %v4253_v61, 0  ;;  %v8423_v53 = vsub.s32 %v8338_v60, %v2137_v55  ;;  %vm3563_vm0 = vcmp.lt.s32.totalorder %v8376_v49, 2 }
 0x35e   : > { %v3574_v19 = vsel %vm3562_vm11, %v8396_v38, %v3555_v35  ;;  %v3576_v59 = vsel %vm3564_vm14, %v3558_v0, %v3575_v26  ;;  %v3440_v47 = vand.u32 31, %v3438_v58  ;;  %vm2482_vm12 = vcmp.eq.s32.totalorder %v8406_v18, 0 }
 0x35f   : > { %vm2485_vm1 = vcmp.eq.s32.totalorder %v8406_v18, 2  ;;  %v2486_v28 = vxor.u32 2147483648, %v4574_v20  ;;  %v3573_v54 = vsel %vm3563_vm0, %v3570_v7, %v3572_v34  ;;  %v2483_v60 = vxor.u32 2147483648, %v4576_v40 }
 0x360   : > { %v8435_v29 = vsel %vm4254_vm15, 0, %v4253_v61  ;;  %vm4242_vm3 = vcmp.lt.s32.totalorder %v4241_v2, 0  ;;  %v8437_v63 = vshll.u32 %v3538_v4, 8  ;;  %v8441_v39 = vsel %vm3105_vm9, %v3108_v8, %v3111_v23 }
 0x361   : > { %9819 = vst [vmem:[#allocation22_spill] sm:$0xff] %v8441_v39  ;;  %v914_v0 = vsel %vm8361_vm8, %v7560_v36, %v911_v56  ;;  %v8446_v55 = vand.u32 3, %v919_v13  ;;  %v3577_v52 = vsel %vm3563_vm0, %v3574_v19, %v3576_v59  ;;  %v2140_v24 = vsub.s32 0, %v8423_v53 }
 0x362   : > { %v8452_v61 = vmul.u32.u64.low %v8437_v63, %v3573_v54  ;;  %v8453_v26 = vmul.u32.u64.high %v8437_v63, %v3573_v54, %v8452_v61  ;;  %v8456_v4 = vsub.s32 32, %v3440_v47  ;;  %v8458_v8 = vsel %vm2485_vm1, %v2486_v28, %v4576_v40 }
 0x363   : > { %v3170_v62 = vadd.s32 %v8064_v22, %v8091_v44  ;;  %v3190_v23 = vsub.s32 4294967266, %v8435_v29  ;;  %v8463_v7 = vsel %vm4242_vm3, 0, %v4241_v2  ;;  %v8467_v34 = vsel %vm2482_vm12, %v4574_v20, %v2483_v60  ;;  %v8476_v22 = vld [vmem:[#allocation7 + $0x10] sm:$0xff] }
 0x364   : > { %4577 = vcosq.f32 %v914_v0  ;;  %v8470_v56 = vmul.u32.u64.low %v8437_v63, %v3577_v52  ;;  %v8471_v13 = vmul.u32.u64.high %v8437_v63, %v3577_v52, %v8470_v56  ;;  %v3186_v40 = vsub.s32 32, %v8435_v29 }
 0x365   : > { %4579 = vsinq.f32 %v914_v0  ;;  %v3567_v19 = vsel %vm3565_vm10, %v3555_v35, 2102212464  ;;  %v476_v44 = vmul.f32 %v8476_v22, %v426_v50  ;;  %v2878_v2 = vsub.s32 4294967266, %v8463_v7 }
 0x366   : > { %v4212_v20 = vmin.u32 %v2140_v24, %v8423_v53  ;;  %v3546_v59 = vshrl.u32 %v9724_v12, %v8340_v25  ;;  %v3453_v28 = vshrl.u32 %v9705_v46, %v8456_v4  ;;  %v3187_v54 = vshll.u32 %v8299_v14, %v8435_v29 }
 0x367   : > { %v3191_v60 = vadd.s32 127, %v3190_v23  ;;  %v3456_v0 = vshrl.u32 %v9706_v11, %v8456_v4  ;;  %v3568_v25 = vsel %vm3564_vm14, %v8396_v38, %v3567_v19  ;;  %v8496_v24 = vshrl.u32 %v3438_v58, 5 }
 0x368   : > { %v3566_v52 = vsel %vm3562_vm11, %v3546_v59, %v8393_v1  ;;  %v3452_v50 = vshll.u32 %v9707_v15, %v3440_v47  ;;  %v3444_v14 = vshrl.u32 %v9723_v5, %v8456_v4  ;;  %v3447_v29 = vshrl.u32 %v9722_v16, %v8456_v4 }
 0x369   : > { %v3450_v23 = vshrl.u32 %v9707_v15, %v8456_v4  ;;  %v3455_v56 = vshll.u32 %v9705_v46, %v3440_v47  ;;  %v2879_v1 = vadd.s32 127, %v2878_v2  ;;  %v2142_v59 = vclz %v4212_v20  ;;  %v8516_v20 = vld [vmem:[#allocation8 + $0x10] sm:$0xff] }
 0x36a   : > { %v3588_v51 = vadd.s32 1, %v8453_v26  ;;  %v3454_v38 = vor.u32 %v3453_v28, %v3452_v50  ;;  %v3443_v58 = vshll.u32 %v9724_v12, %v3440_v47  ;;  %v3446_v19 = vshll.u32 %v9723_v5, %v3440_v47 }
 0x36b   : > { %v3449_v10 = vshll.u32 %v9722_v16, %v3440_v47  ;;  %v3457_v35 = vor.u32 %v3456_v0, %v3455_v56  ;;  %v3569_v39 = vsel %vm3563_vm0, %v3566_v52, %v3568_v25  ;;  %vm3587_vm4 = vc.u32 %v8471_v13, %v8452_v61 }
 0x36c   : > { %v9820_v3 = vand.u32 2147483647, %v8288_v57  ;;  %v8519_v28 = vadd.f32 %v8516_v20, %v476_v44  ;;  %v8521_v50 = vor.u32 %v3444_v14, %v3443_v58  ;;  %v8523_v27 = vor.u32 %v3447_v29, %v3446_v19 }
 0x36d   : > { %v8525_v47 = vor.u32 %v3450_v23, %v3449_v10  ;;  %vm3461_vm5 = vcmp.lt.s32.totalorder %v8496_v24, 4  ;;  %v3188_v0 = vshrl.u32 %v3170_v62, %v3186_v40  ;;  %v3192_v52 = vshll.u32 %v3191_v60, 23 }
 0x36e   : > { %v3433_v2 = vand.u32 8388607, %v9820_v3  ;;  %9821 = vst [vmem:[#allocation23_spill] sm:$0xff] %v8519_v28  ;;  %v4578_v49 = vpop.eup %4577  ;;  %v2858_v25 = vadd.s32 %v8124_v48, %v8121_v45  ;;  %v3467_v3 = vsel %vm3461_vm5, %v3454_v38, 920167782  ;;  %v2874_v44 = vsub.s32 32, %v8463_v7 }
 0x36f   : > { %v4580_v56 = vpop.eup %4579  ;;  %v4213_v14 = vadd.s32 4294967294, %v2142_v59  ;;  %v3589_v10 = vsel %vm3587_vm4, %v3588_v51, %v8453_v26  ;;  %v3471_v29 = vsel %vm3461_vm5, %v3457_v35, 1326507024  ;;  %v3585_v62 = vmul.u32 %v8437_v63, %v3569_v39  ;;  %v392_v63 = vpop.permute.xlu0 %391 }
 0x370   : > { %vm3458_vm7 = vcmp.lt.s32.totalorder %v8496_v24, 1  ;;  %vm3460_vm6 = vcmp.lt.s32.totalorder %v8496_v24, 3  ;;  %v3221_v45 = vand.u32 2139095040, %v8519_v28  ;;  %vm2481_vm8 = vcmp.lt.s32.totalorder %v8406_v18, 2 }
 0x371   : > { %v2880_v48 = vshll.u32 %v2879_v1, 23  ;;  %v3434_v40 = vor.u32 8388608, %v3433_v2  ;;  %v3466_v51 = vsel %vm3458_vm7, %v8521_v50, %v8523_v27  ;;  %v3468_v26 = vsel %vm3460_vm6, %v8525_v47, %v3467_v3 }
 0x372   : > { %v3193_v39 = vor.u32 4788187, %v3192_v52  ;;  %v8551_v60 = vadd.s32 %v3589_v10, %v3585_v62  ;;  %v3470_v35 = vsel %vm3458_vm7, %v8523_v27, %v8525_v47  ;;  %v3472_v23 = vsel %vm3460_vm6, %v3454_v38, %v3471_v29  ;;  %v8563_v52 = vld [vmem:[#allocation7 + $0x18] sm:$0xff] }
 0x373   : > { %v3189_v1 = vor.u32 %v3188_v0, %v3187_v54  ;;  %v2876_v59 = vshrl.u32 %v2858_v25, %v2874_v44  ;;  %vm4214_vm9 = vcmp.lt.s32.totalorder %v4213_v14, 0  ;;  %vm3459_vm10 = vcmp.lt.s32.totalorder %v8496_v24, 2 }
 0x374   : > { %vm2478_vm13 = vweird.f32 %v9807_v41  ;;  %v926_v58 = vxor.u32 2147483648, %v4578_v49  ;;  %v3469_v19 = vsel %vm3459_vm10, %v3466_v51, %v3468_v26  ;;  %v3222_v2 = vshrl.u32 %v3221_v45, 23 }
 0x375   : > { %v469_v3 = vmul.f32 %v8563_v52, %v392_v63  ;;  %v2875_v10 = vshll.u32 %v8318_v32, %v8463_v7  ;;  %v2881_v38 = vor.u32 4788187, %v2880_v48  ;;  %v3473_v54 = vsel %vm3459_vm10, %v3470_v35, %v3472_v23  ;;  %v9824_v35 = vld [vmem:[#allocation15_spill] sm:$0xff] }
 0x376   : > { %v8570_v0 = vshll.u32 %v3434_v40, 8  ;;  %v923_v25 = vxor.u32 2147483648, %v4580_v56  ;;  %v3194_v44 = vand.u32 2147483647, %v3193_v39  ;;  %v8572_v29 = vsel %vm4214_vm9, 0, %v4213_v14  ;;  %v8584_v40 = vld [vmem:[#allocation8 + $0x18] sm:$0xff] }
 0x377   : > { %v3591_v62 = vadd.s32 536870912, %v8551_v60  ;;  %v3196_v45 = vcvt.s32.f32 %v3189_v1  ;;  %v2877_v51 = vor.u32 %v2876_v59, %v2875_v10  ;;  %v4255_v48 = vadd.s32 4294967169, %v3222_v2  ;;  %v9823_v14 = vld [vmem:[#allocation17_spill] sm:$0xff] }
 0x378   : > { %v8576_v26 = vmul.u32.u64.low %v8570_v0, %v3469_v19  ;;  %v8577_v63 = vmul.u32.u64.high %v8570_v0, %v3469_v19, %v8576_v26  ;;  %v8581_v32 = vmul.u32.u64.low %v8570_v0, %v3473_v54  ;;  %v8582_v7 = vmul.u32.u64.high %v8570_v0, %v3473_v54, %v8581_v32 }
 0x379   : > { %v8587_v39 = vadd.f32 %v8584_v40, %v469_v3  ;;  %vm922_vm11 = vcmp.eq.s32.totalorder %v8446_v55, 0  ;;  %vm3116_vm14 = vcmp.lt.s32.totalorder %v9823_v14, 0  ;;  %vm2804_vm15 = vcmp.lt.s32.totalorder %v9824_v35, 0 }
 0x37a   : > { %v2882_v23 = vand.u32 2147483647, %v2881_v38  ;;  %v2150_v1 = vsub.s32 4294967266, %v8572_v29  ;;  %v2488_v59 = vsel %vm2481_vm8, %v8467_v34, %v8458_v8  ;;  %vm925_vm0 = vcmp.eq.s32.totalorder %v8446_v55, 2 }
 0x37b   : > { %9822 = vst [vmem:[#allocation18_spill] sm:$0xff] %v8587_v39  ;;  %v3197_v19 = vmul.f32 %v3196_v45, %v3194_v44  ;;  %v8598_v2 = vshrl.u32 %v3591_v62, 30  ;;  %vm918_vm12 = vweird.f32 %v7560_v36  ;;  %v924_v3 = vsel %vm922_vm11, %v4578_v49, %v923_v25 }
 0x37c   : > { %v927_v10 = vsel %vm925_vm0, %v926_v58, %v4580_v56  ;;  %v2884_v54 = vcvt.s32.f32 %v2877_v51  ;;  %v3463_v38 = vsel %vm3461_vm5, %v8525_v47, 2102212464  ;;  %v9825_v32 = vand.u32 2147483647, %v9823_v14 }
 0x37d   : > { %v2888_v18 = vsub.s32 4, %v8278_v42  ;;  %v3442_v8 = vshrl.u32 %v9724_v12, %v8456_v4  ;;  %v3228_v34 = vadd.s32 1, %v4255_v48  ;;  %v2493_v49 = vand.u32 2139095040, %v8587_v39 }
 0x37e   : > { %vm8606_vm1 = vcmp.le.f32.partialorder %v9825_v32, 0.7853982  ;;  %v2489_v56 = vsel %vm2478_vm13, nan, %v2488_v59  ;;  %vm921_vm3 = vcmp.lt.s32.totalorder %v8446_v55, 2  ;;  %v2885_v47 = vmul.f32 %v2884_v54, %v2882_v23 }
 0x37f   : > { %v2151_v58 = vadd.s32 127, %v2150_v1  ;;  %v3198_v25 = vxor.u32 2147483648, %v3197_v19  ;;  %v3593_v44 = vshll.u32 %v8598_v2, 30  ;;  %v3462_v62 = vsel %vm3458_vm7, %v3442_v8, %v8521_v50 }
 0x380   : > { %v3464_v4 = vsel %vm3460_vm6, %v8523_v27, %v3463_v38  ;;  %v928_v45 = vsel %vm921_vm3, %v924_v3, %v927_v10  ;;  %v3200_v51 = vsub.s32 4, %v8255_v33  ;;  %v2146_v41 = vsub.s32 32, %v8572_v29  ;;  %v4653_v3 = vld [vmem:[#allocation5 + $0x10] sm:$0xff] }
 0x381   : > { %v3484_v55 = vadd.s32 1, %v8577_v63  ;;  %v2889_v48 = vsel %vm2804_vm15, %v2888_v18, %v8278_v42  ;;  %vm3483_vm4 = vc.u32 %v8582_v7, %v8576_v26  ;;  %vm3229_vm5 = vcmp.gt.s32.totalorder %v3228_v34, 0 }
 0x382   : > { %v2494_v50 = vshrl.u32 %v2493_v49, 23  ;;  %v2886_v23 = vxor.u32 2147483648, %v2885_v47  ;;  %v2130_v27 = vadd.s32 %v8259_v21, %v8265_v30  ;;  %v2152_v1 = vshll.u32 %v2151_v58, 23 }
 0x383   : > { %v3465_v59 = vsel %vm3459_vm10, %v3462_v62, %v3464_v4  ;;  %v3860_v10 = vmul.f32 %v4653_v3, %v2489_v56  ;;  %v3199_v54 = vsel %vm3116_vm14, %v3198_v25, %v3197_v19  ;;  %v9828_v42 = vand.u32 2147483647, %v9824_v35 }
 0x384   : > { %v8645_v32 = vsub.s32 %v8551_v60, %v3593_v44  ;;  %v3201_v21 = vsel %vm3116_vm14, %v3200_v51, %v8255_v33  ;;  %v2148_v30 = vshrl.u32 %v2130_v27, %v2146_v41  ;;  %v3485_v24 = vsel %vm3483_vm4, %v3484_v55, %v8577_v63 }
 0x385   : > { %vm8640_vm7 = vcmp.le.f32.partialorder %v9828_v42, 0.7853982  ;;  %v3230_v18 = vsel %vm3229_vm5, %v3228_v34, 0  ;;  %v929_v19 = vsel %vm918_vm12, nan, %v928_v45  ;;  %v3481_v49 = vmul.u32 %v8570_v0, %v3465_v59 }
 0x386   : > { %v2891_v8 = vsel %vm8640_vm7, 0, %v2889_v48  ;;  %v4227_v56 = vadd.s32 4294967169, %v2494_v50  ;;  %v3202_v60 = vsel %vm8606_vm1, %v9823_v14, %v3199_v54  ;;  %v2887_v33 = vsel %vm2804_vm15, %v2886_v23, %v2885_v47  ;;  %v9831_v48 = vld [vmem:[#allocation24_spill] sm:$0xff] }
 0x387   : > { %v2147_v63 = vshll.u32 %v8423_v53, %v8572_v29  ;;  %v2153_v34 = vor.u32 4788187, %v2152_v1  ;;  %vm2076_vm6 = vcmp.lt.s32.totalorder %v7972_v31, 0  ;;  %v3596_v36 = vsub.s32 0, %v8645_v32 }
 0x388   : > { %v8665_v58 = vadd.s32 %v3485_v24, %v3481_v49  ;;  %v3232_v25 = vand.u32 31, %v3230_v18  ;;  %v3930_v0 = vsel %vm3874_vm2, %v3860_v10, 0.0  ;;  %v3845_v44 = vmul.f32 %v8303_v9, %v929_v19 }
 0x389   : > { %v3203_v62 = vsel %vm8606_vm1, 0, %v3201_v21  ;;  %v2149_v4 = vor.u32 %v2148_v30, %v2147_v63  ;;  %4581 = vcosq.f32 %v3202_v60  ;;  %v2890_v53 = vsel %vm8640_vm7, %v9824_v35, %v2887_v33  ;;  %v445_v21 = vpop.permute.xlu1 %444 }
 0x38a   : > { %v2895_v29 = vadd.s32 3, %v2891_v8  ;;  %v2500_v47 = vadd.s32 1, %v4227_v56  ;;  %4583 = vsinq.f32 %v3202_v60  ;;  %v2154_v45 = vand.u32 2147483647, %v2153_v34 }
 0x38b   : > { %v2160_v51 = vsub.s32 4, %v8382_v37  ;;  %v9657_v41 = vand.u32 2147483647, %v8519_v28  ;;  %v8677_v55 = vmin.u32 %v3596_v36, %v8645_v32  ;;  %v3487_v9 = vadd.s32 536870912, %v8665_v58 }
 0x38c   : > { %v8680_v6 = vsub.s32 32, %v3232_v25  ;;  %vm2501_vm8 = vcmp.gt.s32.totalorder %v2500_v47, 0  ;;  %v8683_v50 = vadd.f32 %v3930_v0, %v9831_v48  ;;  %4585 = vcosq.f32 %v2890_v53 }
 0x38d   : > { %v2156_v23 = vcvt.s32.f32 %v2149_v4  ;;  %v2502_v27 = vsel %vm2501_vm8, %v2500_v47, 0  ;;  %v8686_v1 = vsel %vm3874_vm2, %v3845_v44, 0.0  ;;  %v8688_v59 = vadd.s32 3, %v3203_v62 }
 0x38e   : > { %9832 = vst [vmem:[#allocation15_spill] sm:$0xff] %v8683_v50  ;;  %4587 = vsinq.f32 %v2890_v53  ;;  %v8690_v3 = vand.u32 3, %v2895_v29  ;;  %v8697_v54 = vsel %vm2076_vm6, %v2160_v51, %v8382_v37  ;;  %v8701_v42 = vand.u32 8388607, %v9657_v41 }
 0x38f   : > { %v8692_v10 = vmul.f32 %v2156_v23, %v2154_v45  ;;  %v2504_v38 = vand.u32 31, %v2502_v27  ;;  %v8704_v30 = vshrl.u32 %v3487_v9, 30  ;;  %v3245_v24 = vshrl.u32 %v9705_v46, %v8680_v6 }
 0x390   : > { %v9659_v19 = vand.u32 2147483647, %v8587_v39  ;;  %v8709_v8 = vshrl.u32 %v3230_v18, 5  ;;  %v3235_v49 = vshll.u32 %v9724_v12, %v3232_v25  ;;  %v3238_v37 = vshll.u32 %v9723_v5, %v3232_v25 }
 0x391   : > { %v8713_v56 = vsub.s32 32, %v2504_v38  ;;  %v3236_v60 = vshrl.u32 %v9723_v5, %v8680_v6  ;;  %v3239_v33 = vshrl.u32 %v9722_v16, %v8680_v6  ;;  %v3241_v63 = vshll.u32 %v9722_v16, %v3232_v25 }
 0x392   : > { %v3244_v34 = vshll.u32 %v9707_v15, %v3232_v25  ;;  %v3242_v18 = vshrl.u32 %v9707_v15, %v8680_v6  ;;  %v3247_v36 = vshll.u32 %v9705_v46, %v3232_v25  ;;  %v3248_v0 = vshrl.u32 %v9706_v11, %v8680_v6 }
 0x393   : > { %v2508_v44 = vshrl.u32 %v9723_v5, %v8713_v56  ;;  %v8728_v62 = vpop.eup %4581  ;;  %v2507_v53 = vshll.u32 %v9724_v12, %v2504_v38  ;;  %v2510_v29 = vshll.u32 %v9723_v5, %v2504_v38  ;;  %v2511_v47 = vshrl.u32 %v9722_v16, %v8713_v56 }
 0x394   : > { %9833 = vst [vmem:[#allocation24_spill] sm:$0xff] %v8728_v62  ;;  %v3246_v4 = vor.u32 %v3245_v24, %v3244_v34  ;;  %v8734_v45 = vpop.eup %4583  ;;  %v2497_v25 = vand.u32 8388607, %v9659_v19  ;;  %v8738_v51 = vshrl.u32 %v2502_v27, 5  ;;  %v2513_v9 = vshll.u32 %v9722_v16, %v2504_v38 }
 0x395   : > { %9834 = vst [vmem:[#allocation27_spill] sm:$0xff] %v8734_v45  ;;  %v2514_v48 = vshrl.u32 %v9707_v15, %v8713_v56  ;;  %v8743_v23 = vor.u32 %v2508_v44, %v2507_v53  ;;  %v8745_v24 = vor.u32 %v2511_v47, %v2510_v29  ;;  %v2516_v34 = vshll.u32 %v9707_v15, %v2504_v38 }
 0x396   : > { %v2517_v41 = vshrl.u32 %v9705_v46, %v8713_v56  ;;  %v8750_v14 = vpop.eup %4585  ;;  %v8752_v19 = vor.u32 %v3236_v60, %v3235_v49  ;;  %v2519_v50 = vshll.u32 %v9705_v46, %v2504_v38  ;;  %v2520_v43 = vshrl.u32 %v9706_v11, %v8713_v56 }
 0x397   : > { %v2515_v27 = vor.u32 %v2514_v48, %v2513_v9  ;;  %v9835_v53 = vand.u32 2147483647, %v7972_v31  ;;  %v8765_v47 = vor.u32 %v3239_v33, %v3238_v37  ;;  %v8767_v28 = vor.u32 %v3242_v18, %v3241_v63 }
 0x398   : > { %v8757_v44 = vpop.eup %4587  ;;  %v3249_v49 = vor.u32 %v3248_v0, %v3247_v36  ;;  %v2518_v60 = vor.u32 %v2517_v41, %v2516_v34  ;;  %vm3253_vm10 = vcmp.lt.s32.totalorder %v8709_v8, 4  ;;  %v2521_v38 = vor.u32 %v2520_v43, %v2519_v50 }
 0x399   : > { %vm8761_vm9 = vcmp.le.f32.partialorder %v9835_v53, 0.7853982  ;;  %vm2522_vm13 = vcmp.lt.s32.totalorder %v8738_v51, 1  ;;  %v480_v9 = vmul.f32 %v8476_v22, %v445_v21  ;;  %v3259_v48 = vsel %vm3253_vm10, %v3246_v4, 920167782 }
 0x39a   : > { %v2498_v53 = vor.u32 8388608, %v2497_v25  ;;  %vm2525_vm11 = vcmp.lt.s32.totalorder %v8738_v51, 4  ;;  %v2530_v37 = vsel %vm2522_vm13, %v8743_v23, %v8745_v24  ;;  %vm2524_vm14 = vcmp.lt.s32.totalorder %v8738_v51, 3 }
 0x39b   : > { %v2531_v43 = vsel %vm2525_vm11, %v2518_v60, 920167782  ;;  %v2534_v22 = vsel %vm2522_vm13, %v8745_v24, %v2515_v27  ;;  %v2535_v41 = vsel %vm2525_vm11, %v2521_v38, 1326507024  ;;  %v3263_v50 = vsel %vm3253_vm10, %v3249_v49, 1326507024 }
 0x39c   : > { %vm2523_vm15 = vcmp.lt.s32.totalorder %v8738_v51, 2  ;;  %v2532_v21 = vsel %vm2524_vm14, %v2515_v27, %v2531_v43  ;;  %v2536_v33 = vsel %vm2524_vm14, %v2518_v60, %v2535_v41  ;;  %v3226_v63 = vor.u32 8388608, %v8701_v42 }
 0x39d   : > { %v2533_v18 = vsel %vm2523_vm15, %v2530_v37, %v2532_v21  ;;  %v2537_v36 = vsel %vm2523_vm15, %v2534_v22, %v2536_v33  ;;  %v8800_v0 = vadd.f32 %v8516_v20, %v480_v9  ;;  %v3489_v25 = vshll.u32 %v8704_v30, 30  ;;  %v9840_v22 = vld [vmem:[#allocation19_spill] sm:$0xff] }
 0x39e   : > { %vm3250_vm0 = vcmp.lt.s32.totalorder %v8709_v8, 1  ;;  %vm3252_vm12 = vcmp.lt.s32.totalorder %v8709_v8, 3  ;;  %v8805_v34 = vshll.u32 %v2498_v53, 8  ;;  %v8830_v43 = vand.u32 3, %v8688_v59 }
 0x39f   : > { %9838 = vst [vmem:[#allocation28_spill] sm:$0xff] %v8800_v0  ;;  %v3258_v42 = vsel %vm3250_vm0, %v8752_v19, %v8765_v47  ;;  %v3260_v49 = vsel %vm3252_vm12, %v8767_v28, %v3259_v48  ;;  %v3262_v20 = vsel %vm3250_vm0, %v8765_v47, %v8767_v28  ;;  %v3264_v60 = vsel %vm3252_vm12, %v3246_v4, %v3263_v50 }
 0x3a0   : > { %v8821_v38 = vmul.u32.u64.low %v8805_v34, %v2537_v36  ;;  %v8822_v9 = vmul.u32.u64.high %v8805_v34, %v2537_v36, %v8821_v38  ;;  %v8825_v53 = vmul.u32.u64.low %v8805_v34, %v2533_v18  ;;  %v8826_v37 = vmul.u32.u64.high %v8805_v34, %v2533_v18, %v8825_v53  ;;  %9839 = vst [vmem:[#allocation29_spill] sm:$0xff] %v8830_v43 }
 0x3a1   : > { %v2163_v48 = vsel %vm8761_vm9, 0, %v8697_v54  ;;  %vm3251_vm1 = vcmp.lt.s32.totalorder %v8709_v8, 2  ;;  %v3637_v4 = vand.u32 2139095040, %v8800_v0  ;;  %v8839_v41 = vadd.f32 %v8686_v1, %v9840_v22 }
 0x3a2   : > { %vm2901_vm3 = vcmp.eq.s32.totalorder %v8690_v3, 2  ;;  %v2158_v50 = vxor.u32 2147483648, %v8692_v10  ;;  %v3261_v59 = vsel %vm3251_vm1, %v3258_v42, %v3260_v49  ;;  %v8846_v21 = vsub.s32 %v8665_v58, %v3489_v25 }
 0x3a3   : > { %9841 = vst [vmem:[#allocation19_spill] sm:$0xff] %v8839_v41  ;;  %v3265_v54 = vsel %vm3251_vm1, %v3262_v20, %v3264_v60  ;;  %v8850_v33 = vshll.u32 %v3226_v63, 8  ;;  %v2527_v18 = vsel %vm2525_vm11, %v2515_v27, 2102212464  ;;  %v2167_v36 = vadd.s32 3, %v2163_v48  ;;  %v411_v27 = vpop.permute.xlu0 %410 }
 0x3a4   : > { %v9842_v38 = vclz %v8677_v55  ;;  %v2506_v42 = vshrl.u32 %v9724_v12, %v8713_v56  ;;  %vm2898_vm4 = vcmp.eq.s32.totalorder %v8690_v3, 0  ;;  %v2902_v58 = vxor.u32 2147483648, %v8750_v14 }
 0x3a5   : > { %v8862_v25 = vmul.u32.u64.low %v8850_v33, %v3261_v59  ;;  %v8863_v63 = vmul.u32.u64.high %v8850_v33, %v3261_v59, %v8862_v25  ;;  %v3638_v49 = vshrl.u32 %v3637_v4, 23  ;;  %v2528_v56 = vsel %vm2524_vm14, %v8745_v24, %v2527_v18 }
 0x3a6   : > { %v4269_v22 = vadd.s32 4294967294, %v9842_v38  ;;  %v8867_v20 = vmul.u32.u64.low %v8850_v33, %v3265_v54  ;;  %v8868_v60 = vmul.u32.u64.high %v8850_v33, %v3265_v54, %v8867_v20  ;;  %v2526_v55 = vsel %vm2522_vm13, %v2506_v42, %v8743_v23 }
 0x3a7   : > { %9843 = vst [vmem:[#allocation30_spill] sm:$0xff] %v8862_v25  ;;  %v2159_v48 = vsel %vm2076_vm6, %v2158_v50, %v8692_v10  ;;  %v3492_v59 = vsub.s32 0, %v8846_v21  ;;  %v2548_v4 = vadd.s32 1, %v8826_v37  ;;  %v4271_v38 = vadd.s32 4294967169, %v3638_v49 }
 0x3a8   : > { %vm4270_vm5 = vcmp.lt.s32.totalorder %v4269_v22, 0  ;;  %vm2547_vm7 = vc.u32 %v8822_v9, %v8825_v53  ;;  %v473_v23 = vmul.f32 %v8563_v52, %v411_v27  ;;  %v2899_v42 = vxor.u32 2147483648, %v8757_v44 }
 0x3a9   : > { %v8886_v24 = vand.u32 3, %v2167_v36  ;;  %v2529_v10 = vsel %vm2523_vm15, %v2526_v55, %v2528_v56  ;;  %v3644_v50 = vadd.s32 1, %v4271_v38  ;;  %v8893_v18 = vsel %vm2901_vm3, %v2902_v58, %v8757_v44 }
 0x3aa   : > { %v2162_v49 = vsel %vm8761_vm9, %v7972_v31, %v2159_v48  ;;  %v3234_v27 = vshrl.u32 %v9724_v12, %v8680_v6  ;;  %v3255_v36 = vsel %vm3253_vm10, %v8767_v28, 2102212464  ;;  %v8903_v20 = vsel %vm4270_vm5, 0, %v4269_v22 }
 0x3ab   : > { %v4264_v51 = vmin.u32 %v3492_v59, %v8846_v21  ;;  %v2549_v55 = vsel %vm2547_vm7, %v2548_v4, %v8826_v37  ;;  %vm3645_vm6 = vcmp.gt.s32.totalorder %v3644_v50, 0  ;;  %v2545_v29 = vmul.u32 %v8805_v34, %v2529_v10 }
 0x3ac   : > { %v3254_v44 = vsel %vm3250_vm0, %v3234_v27, %v8752_v19  ;;  %v3646_v58 = vsel %vm3645_vm6, %v3644_v50, 0  ;;  %v8912_v6 = vadd.f32 %v8584_v40, %v473_v23  ;;  %v3256_v28 = vsel %vm3252_vm12, %v8765_v47, %v3255_v36 }
 0x3ad   : > { %v3276_v22 = vadd.s32 1, %v8863_v63  ;;  %v9662_v56 = vand.u32 2147483647, %v8800_v0  ;;  %v3648_v37 = vand.u32 31, %v3646_v58  ;;  %v8922_v48 = vsel %vm2898_vm4, %v8750_v14, %v2899_v42 }
 0x3ae   : > { %9844 = vst [vmem:[#allocation31_spill] sm:$0xff] %v8912_v6  ;;  %4589 = vcosq.f32 %v2162_v49  ;;  %vm3275_vm8 = vc.u32 %v8868_v60, %v8862_v25  ;;  %v8926_v19 = vadd.s32 %v2549_v55, %v2545_v29  ;;  %v8930_v47 = vadd.s32 %v8452_v61, %v8471_v13 }
 0x3af   : > { %4591 = vsinq.f32 %v2162_v49  ;;  %v3649_v59 = vsub.s32 32, %v3648_v37  ;;  %v3606_v4 = vsub.s32 4294967266, %v8903_v20  ;;  %v3494_v38 = vclz %v4264_v51 }
 0x3b0   : > { %v3257_v14 = vsel %vm3251_vm1, %v3254_v44, %v3256_v28  ;;  %v2909_v23 = vand.u32 2139095040, %v8912_v6  ;;  %v3277_v42 = vsel %vm3275_vm8, %v3276_v22, %v8863_v63  ;;  %v3641_v10 = vand.u32 8388607, %v9662_v56 }
 0x3b1   : > { %v3652_v50 = vshrl.u32 %v9723_v5, %v3649_v59  ;;  %v3655_v61 = vshrl.u32 %v9722_v16, %v3649_v59  ;;  %v2551_v13 = vadd.s32 536870912, %v8926_v19  ;;  %v3651_v49 = vshll.u32 %v9724_v12, %v3648_v37 }
 0x3b2   : > { %v3654_v27 = vshll.u32 %v9723_v5, %v3648_v37  ;;  %v3658_v8 = vshrl.u32 %v9707_v15, %v3649_v59  ;;  %v3647_v36 = vshrl.u32 %v3646_v58, 5  ;;  %v3657_v51 = vshll.u32 %v9722_v16, %v3648_v37 }
 0x3b3   : > { %v3660_v63 = vshll.u32 %v9707_v15, %v3648_v37  ;;  %v3661_v55 = vshrl.u32 %v9705_v46, %v3649_v59  ;;  %v3273_v44 = vmul.u32 %v8850_v33, %v3257_v14  ;;  %v3653_v29 = vor.u32 %v3652_v50, %v3651_v49 }
 0x3b4   : > { %v3656_v28 = vor.u32 %v3655_v61, %v3654_v27  ;;  %v2910_v22 = vshrl.u32 %v2909_v23, 23  ;;  %vm3532_vm9 = vcmp.lt.s32.totalorder %v8176_v17, 0  ;;  %v3659_v1 = vor.u32 %v3658_v8, %v3657_v51 }
 0x3b5   : > { %v3662_v54 = vor.u32 %v3661_v55, %v3660_v63  ;;  %v3663_v56 = vshll.u32 %v9705_v46, %v3648_v37  ;;  %v3664_v34 = vshrl.u32 %v9706_v11, %v3649_v59  ;;  %v3602_v58 = vsub.s32 32, %v8903_v20 }
 0x3b6   : > { %v3607_v41 = vadd.s32 127, %v3606_v4  ;;  %v4265_v62 = vadd.s32 4294967294, %v3494_v38  ;;  %v8954_v45 = vadd.s32 %v3277_v42, %v3273_v44  ;;  %v8956_v43 = vshrl.u32 %v2551_v13, 30 }
 0x3b7   : > { %v3642_v33 = vor.u32 8388608, %v3641_v10  ;;  %v3665_v14 = vor.u32 %v3664_v34, %v3663_v56  ;;  %vm3666_vm10 = vcmp.lt.s32.totalorder %v3647_v36, 1  ;;  %vm3668_vm13 = vcmp.lt.s32.totalorder %v3647_v36, 3 }
 0x3b8   : > { %9845 = vst [vmem:[#allocation32_spill] sm:$0xff] %v8956_v43  ;;  %v8958_v23 = vpop.eup %4589  ;;  %vm3669_vm11 = vcmp.lt.s32.totalorder %v3647_v36, 4  ;;  %v3674_v50 = vsel %vm3666_vm10, %v3653_v29, %v3656_v28  ;;  %v4243_v37 = vadd.s32 4294967169, %v2910_v22  ;;  %v3678_v4 = vsel %vm3666_vm10, %v3656_v28, %v3659_v1 }
 0x3b9   : > { %v4592_v61 = vpop.eup %4591  ;;  %v3671_v49 = vsel %vm3669_vm11, %v3659_v1, 2102212464  ;;  %v3675_v27 = vsel %vm3669_vm11, %v3662_v54, 920167782  ;;  %v3679_v38 = vsel %vm3669_vm11, %v3665_v14, 1326507024  ;;  %v3650_v42 = vshrl.u32 %v9724_v12, %v3649_v59 }
 0x3ba   : > { %vm3667_vm14 = vcmp.lt.s32.totalorder %v3647_v36, 2  ;;  %v3676_v10 = vsel %vm3668_vm13, %v3659_v1, %v3675_v27  ;;  %v3680_v56 = vsel %vm3668_vm13, %v3662_v54, %v3679_v38  ;;  %v9846_v34 = vand.u32 2147483647, %v8176_v17 }
 0x3bb   : > { %v3279_v8 = vadd.s32 536870912, %v8954_v45  ;;  %v3677_v51 = vsel %vm3667_vm14, %v3674_v50, %v3676_v10  ;;  %v3681_v63 = vsel %vm3667_vm14, %v3678_v4, %v3680_v56  ;;  %v3682_v55 = vshll.u32 %v3642_v33, 8 }
 0x3bc   : > { %vm8967_vm15 = vcmp.le.f32.partialorder %v9846_v34, 0.7853982  ;;  %vm2173_vm0 = vcmp.eq.s32.totalorder %v8886_v24, 2  ;;  %vm4266_vm12 = vcmp.lt.s32.totalorder %v4265_v62, 0  ;;  %v2553_v1 = vshll.u32 %v8956_v43, 30 }
 0x3bd   : > { %v3670_v54 = vsel %vm3666_vm10, %v3650_v42, %v3653_v29  ;;  %v3672_v59 = vsel %vm3668_vm13, %v3656_v28, %v3671_v49  ;;  %vm2170_vm1 = vcmp.eq.s32.totalorder %v8886_v24, 0  ;;  %v3604_v33 = vshrl.u32 %v8930_v47, %v3602_v58  ;;  %v449_v49 = vpop.permute.xlu1 %448 }
 0x3be   : > { %v8979_v44 = vmul.u32.u64.low %v3682_v55, %v3681_v63  ;;  %v8980_v22 = vmul.u32.u64.high %v3682_v55, %v3681_v63, %v8979_v44  ;;  %v8982_v14 = vmul.u32.u64.low %v3682_v55, %v3677_v51  ;;  %v8983_v27 = vmul.u32.u64.high %v3682_v55, %v3677_v51, %v8982_v14 }
 0x3bf   : > { %v3608_v50 = vshll.u32 %v3607_v41, 23  ;;  %v9849_v4 = vsub.s32 4, %v8598_v2  ;;  %v2916_v28 = vadd.s32 1, %v4243_v37  ;;  %v2174_v38 = vxor.u32 2147483648, %v8958_v23 }
 0x3c0   : > { %v3603_v42 = vshll.u32 %v8645_v32, %v8903_v20  ;;  %v8997_v10 = vshrl.u32 %v3279_v8, 30  ;;  %v3673_v56 = vsel %vm3667_vm14, %v3670_v54, %v3672_v59  ;;  %v9001_v41 = vsel %vm4266_vm12, 0, %v4265_v62 }
 0x3c1   : > { %v8992_v29 = vsel %vm3532_vm9, %v9849_v4, %v8598_v2  ;;  %v9004_v47 = vsub.s32 %v8926_v19, %v2553_v1  ;;  %v9669_v2 = vand.u32 2147483647, %v8912_v6  ;;  %vm2917_vm3 = vcmp.gt.s32.totalorder %v2916_v28, 0 }
 0x3c2   : > { %9850 = vst [vmem:[#allocation33_spill] sm:$0xff] %v8997_v10  ;;  %v2171_v58 = vxor.u32 2147483648, %v4592_v61  ;;  %vm3691_vm4 = vc.u32 %v8980_v22, %v8982_v14  ;;  %v3692_v37 = vadd.s32 1, %v8983_v27  ;;  %v481_v32 = vmul.f32 %v8563_v52, %v449_v49 }
 0x3c3   : > { %v3605_v20 = vor.u32 %v3604_v33, %v3603_v42  ;;  %v3609_v36 = vor.u32 4788187, %v3608_v50  ;;  %v3689_v34 = vmul.u32 %v3682_v55, %v3673_v56  ;;  %v2918_v8 = vsel %vm2917_vm3, %v2916_v28, 0 }
 0x3c4   : > { %v3502_v62 = vsub.s32 4294967266, %v9001_v41  ;;  %v3281_v19 = vshll.u32 %v8997_v10, 30  ;;  %v3693_v51 = vsel %vm3691_vm4, %v3692_v37, %v8983_v27  ;;  %v2920_v63 = vand.u32 31, %v2918_v8 }
 0x3c5   : > { %v2556_v54 = vsub.s32 0, %v9004_v47  ;;  %v3694_v59 = vadd.s32 %v3693_v51, %v3689_v34  ;;  %v2913_v44 = vand.u32 8388607, %v9669_v2  ;;  %v9022_v55 = vsel %vm2173_vm0, %v2174_v38, %v4592_v61 }
 0x3c6   : > { %v3482_v33 = vadd.s32 %v8576_v26, %v8582_v7  ;;  %v2921_v50 = vsub.s32 32, %v2920_v63  ;;  %v9027_v27 = vadd.f32 %v8584_v40, %v481_v32  ;;  %v9032_v4 = vsel %vm2170_vm1, %v8958_v23, %v2171_v58 }
 0x3c7   : > { %v3610_v28 = vand.u32 2147483647, %v3609_v36  ;;  %v3612_v49 = vcvt.s32.f32 %v3605_v20  ;;  %v3695_v42 = vadd.s32 536870912, %v3694_v59  ;;  %v3503_v56 = vadd.s32 127, %v3502_v62 }
 0x3c8   : > { %v9035_v37 = vsub.s32 %v8954_v45, %v3281_v19  ;;  %v2924_v61 = vshrl.u32 %v9723_v5, %v2921_v50  ;;  %v2927_v26 = vshrl.u32 %v9722_v16, %v2921_v50  ;;  %v4228_v7 = vmin.u32 %v2556_v54, %v9004_v47 }
 0x3c9   : > { %v2914_v38 = vor.u32 8388608, %v2913_v44  ;;  %v2923_v32 = vshll.u32 %v9724_v12, %v2920_v63  ;;  %v2930_v34 = vshrl.u32 %v9707_v15, %v2921_v50  ;;  %v2926_v23 = vshll.u32 %v9723_v5, %v2920_v63 }
 0x3ca   : > { %v2932_v58 = vshll.u32 %v9707_v15, %v2920_v63  ;;  %v2933_v20 = vshrl.u32 %v9705_v46, %v2921_v50  ;;  %v3741_v45 = vand.u32 2139095040, %v9027_v27  ;;  %v9046_v36 = vshrl.u32 %v3695_v42, 30 }
 0x3cb   : > { %v2919_v62 = vshrl.u32 %v2918_v8, 5  ;;  %v2925_v19 = vor.u32 %v2924_v61, %v2923_v32  ;;  %v2929_v51 = vshll.u32 %v9722_v16, %v2920_v63  ;;  %v2928_v54 = vor.u32 %v2927_v26, %v2926_v23 }
 0x3cc   : > { %v2934_v44 = vor.u32 %v2933_v20, %v2932_v58  ;;  %v2935_v2 = vshll.u32 %v9705_v46, %v2920_v63  ;;  %v2936_v1 = vshrl.u32 %v9706_v11, %v2921_v50  ;;  %v3613_v10 = vmul.f32 %v3612_v49, %v3610_v28 }
 0x3cd   : > { %v3498_v6 = vsub.s32 32, %v9001_v41  ;;  %v3512_v43 = vsub.s32 4, %v8704_v30  ;;  %v2931_v0 = vor.u32 %v2930_v34, %v2929_v51  ;;  %v3504_v39 = vshll.u32 %v3503_v56, 23 }
 0x3ce   : > { %v3284_v42 = vsub.s32 0, %v9035_v37  ;;  %v2937_v25 = vor.u32 %v2936_v1, %v2935_v2  ;;  %v3742_v8 = vshrl.u32 %v3741_v45, 23  ;;  %vm2897_vm5 = vcmp.lt.s32.totalorder %v8690_v3, 2 }
 0x3cf   : > { %vm2169_vm7 = vcmp.lt.s32.totalorder %v8886_v24, 2  ;;  %v3697_v61 = vshll.u32 %v9046_v36, 30  ;;  %vm2938_vm6 = vcmp.lt.s32.totalorder %v2919_v62, 1  ;;  %vm2941_vm8 = vcmp.lt.s32.totalorder %v2919_v62, 4 }
 0x3d0   : > { %v2954_v63 = vshll.u32 %v2914_v38, 8  ;;  %vm3428_vm10 = vcmp.lt.s32.totalorder %v8288_v57, 0  ;;  %v2558_v28 = vclz %v4228_v7  ;;  %vm2940_vm13 = vcmp.lt.s32.totalorder %v2919_v62, 3 }
 0x3d1   : > { %v2946_v49 = vsel %vm2938_vm6, %v2925_v19, %v2928_v54  ;;  %v2947_v56 = vsel %vm2941_vm8, %v2934_v44, 920167782  ;;  %v2922_v26 = vshrl.u32 %v9724_v12, %v2921_v50  ;;  %vm2939_vm11 = vcmp.lt.s32.totalorder %v2919_v62, 2 }
 0x3d2   : > { %v2943_v2 = vsel %vm2941_vm8, %v2931_v0, 2102212464  ;;  %v2948_v1 = vsel %vm2940_vm13, %v2931_v0, %v2947_v56  ;;  %v2950_v34 = vsel %vm2938_vm6, %v2928_v54, %v2931_v0  ;;  %v2951_v23 = vsel %vm2941_vm8, %v2937_v25, 1326507024 }
 0x3d3   : > { %v2949_v32 = vsel %vm2939_vm11, %v2946_v49, %v2948_v1  ;;  %v4275_v58 = vadd.s32 4294967169, %v3742_v8  ;;  %v3499_v38 = vshll.u32 %v8846_v21, %v9001_v41  ;;  %v3500_v7 = vshrl.u32 %v3482_v33, %v3498_v6 }
 0x3d4   : > { %v9065_v20 = vsub.s32 %v3694_v59, %v3697_v61  ;;  %v2942_v45 = vsel %vm2938_vm6, %v2922_v26, %v2925_v19  ;;  %vm2166_vm14 = vweird.f32 %v7972_v31  ;;  %v2944_v50 = vsel %vm2940_vm13, %v2928_v54, %v2943_v2 }
 0x3d5   : > { %v2952_v51 = vsel %vm2940_vm13, %v2934_v44, %v2951_v23  ;;  %v9071_v56 = vmul.u32.u64.low %v2954_v63, %v2949_v32  ;;  %v9072_v49 = vmul.u32.u64.high %v2954_v63, %v2949_v32, %v9071_v56  ;;  %vm2894_vm0 = vweird.f32 %v9824_v35 }
 0x3d6   : > { %v3505_v0 = vor.u32 4788187, %v3504_v39  ;;  %v4229_v25 = vadd.s32 4294967294, %v2558_v28  ;;  %v2953_v21 = vsel %vm2939_vm11, %v2950_v34, %v2952_v51  ;;  %v3748_v6 = vadd.s32 1, %v4275_v58 }
 0x3d7   : > { %v3614_v41 = vxor.u32 2147483648, %v3613_v10  ;;  %v4256_v59 = vmin.u32 %v3284_v42, %v9035_v37  ;;  %v9078_v33 = vmul.u32.u64.low %v2954_v63, %v2953_v21  ;;  %v9079_v19 = vmul.u32.u64.high %v2954_v63, %v2953_v21, %v9078_v33  ;;  %v9132_v21 = vld [vmem:[#allocation5 + $0x18] sm:$0xff] }
 0x3d8   : > { %v3501_v54 = vor.u32 %v3500_v7, %v3499_v38  ;;  %v3700_v44 = vsub.s32 0, %v9065_v20  ;;  %v2945_v8 = vsel %vm2939_vm11, %v2942_v45, %v2944_v50  ;;  %vm3749_vm12 = vcmp.gt.s32.totalorder %v3748_v6, 0 }
 0x3d9   : > { %v2904_v39 = vsel %vm2897_vm5, %v8922_v48, %v8893_v18  ;;  %v2176_v61 = vsel %vm2169_vm7, %v9032_v4, %v9022_v55  ;;  %v9851_v42 = vsel %vm8967_vm15, 0, %v8992_v29  ;;  %v2964_v26 = vadd.s32 1, %v9072_v49 }
 0x3da   : > { %v3623_v28 = vadd.s32 3, %v9851_v42  ;;  %v3506_v62 = vand.u32 2147483647, %v3505_v0  ;;  %v3513_v2 = vsel %vm3428_vm10, %v3512_v43, %v8704_v30  ;;  %vm4230_vm1 = vcmp.lt.s32.totalorder %v4229_v25, 0 }
 0x3db   : > { %v3750_v3 = vsel %vm3749_vm12, %v3748_v6, 0  ;;  %v3615_v18 = vsel %vm3532_vm9, %v3614_v41, %v3613_v10  ;;  %v3286_v48 = vclz %v4256_v59  ;;  %v2961_v24 = vmul.u32 %v2954_v63, %v2945_v8 }
 0x3dc   : > { %vm2963_vm3 = vc.u32 %v9079_v19, %v9071_v56  ;;  %v3508_v55 = vcvt.s32.f32 %v3501_v54  ;;  %v4272_v29 = vmin.u32 %v3700_v44, %v9065_v20  ;;  %v3738_v1 = vand.u32 2147483647, %v9027_v27 }
 0x3dd   : > { %v2965_v4 = vsel %vm2963_vm3, %v2964_v26, %v9072_v49  ;;  %v9852_v32 = vand.u32 2147483647, %v8288_v57  ;;  %v9112_v43 = vsel %vm4230_vm1, 0, %v4229_v25  ;;  %v3752_v63 = vand.u32 31, %v3750_v3  ;;  %v430_v49 = vpop.permute.xlu0 %429 }
 0x3de   : > { %v2966_v10 = vadd.s32 %v2965_v4, %v2961_v24  ;;  %v2177_v34 = vsel %vm2166_vm14, nan, %v2176_v61  ;;  %v3618_v23 = vsel %vm8967_vm15, %v8176_v17, %v3615_v18  ;;  %v9119_v58 = vmul.f32 %v3508_v55, %v3506_v62 }
 0x3df   : > { %vm9108_vm4 = vcmp.le.f32.partialorder %v9852_v32, 0.7853982  ;;  %v9125_v7 = vsel %vm2894_vm0, nan, %v2904_v39  ;;  %v4257_v45 = vadd.s32 4294967294, %v3286_v48  ;;  %v3753_v51 = vsub.s32 32, %v3752_v63 }
 0x3e0   : > { %v3515_v38 = vsel %vm9108_vm4, 0, %v3513_v2  ;;  %v2967_v50 = vadd.s32 536870912, %v2966_v10  ;;  %v9127_v0 = vand.u32 3, %v3623_v28  ;;  %v2566_v31 = vsub.s32 4294967266, %v9112_v43 }
 0x3e1   : > { %v3702_v25 = vclz %v4272_v29  ;;  %v3745_v13 = vand.u32 8388607, %v3738_v1  ;;  %v9135_v6 = vmul.f32 %v9132_v21, %v2177_v34  ;;  %4593 = vcosq.f32 %v3618_v23 }
 0x3e2   : > { %v3519_v35 = vadd.s32 3, %v3515_v38  ;;  %v9137_v41 = vshrl.u32 %v2967_v50, 30  ;;  %4595 = vsinq.f32 %v3618_v23  ;;  %v3510_v59 = vxor.u32 2147483648, %v9119_v58 }
 0x3e3   : > { %v3756_v33 = vshrl.u32 %v9723_v5, %v3753_v51  ;;  %v477_v54 = vmul.f32 %v8563_v52, %v430_v49  ;;  %vm4258_vm9 = vcmp.lt.s32.totalorder %v4257_v45, 0  ;;  %v3759_v8 = vshrl.u32 %v9722_v16, %v3753_v51 }
 0x3e4   : > { %v2969_v44 = vshll.u32 %v9137_v41, 30  ;;  %v3762_v39 = vshrl.u32 %v9707_v15, %v3753_v51  ;;  %v9145_v61 = vadd.s32 127, %v2566_v31  ;;  %v4273_v42 = vadd.s32 4294967294, %v3702_v25 }
 0x3e5   : > { %v3746_v28 = vor.u32 8388608, %v3745_v13  ;;  %v3755_v26 = vshll.u32 %v9724_v12, %v3752_v63  ;;  %v3758_v2 = vshll.u32 %v9723_v5, %v3752_v63  ;;  %v3761_v18 = vshll.u32 %v9722_v16, %v3752_v63 }
 0x3e6   : > { %v9148_v62 = vsub.s32 %v2966_v10, %v2969_v44  ;;  %v3765_v52 = vshrl.u32 %v9705_v46, %v3753_v51  ;;  %v3751_v48 = vshrl.u32 %v3750_v3, 5  ;;  %v3764_v55 = vshll.u32 %v9707_v15, %v3752_v63 }
 0x3e7   : > { %v3757_v24 = vor.u32 %v3756_v33, %v3755_v26  ;;  %v3768_v29 = vshrl.u32 %v9706_v11, %v3753_v51  ;;  %v3760_v32 = vor.u32 %v3759_v8, %v3758_v2  ;;  %v3763_v34 = vor.u32 %v3762_v39, %v3761_v18 }
 0x3e8   : > { %v2972_v4 = vsub.s32 0, %v9148_v62  ;;  %v3767_v23 = vshll.u32 %v9705_v46, %v3752_v63  ;;  %v9158_v10 = vsel %vm4258_vm9, 0, %v4257_v45  ;;  %v2546_v38 = vadd.s32 %v8825_v53, %v8822_v9 }
 0x3e9   : > { %vm4274_vm15 = vcmp.lt.s32.totalorder %v4273_v42, 0  ;;  %v3766_v50 = vor.u32 %v3765_v52, %v3764_v55  ;;  %v2562_v3 = vsub.s32 32, %v9112_v43  ;;  %v2568_v49 = vshll.u32 %v9145_v61, 23 }
 0x3ea   : > { %v4244_v31 = vmin.u32 %v2972_v4, %v9148_v62  ;;  %v3769_v25 = vor.u32 %v3768_v29, %v3767_v23  ;;  %vm3770_vm5 = vcmp.lt.s32.totalorder %v3751_v48, 1  ;;  %vm3773_vm7 = vcmp.lt.s32.totalorder %v3751_v48, 4 }
 0x3eb   : > { %v3786_v13 = vshll.u32 %v3746_v28, 8  ;;  %v9166_v63 = vadd.f32 %v8584_v40, %v477_v54  ;;  %v9168_v45 = vpop.eup %4593  ;;  %v9170_v33 = vsel %vm4274_vm15, 0, %v4273_v42  ;;  %v3775_v53 = vsel %vm3773_vm7, %v3763_v34, 2102212464 }
 0x3ec   : > { %v2974_v9 = vclz %v4244_v31  ;;  %v3778_v44 = vsel %vm3770_vm5, %v3757_v24, %v3760_v32  ;;  %v9174_v8 = vpop.eup %4595  ;;  %v3754_v39 = vshrl.u32 %v9724_v12, %v3753_v51  ;;  %vm3772_vm6 = vcmp.lt.s32.totalorder %v3751_v48, 3 }
 0x3ed   : > { %v3779_v61 = vsel %vm3773_vm7, %v3766_v50, 920167782  ;;  %v3782_v28 = vsel %vm3770_vm5, %v3760_v32, %v3763_v34  ;;  %vm3771_vm8 = vcmp.lt.s32.totalorder %v3751_v48, 2  ;;  %v3783_v42 = vsel %vm3773_vm7, %v3769_v25, 1326507024 }
 0x3ee   : > { %v4245_v40 = vadd.s32 4294967294, %v2974_v9  ;;  %v3780_v54 = vsel %vm3772_vm6, %v3763_v34, %v3779_v61  ;;  %v3774_v26 = vsel %vm3770_vm5, %v3754_v39, %v3757_v24  ;;  %v3776_v2 = vsel %vm3772_vm6, %v3760_v32, %v3775_v53 }
 0x3ef   : > { %v3781_v18 = vsel %vm3771_vm8, %v3778_v44, %v3780_v54  ;;  %v3784_v52 = vsel %vm3772_vm6, %v3766_v50, %v3783_v42  ;;  %v9187_v4 = vand.u32 3, %v3519_v35  ;;  %v3710_v23 = vsub.s32 4294967266, %v9170_v33 }
 0x3f0   : > { %vm4246_vm13 = vcmp.lt.s32.totalorder %v4245_v40, 0  ;;  %v3785_v55 = vsel %vm3771_vm8, %v3782_v28, %v3784_v52  ;;  %v9183_v51 = vmul.u32.u64.low %v3786_v13, %v3781_v18  ;;  %v9184_v29 = vmul.u32.u64.high %v3786_v13, %v3781_v18, %v9183_v51 }
 0x3f1   : > { %v9190_v34 = vmul.u32.u64.low %v3786_v13, %v3785_v55  ;;  %v9191_v31 = vmul.u32.u64.high %v3786_v13, %v3785_v55, %v9190_v34  ;;  %v3627_v24 = vxor.u32 2147483648, %v9174_v8  ;;  %v3630_v32 = vxor.u32 2147483648, %v9168_v45 }
 0x3f2   : > { %v2564_v25 = vshrl.u32 %v2546_v38, %v2562_v3  ;;  %v3777_v50 = vsel %vm3771_vm8, %v3774_v26, %v3776_v2  ;;  %v3511_v9 = vsel %vm3428_vm10, %v3510_v59, %v9119_v58  ;;  %v3294_v35 = vsub.s32 4294967266, %v9158_v10  ;;  %v9855_v2 = vld [vmem:[#allocation30_spill] sm:$0xff] }
 0x3f3   : > { %v2977_v53 = vsel %vm4246_vm13, 0, %v4245_v40  ;;  %v3325_v44 = vand.u32 2139095040, %v9166_v63  ;;  %v2563_v39 = vshll.u32 %v9004_v47, %v9112_v43  ;;  %v2569_v61 = vor.u32 4788187, %v2568_v49 }
 0x3f4   : > { %v3706_v28 = vsub.s32 32, %v9170_v33  ;;  %v3796_v48 = vadd.s32 1, %v9184_v29  ;;  %v3711_v38 = vadd.s32 127, %v3710_v23  ;;  %v3793_v3 = vmul.u32 %v3786_v13, %v3777_v50 }
 0x3f5   : > { %vm3795_vm11 = vc.u32 %v9191_v31, %v9183_v51  ;;  %v3326_v54 = vshrl.u32 %v3325_v44, 23  ;;  %vm3629_vm10 = vcmp.eq.s32.totalorder %v9127_v0, 2  ;;  %v2565_v58 = vor.u32 %v2564_v25, %v2563_v39 }
 0x3f6   : > { %v3690_v59 = vadd.s32 %v8982_v14, %v8980_v22  ;;  %v2982_v40 = vsub.s32 4294967266, %v2977_v53  ;;  %v3797_v47 = vsel %vm3795_vm11, %v3796_v48, %v9184_v29  ;;  %v3290_v43 = vsub.s32 32, %v9158_v10 }
 0x3f7   : > { %v3295_v49 = vadd.s32 127, %v3294_v35  ;;  %v3798_v42 = vadd.s32 %v3797_v47, %v3793_v3  ;;  %v4259_v26 = vadd.s32 4294967169, %v3326_v54  ;;  %v3514_v13 = vsel %vm9108_vm4, %v8288_v57, %v3511_v9 }
 0x3f8   : > { %v3274_v18 = vadd.s32 %v9855_v2, %v8868_v60  ;;  %v2570_v52 = vand.u32 2147483647, %v2569_v61  ;;  %v3708_v55 = vshrl.u32 %v3690_v59, %v3706_v28  ;;  %v3712_v23 = vshll.u32 %v3711_v38, 23 }
 0x3f9   : > { %v3799_v34 = vadd.s32 536870912, %v3798_v42  ;;  %v3322_v22 = vand.u32 2147483647, %v9166_v63  ;;  %v3332_v14 = vadd.s32 1, %v4259_v26  ;;  %v2572_v29 = vcvt.s32.f32 %v2565_v58 }
 0x3fa   : > { %v3707_v25 = vshll.u32 %v9065_v20, %v9170_v33  ;;  %v2978_v50 = vsub.s32 32, %v2977_v53  ;;  %v2983_v35 = vadd.s32 127, %v2982_v40  ;;  %v3292_v44 = vshrl.u32 %v3274_v18, %v3290_v43 }
 0x3fb   : > { %v3296_v39 = vshll.u32 %v3295_v49, 23  ;;  %v9222_v30 = vshrl.u32 %v3799_v34, 30  ;;  %vm3333_vm14 = vcmp.gt.s32.totalorder %v3332_v14, 0  ;;  %v9224_v9 = vmul.f32 %v2572_v29, %v2570_v52 }
 0x3fc   : > { %v3709_v60 = vor.u32 %v3708_v55, %v3707_v25  ;;  %v2962_v61 = vadd.s32 %v9071_v56, %v9079_v19  ;;  %v3334_v28 = vsel %vm3333_vm14, %v3332_v14, 0  ;;  %v3713_v48 = vor.u32 4788187, %v3712_v23  ;;  %v9856_v25 = vld [vmem:[#allocation18_spill] sm:$0xff] }
 0x3fd   : > { %v3801_v38 = vshll.u32 %v9222_v30, 30  ;;  %v3329_v20 = vand.u32 8388607, %v3322_v22  ;;  %v3336_v33 = vand.u32 31, %v3334_v28  ;;  %4597 = vcosq.f32 %v3514_v13 }
 0x3fe   : > { %v3291_v3 = vshll.u32 %v9035_v37, %v9158_v10  ;;  %v2980_v54 = vshrl.u32 %v2962_v61, %v2978_v50  ;;  %v2984_v58 = vshll.u32 %v2983_v35, 23  ;;  %v9236_v59 = vsel %vm3629_vm10, %v3630_v32, %v9174_v8 }
 0x3ff   : > { %4599 = vsinq.f32 %v3514_v13  ;;  %v9238_v56 = vsub.s32 %v3798_v42, %v3801_v38  ;;  %v3337_v19 = vsub.s32 32, %v3336_v33  ;;  %v9242_v47 = vor.u32 4788187, %v3296_v39 }
 0x400   : > { %v9240_v40 = vor.u32 %v3292_v44, %v3291_v3  ;;  %v2574_v43 = vxor.u32 2147483648, %v9224_v9  ;;  %v2979_v49 = vshll.u32 %v9148_v62, %v2977_v53  ;;  %v3714_v37 = vand.u32 2147483647, %v3713_v48 }
 0x401   : > { %v3716_v10 = vcvt.s32.f32 %v3709_v60  ;;  %v3804_v26 = vsub.s32 0, %v9238_v56  ;;  %v3330_v2 = vor.u32 8388608, %v3329_v20  ;;  %v2985_v32 = vor.u32 4788187, %v2984_v58 }
 0x402   : > { %v2981_v18 = vor.u32 %v2980_v54, %v2979_v49  ;;  %v3340_v13 = vshrl.u32 %v9723_v5, %v3337_v19  ;;  %v3343_v42 = vshrl.u32 %v9722_v16, %v3337_v19  ;;  %v3339_v55 = vshll.u32 %v9724_v12, %v3336_v33 }
 0x403   : > { %v4276_v52 = vmin.u32 %v3804_v26, %v9238_v56  ;;  %v3342_v23 = vshll.u32 %v9723_v5, %v3336_v33  ;;  %v3346_v34 = vshrl.u32 %v9707_v15, %v3337_v19  ;;  %v9253_v62 = vshrl.u32 %v3334_v28, 5 }
 0x404   : > { %v3345_v53 = vshll.u32 %v9722_v16, %v3336_v33  ;;  %v3348_v14 = vshll.u32 %v9707_v15, %v3336_v33  ;;  %v3349_v29 = vshrl.u32 %v9705_v46, %v3337_v19  ;;  %vm2492_vm0 = vcmp.lt.s32.totalorder %v9856_v25, 0 }
 0x405   : > { %v3717_v50 = vmul.f32 %v3716_v10, %v3714_v37  ;;  %v3806_v35 = vclz %v4276_v52  ;;  %v3341_v44 = vor.u32 %v3340_v13, %v3339_v55  ;;  %v3344_v39 = vor.u32 %v3343_v42, %v3342_v23 }
 0x406   : > { %v3347_v60 = vor.u32 %v3346_v34, %v3345_v53  ;;  %v3350_v61 = vor.u32 %v3349_v29, %v3348_v14  ;;  %v3351_v5 = vshll.u32 %v9705_v46, %v3336_v33  ;;  %v3352_v48 = vshrl.u32 %v9706_v11, %v3337_v19 }
 0x407   : > { %v2986_v28 = vand.u32 2147483647, %v2985_v32  ;;  %v3794_v16 = vadd.s32 %v9183_v51, %v9191_v31  ;;  %v4277_v38 = vadd.s32 4294967294, %v3806_v35  ;;  %v9263_v15 = vshll.u32 %v3330_v2, 8  ;;  %v9265_v20 = vpop.eup %4597 }
 0x408   : > { %v2988_v3 = vcvt.s32.f32 %v2981_v18  ;;  %v3353_v54 = vor.u32 %v3352_v48, %v3351_v5  ;;  %vm3354_vm12 = vcmp.lt.s32.totalorder %v9253_v62, 1  ;;  %vm3357_vm1 = vcmp.lt.s32.totalorder %v9253_v62, 4 }
 0x409   : > { %v9269_v58 = vpop.eup %4599  ;;  %v9857_v46 = vand.u32 2147483647, %v9856_v25  ;;  %vm4278_vm4 = vcmp.lt.s32.totalorder %v4277_v38, 0  ;;  %vm3356_vm9 = vcmp.lt.s32.totalorder %v9253_v62, 3  ;;  %v3362_v51 = vsel %vm3354_vm12, %v3341_v44, %v3344_v39 }
 0x40a   : > { %v3363_v31 = vsel %vm3357_vm1, %v3350_v61, 920167782  ;;  %v3809_v33 = vsel %vm4278_vm4, 0, %v4277_v38  ;;  %v3366_v37 = vsel %vm3354_vm12, %v3344_v39, %v3347_v60  ;;  %v3367_v10 = vsel %vm3357_vm1, %v3353_v54, 1326507024 }
 0x40b   : > { %vm9273_vm3 = vcmp.le.f32.partialorder %v9857_v46, 0.7853982  ;;  %v3364_v49 = vsel %vm3356_vm9, %v3347_v60, %v3363_v31  ;;  %v2989_v26 = vmul.f32 %v2988_v3, %v2986_v28  ;;  %v3810_v2 = vsub.s32 32, %v3809_v33 }
 0x40c   : > { %v3814_v18 = vsub.s32 4294967266, %v3809_v33  ;;  %v3338_v32 = vshrl.u32 %v9724_v12, %v3337_v19  ;;  %v3811_v13 = vshll.u32 %v9238_v56, %v3809_v33  ;;  %vm3355_vm15 = vcmp.lt.s32.totalorder %v9253_v62, 2 }
 0x40d   : > { %v3359_v42 = vsel %vm3357_vm1, %v3347_v60, 2102212464  ;;  %v3368_v52 = vsel %vm3356_vm9, %v3350_v61, %v3367_v10  ;;  %v3812_v55 = vshrl.u32 %v3794_v16, %v3810_v2  ;;  %v3365_v34 = vsel %vm3355_vm15, %v3362_v51, %v3364_v49  ;;  %v9865_v51 = vld [vmem:[#allocation31_spill] sm:$0xff] }
 0x40e   : > { %v3815_v23 = vadd.s32 127, %v3814_v18  ;;  %v3369_v53 = vsel %vm3355_vm15, %v3366_v37, %v3368_v52  ;;  %v2575_v12 = vsel %vm2492_vm0, %v2574_v43, %v9224_v9  ;;  %v3718_v56 = vxor.u32 2147483648, %v3717_v50  ;;  %v9860_v43 = vld [vmem:[#allocation28_spill] sm:$0xff]  ;;  %v9866_v49 = vld [vmem:[#allocation23_spill] sm:$0xff] }
 0x40f   : > { %v9303_v19 = vmul.u32.u64.low %v9263_v15, %v3369_v53  ;;  %v9304_v14 = vmul.u32.u64.high %v9263_v15, %v3369_v53, %v9303_v19  ;;  %v3813_v29 = vor.u32 %v3812_v55, %v3811_v13  ;;  %v3358_v60 = vsel %vm3354_vm12, %v3338_v32, %v3341_v44 }
 0x410   : > { %v3816_v35 = vshll.u32 %v3815_v23, 23  ;;  %v3360_v61 = vsel %vm3356_vm9, %v3344_v39, %v3359_v42  ;;  %v3298_v5 = vand.u32 2147483647, %v9242_v47  ;;  %v2990_v48 = vxor.u32 2147483648, %v2989_v26  ;;  %v9864_v39 = vld [vmem:[#allocation32_spill] sm:$0xff] }
 0x411   : > { %v9312_v28 = vmul.u32.u64.low %v9263_v15, %v3365_v34  ;;  %v9313_v16 = vmul.u32.u64.high %v9263_v15, %v3365_v34, %v9312_v28  ;;  %v3300_v9 = vcvt.s32.f32 %v9240_v40  ;;  %v9861_v38 = vand.u32 2147483647, %v9860_v43 }
 0x412   : > { %vm3636_vm7 = vcmp.lt.s32.totalorder %v9860_v43, 0  ;;  %v3817_v44 = vor.u32 4788187, %v3816_v35  ;;  %v2576_v54 = vsub.s32 4, %v9864_v39  ;;  %v2578_v47 = vsel %vm9273_vm3, %v9856_v25, %v2575_v12 }
 0x413   : > { %vm9319_vm5 = vcmp.le.f32.partialorder %v9861_v38, 0.7853982  ;;  %v3719_v46 = vsel %vm3636_vm7, %v3718_v56, %v3717_v50  ;;  %v3361_v40 = vsel %vm3355_vm15, %v3358_v60, %v3360_v61  ;;  %vm3626_vm6 = vcmp.eq.s32.totalorder %v9127_v0, 0  ;;  %v9875_v38 = vld [vmem:[#allocation33_spill] sm:$0xff] }
 0x414   : > { %vm2908_vm8 = vcmp.lt.s32.totalorder %v9865_v51, 0  ;;  %v3818_v31 = vand.u32 2147483647, %v3817_v44  ;;  %v3820_v33 = vcvt.s32.f32 %v3813_v29  ;;  %vm3379_vm13 = vc.u32 %v9304_v14, %v9312_v28 }
 0x415   : > { %vm3220_vm11 = vcmp.lt.s32.totalorder %v9866_v49, 0  ;;  %v3301_v37 = vmul.f32 %v3300_v9, %v3298_v5  ;;  %v3720_v10 = vsub.s32 4, %v9046_v36  ;;  %v2991_v50 = vsel %vm2908_vm8, %v2990_v48, %v2989_v26 }
 0x416   : > { %v3380_v62 = vadd.s32 1, %v9313_v16  ;;  %4601 = vcosq.f32 %v2578_v47  ;;  %v3722_v2 = vsel %vm9319_vm5, %v9860_v43, %v3719_v46  ;;  %v3821_v18 = vmul.f32 %v3820_v33, %v3818_v31 }
 0x417   : > { %v3377_v32 = vmul.u32 %v9263_v15, %v3361_v40  ;;  %v2577_v13 = vsel %vm2492_vm0, %v2576_v54, %v9864_v39  ;;  %4603 = vsinq.f32 %v2578_v47  ;;  %v9867_v42 = vand.u32 2147483647, %v9865_v51 }
 0x418   : > { %v3381_v26 = vsel %vm3379_vm13, %v3380_v62, %v9313_v16  ;;  %v9870_v55 = vand.u32 2147483647, %v9866_v49  ;;  %v2992_v15 = vsub.s32 4, %v9137_v41  ;;  %v3822_v53 = vxor.u32 2147483648, %v3821_v18 }
 0x419   : > { %vm9350_vm10 = vcmp.le.f32.partialorder %v9867_v42, 0.7853982  ;;  %v3382_v12 = vadd.s32 %v3381_v26, %v3377_v32  ;;  %v3302_v56 = vxor.u32 2147483648, %v3301_v37  ;;  %v3721_v19 = vsel %vm3636_vm7, %v3720_v10, %v9046_v36 }
 0x41a   : > { %vm9357_vm14 = vcmp.le.f32.partialorder %v9870_v55, 0.7853982  ;;  %v2994_v34 = vsel %vm9350_vm10, %v9865_v51, %v2991_v50  ;;  %4605 = vcosq.f32 %v3722_v2  ;;  %vm3740_vm0 = vcmp.lt.s32.totalorder %v9027_v27, 0 }
 0x41b   : > { %4607 = vsinq.f32 %v3722_v2  ;;  %vm9371_vm12 = vcmp.le.f32.partialorder %v3738_v1, 0.7853982  ;;  %v3823_v35 = vsel %vm3740_vm0, %v3822_v53, %v3821_v18  ;;  %v3383_v60 = vadd.s32 536870912, %v3382_v12  ;;  %v9426_v2 = vld [vmem:[#allocation5 + $0x10] sm:$0xff] }
 0x41c   : > { %vm3622_vm1 = vweird.f32 %v8176_v17  ;;  %v2579_v61 = vsel %vm9273_vm3, 0, %v2577_v13  ;;  %4609 = vcosq.f32 %v2994_v34  ;;  %v3824_v36 = vsub.s32 4, %v9222_v30 }
 0x41d   : > { %v3826_v5 = vsel %vm9371_vm12, %v9027_v27, %v3823_v35  ;;  %v3723_v1 = vsel %vm9319_vm5, 0, %v3721_v19  ;;  %v2993_v48 = vsel %vm2908_vm8, %v2992_v15, %v9137_v41  ;;  %4611 = vsinq.f32 %v2994_v34 }
 0x41e   : > { %v9389_v16 = vshrl.u32 %v3383_v60, 30  ;;  %v3628_v11 = vsel %vm3626_vm6, %v9168_v45, %v3627_v24  ;;  %v3526_v9 = vxor.u32 2147483648, %v9265_v20  ;;  %v3304_v44 = vsub.s32 4, %v9875_v38 }
 0x41f   : > { %4613 = vcosq.f32 %v3826_v5  ;;  %v3523_v3 = vxor.u32 2147483648, %v9269_v58  ;;  %v3303_v39 = vsel %vm3220_vm11, %v3302_v56, %v3301_v37  ;;  %v2583_v54 = vadd.s32 3, %v2579_v61 }
 0x420   : > { %4615 = vsinq.f32 %v3826_v5  ;;  %v3385_v41 = vshll.u32 %v9389_v16, 30  ;;  %v3727_v47 = vadd.s32 3, %v3723_v1  ;;  %v2995_v8 = vsel %vm9350_vm10, 0, %v2993_v48  ;;  %v4602_v24 = vpop.eup %4601 }
 0x421   : > { %v3825_v45 = vsel %vm3740_vm0, %v3824_v36, %v9222_v30  ;;  %vm3625_vm3 = vcmp.lt.s32.totalorder %v9127_v0, 2  ;;  %vm3522_vm4 = vcmp.eq.s32.totalorder %v9187_v4, 0  ;;  %vm3525_vm9 = vcmp.eq.s32.totalorder %v9187_v4, 2  ;;  %v4604_v40 = vpop.eup %4603 }
 0x422   : > { %v9410_v46 = vsub.s32 %v3382_v12, %v3385_v41  ;;  %v3632_v31 = vsel %vm3625_vm3, %v3628_v11, %v9236_v59  ;;  %v3527_v33 = vsel %vm3525_vm9, %v3526_v9, %v9269_v58  ;;  %v9417_v37 = vsel %vm3220_vm11, %v3304_v44, %v9875_v38  ;;  %v9876_v38 = vld [vmem:[#allocation29_spill] sm:$0xff] }
 0x423   : > { %v3306_v0 = vsel %vm9357_vm14, %v9866_v49, %v3303_v39  ;;  %v3524_v30 = vsel %vm3522_vm4, %v9265_v20, %v3523_v3  ;;  %v2999_v10 = vadd.s32 3, %v2995_v8  ;;  %v3827_v50 = vsel %vm9371_vm12, 0, %v3825_v45 }
 0x424   : > { %v3388_v62 = vsub.s32 0, %v9410_v46  ;;  %v4606_v59 = vpop.eup %4605  ;;  %v9430_v58 = vmul.f32 %v9426_v2, %v9125_v7  ;;  %v9434_v18 = vsel %vm3874_vm2, %v9135_v6, 0.0  ;;  %v2584_v32 = vand.u32 3, %v2583_v54 }
 0x425   : > { %v3728_v13 = vand.u32 3, %v3727_v47  ;;  %v4608_v20 = vpop.eup %4607  ;;  %v9438_v42 = vsel %vm3622_vm1, nan, %v3632_v31  ;;  %vm3521_vm15 = vcmp.lt.s32.totalorder %v9187_v4, 2  ;;  %4617 = vcosq.f32 %v3306_v0 }
 0x426   : > { %v4260_v52 = vmin.u32 %v3388_v62, %v9410_v46  ;;  %v4610_v26 = vpop.eup %4609  ;;  %v3528_v55 = vsel %vm3521_vm15, %v3524_v30, %v3527_v33  ;;  %v3307_v7 = vsel %vm9357_vm14, 0, %v9417_v37  ;;  %4619 = vsinq.f32 %v3306_v0 }
 0x427   : > { %v3831_v6 = vadd.s32 3, %v3827_v50  ;;  %v4612_v15 = vpop.eup %4611  ;;  %v2587_v34 = vxor.u32 2147483648, %v4604_v40  ;;  %v2590_v53 = vxor.u32 2147483648, %v4602_v24  ;;  %v3000_v12 = vand.u32 3, %v2999_v10 }
 0x428   : > { %v3390_v17 = vclz %v4260_v52  ;;  %vm2585_vm5 = vcmp.lt.s32.totalorder %v2584_v32, 2  ;;  %vm2586_vm7 = vcmp.eq.s32.totalorder %v2584_v32, 0  ;;  %vm2589_vm6 = vcmp.eq.s32.totalorder %v2584_v32, 2  ;;  %v9464_v52 = vld [vmem:[#allocation5 + $0x8] sm:$0xff] }
 0x429   : > { %v4614_v56 = vpop.eup %4613  ;;  %vm3729_vm8 = vcmp.lt.s32.totalorder %v3728_v13, 2  ;;  %vm3518_vm13 = vweird.f32 %v8288_v57  ;;  %vm3730_vm11 = vcmp.eq.s32.totalorder %v3728_v13, 0  ;;  %vm3733_vm10 = vcmp.eq.s32.totalorder %v3728_v13, 2 }
 0x42a   : > { %v4616_v4 = vpop.eup %4615  ;;  %v3734_v19 = vxor.u32 2147483648, %v4606_v59  ;;  %v4261_v29 = vadd.s32 4294967294, %v3390_v17  ;;  %v3731_v35 = vxor.u32 2147483648, %v4608_v20  ;;  %v3003_v60 = vxor.u32 2147483648, %v4612_v15 }
 0x42b   : > { %v3006_v61 = vxor.u32 2147483648, %v4610_v26  ;;  %v3832_v36 = vand.u32 3, %v3831_v6  ;;  %v2588_v5 = vsel %vm2586_vm7, %v4602_v24, %v2587_v34  ;;  %v2591_v1 = vsel %vm2589_vm6, %v2590_v53, %v4604_v40  ;;  %v9879_v53 = vld [vmem:[#allocation24_spill] sm:$0xff] }
 0x42c   : > { %vm3002_vm0 = vcmp.eq.s32.totalorder %v3000_v12, 0  ;;  %vm4262_vm12 = vcmp.lt.s32.totalorder %v4261_v29, 0  ;;  %vm3005_vm1 = vcmp.eq.s32.totalorder %v3000_v12, 2  ;;  %v3835_v48 = vxor.u32 2147483648, %v4616_v4 }
 0x42d   : > { %v3838_v11 = vxor.u32 2147483648, %v4614_v56  ;;  %v3393_v9 = vsel %vm4262_vm12, 0, %v4261_v29  ;;  %vm3210_vm3 = vcmp.eq.s32.totalorder %v9876_v38, 0  ;;  %vm3213_vm4 = vcmp.eq.s32.totalorder %v9876_v38, 2  ;;  %v9881_v29 = vld [vmem:[#allocation25_spill] sm:$0xff] }
 0x42e   : > { %v3735_v44 = vsel %vm3733_vm10, %v3734_v19, %v4608_v20  ;;  %v3378_v3 = vadd.s32 %v9312_v28, %v9304_v14  ;;  %v3394_v39 = vsub.s32 32, %v3393_v9  ;;  %v3398_v41 = vsub.s32 4294967266, %v3393_v9 }
 0x42f   : > { %v3732_v54 = vsel %vm3730_vm11, %v4606_v59, %v3731_v35  ;;  %v3004_v47 = vsel %vm3002_vm0, %v4610_v26, %v3003_v60  ;;  %v3007_v8 = vsel %vm3005_vm1, %v3006_v61, %v4612_v15  ;;  %vm3834_vm9 = vcmp.eq.s32.totalorder %v3832_v36, 0  ;;  %v9452_v45 = vpop.eup %4617  ;;  %v9877_v15 = vld [vmem:[#allocation27_spill] sm:$0xff] }
 0x430   : > { %vm3837_vm15 = vcmp.eq.s32.totalorder %v3832_v36, 2  ;;  %v3395_v24 = vshll.u32 %v9410_v46, %v3393_v9  ;;  %v3396_v40 = vshrl.u32 %v3378_v3, %v3394_v39  ;;  %v3399_v31 = vadd.s32 127, %v3398_v41  ;;  %v9455_v33 = vpop.eup %4619  ;;  %v9884_v41 = vld [vmem:[#allocation16_spill] sm:$0xff] }
 0x431   : > { %v2592_v0 = vsel %vm2585_vm5, %v2588_v5, %v2591_v1  ;;  %vm3001_vm7 = vcmp.lt.s32.totalorder %v3000_v12, 2  ;;  %v3836_v14 = vsel %vm3834_vm9, %v4614_v56, %v3835_v48  ;;  %v3839_v28 = vsel %vm3837_vm15, %v3838_v11, %v4616_v4 }
 0x432   : > { %v3736_v30 = vsel %vm3729_vm8, %v3732_v54, %v3735_v44  ;;  %v3008_v10 = vsel %vm3001_vm7, %v3004_v47, %v3007_v8  ;;  %v3397_v50 = vor.u32 %v3396_v40, %v3395_v24  ;;  %v3400_v62 = vshll.u32 %v3399_v31, 23  ;;  %v9885_v8 = vld [vmem:[#allocation15_spill] sm:$0xff] }
 0x433   : > { %v3529_v59 = vsel %vm3518_vm13, nan, %v3528_v55  ;;  %vm2582_vm6 = vweird.f32 %v9856_v25  ;;  %vm3726_vm11 = vweird.f32 %v9860_v43  ;;  %vm3833_vm10 = vcmp.lt.s32.totalorder %v3832_v36, 2  ;;  %v9472_v55 = vld [vmem:[#allocation5] sm:$0xff] }
 0x434   : > { %v2593_v46 = vsel %vm2582_vm6, nan, %v2592_v0  ;;  %vm2998_vm0 = vweird.f32 %v9865_v51  ;;  %v3840_v32 = vsel %vm3833_vm10, %v3836_v14, %v3839_v28  ;;  %v3401_v20 = vor.u32 4788187, %v3400_v62  ;;  %v9887_v62 = vld [vmem:[#allocation26_spill] sm:$0xff] }
 0x435   : > { %v3871_v13 = vmul.f32 %v9464_v52, %v9438_v42  ;;  %v3311_v57 = vadd.s32 3, %v3307_v7  ;;  %v3737_v26 = vsel %vm3726_vm11, nan, %v3736_v30  ;;  %v3009_v25 = vsel %vm2998_vm0, nan, %v3008_v10 }
 0x436   : > { %v3870_v43 = vmul.f32 %v9472_v55, %v3529_v59  ;;  %vm3830_vm5 = vweird.f32 %v9027_v27  ;;  %v3402_v51 = vand.u32 2147483647, %v3401_v20  ;;  %v3404_v6 = vcvt.s32.f32 %v3397_v50  ;;  %v9888_v20 = vld [vmem:[#allocation21_spill] sm:$0xff] }
 0x437   : > { %v9878_v34 = vxor.u32 2147483648, %v9877_v15  ;;  %v9880_v23 = vxor.u32 2147483648, %v9879_v53  ;;  %v3861_v7 = vmul.f32 %v9132_v21, %v2593_v46  ;;  %v3841_v12 = vsel %vm3830_vm5, nan, %v3840_v32 }
 0x438   : > { %vm3209_vm14 = vcmp.lt.s32.totalorder %v9876_v38, 2  ;;  %v3872_v27 = vmul.f32 %v9426_v2, %v3737_v26  ;;  %v3865_v17 = vmul.f32 %v9132_v21, %v3009_v25  ;;  %v3405_v56 = vmul.f32 %v3404_v6, %v3402_v51  ;;  %v9889_v26 = vld [vmem:[#allocation22_spill] sm:$0xff] }
 0x439   : > { %v3212_v42 = vsel %vm3210_vm3, %v9879_v53, %v9878_v34  ;;  %v3215_v37 = vsel %vm3213_vm4, %v9880_v23, %v9877_v15  ;;  %v3408_v4 = vsub.s32 4, %v9389_v16  ;;  %v3943_v19 = vsel %vm3874_vm2, %v9430_v58, 0.0 }
 0x43a   : > { %v3920_v35 = vadd.f32 %v9434_v18, %v9881_v29  ;;  %v3967_v60 = vsel %vm3874_vm2, %v3871_v13, 0.0  ;;  %v3312_v61 = vand.u32 3, %v3311_v57  ;;  %v3966_v36 = vsel %vm3874_vm2, %v3870_v43, 0.0  ;;  %v9890_v43 = vld [vmem:[#allocation17_spill] sm:$0xff] }
 0x43b   : > { %v3318_v5 = vxor.u32 2147483648, %v9452_v45  ;;  %v3873_v1 = vmul.f32 %v9132_v21, %v3841_v12  ;;  %v3406_v48 = vxor.u32 2147483648, %v3405_v56  ;;  %v3315_v11 = vxor.u32 2147483648, %v9455_v33 }
 0x43c   : > { %v3932_v9 = vsel %vm3874_vm2, %v3861_v7, 0.0  ;;  %vm9503_vm8 = vcmp.le.f32.partialorder %v3322_v22, 0.7853982  ;;  %vm3324_vm13 = vcmp.lt.s32.totalorder %v9166_v63, 0  ;;  %v3969_v18 = vsel %vm3874_vm2, %v3872_v27, 0.0 }
 0x43d   : > { %v3945_v44 = vsel %vm3874_vm2, %v3865_v17, 0.0  ;;  %v3407_v3 = vsel %vm3324_vm13, %v3406_v48, %v3405_v56  ;;  %v3409_v39 = vsel %vm3324_vm13, %v3408_v4, %v9389_v16  ;;  %v3944_v54 = vadd.f32 %v3943_v19, %v9884_v41  ;;  %v9886_v16 = vld [vmem:[#allocation19_spill] sm:$0xff] }
 0x43e   : > { %v3968_v47 = vadd.f32 %v3967_v60, %v3966_v36  ;;  %vm3314_vm12 = vcmp.eq.s32.totalorder %v3312_v61, 0  ;;  %v3410_v22 = vsel %vm9503_vm8, %v9166_v63, %v3407_v3  ;;  %vm3317_vm1 = vcmp.eq.s32.totalorder %v3312_v61, 2 }
 0x43f   : > { %v3933_v24 = vadd.f32 %v3932_v9, %v9885_v8  ;;  %v3971_v40 = vsel %vm3874_vm2, %v3873_v1, 0.0  ;;  %4621 = vcosq.f32 %v3410_v22  ;;  %v3946_v0 = vadd.f32 %v3945_v44, %v3944_v54 }
 0x440   : > { %v3970_v31 = vadd.f32 %v3969_v18, %v3968_v47  ;;  %v3411_v14 = vsel %vm9503_vm8, 0, %v3409_v39  ;;  %4623 = vsinq.f32 %v3410_v22  ;;  %v3882_v28 = vrot.slane %v9886_v16, 4 }
 0x441   : > { %v3921_v30 = vrot.slane %v3920_v35, 4  ;;  %v3316_v10 = vsel %vm3314_vm12, %v9452_v45, %v3315_v11  ;;  %v3319_v50 = vsel %vm3317_vm1, %v3318_v5, %v9455_v33  ;;  %v3908_v59 = vrot.slane %v9887_v62, 4  ;;  %v9891_v45 = vld [vmem:[#allocation20_spill] sm:$0xff] }
 0x442   : > { %v3216_v46 = vsel %vm3209_vm14, %v3212_v42, %v3215_v37  ;;  %v3972_v32 = vadd.f32 %v3971_v40, %v3970_v31  ;;  %vm3102_vm3 = vweird.f32 %v9888_v20  ;;  %vm3313_vm4 = vcmp.lt.s32.totalorder %v3312_v61, 2 }
 0x443   : > { %v3934_v13 = vrot.slane %v3933_v24, 4  ;;  %v3415_v57 = vadd.s32 3, %v3411_v14  ;;  %v3113_v25 = vsel %vm3102_vm3, nan, %v9889_v26  ;;  %vm3206_vm9 = vweird.f32 %v9890_v43 }
 0x444   : > { %v3320_v51 = vsel %vm3313_vm4, %v3316_v10, %v3319_v50  ;;  %v3947_v6 = vrot.slane %v3946_v0, 4  ;;  %v3897_v15 = vrot.slane %v9891_v45, 2  ;;  %v3883_v33 = vadd.f32 %v3882_v28, %v9886_v16 }
 0x445   : > { %v3217_v34 = vsel %vm3206_vm9, nan, %v3216_v46  ;;  %v3922_v53 = vadd.f32 %v3921_v30, %v3920_v35  ;;  %v3909_v38 = vadd.f32 %v3908_v59, %v9887_v62  ;;  %vm3310_vm15 = vweird.f32 %v9866_v49  ;;  %v4279_v62 = vld [vmem:[%s9600_s4] ss:$0 sm:$0xff] }
 0x446   : > { %v3973_v42 = vrot.slane %v3972_v32, 4  ;;  %v3866_v23 = vmul.f32 %v9472_v55, %v3113_v25  ;;  %v3321_v37 = vsel %vm3310_vm15, nan, %v3320_v51  ;;  %v3935_v7 = vadd.f32 %v3934_v13, %v3933_v24 }
 0x447   : > { %v3416_v12 = vand.u32 3, %v3415_v57  ;;  %v3867_v27 = vmul.f32 %v9464_v52, %v3217_v34  ;;  %v3948_v17 = vadd.f32 %v3947_v6, %v3946_v0  ;;  %v3898_v4 = vadd.f32 %v3897_v15, %v9891_v45 }
 0x448   : > { %v3884_v19 = vrot.slane %v3883_v33, 2  ;;  %v3923_v29 = vrot.slane %v3922_v53, 2  ;;  %v3910_v35 = vrot.slane %v3909_v38, 2  ;;  %v3868_v61 = vmul.f32 %v9426_v2, %v3321_v37 }
 0x449   : > { %v4622_v56 = vpop.eup %4621  ;;  %v3974_v49 = vadd.f32 %v3973_v42, %v3972_v32  ;;  %v3953_v5 = vsel %vm3874_vm2, %v3866_v23, 0.0  ;;  %v3936_v55 = vrot.slane %v3935_v7, 2  ;;  %vm3421_vm7 = vcmp.eq.s32.totalorder %v3416_v12, 2 }
 0x44a   : > { %v4624_v60 = vpop.eup %4623  ;;  %v3422_v36 = vxor.u32 2147483648, %v4622_v56  ;;  %v3954_v48 = vsel %vm3874_vm2, %v3867_v27, 0.0  ;;  %v3949_v52 = vrot.slane %v3948_v17, 2  ;;  %vm3418_vm6 = vcmp.eq.s32.totalorder %v3416_v12, 0 }
 0x44b   : > { %v3419_v1 = vxor.u32 2147483648, %v4624_v60  ;;  %v3885_v9 = vadd.f32 %v3884_v19, %v3883_v33  ;;  %v3924_v58 = vadd.f32 %v3923_v29, %v3922_v53  ;;  %vm3417_vm11 = vcmp.lt.s32.totalorder %v3416_v12, 2 }
 0x44c   : > { %v3423_v11 = vsel %vm3421_vm7, %v3422_v36, %v4624_v60  ;;  %v3956_v44 = vsel %vm3874_vm2, %v3868_v61, 0.0  ;;  %vm3414_vm10 = vweird.f32 %v9166_v63  ;;  %v3975_v3 = vrot.slane %v3974_v49, 2 }
 0x44d   : > { %v3420_v18 = vsel %vm3418_vm6, %v4622_v56, %v3419_v1  ;;  %v3911_v39 = vadd.f32 %v3910_v35, %v3909_v38  ;;  %v3955_v41 = vadd.f32 %v3954_v48, %v3953_v5  ;;  %v3937_v54 = vadd.f32 %v3936_v55, %v3935_v7 }
 0x44e   : > { %v3424_v2 = vsel %vm3417_vm11, %v3420_v18, %v3423_v11  ;;  %v3899_v22 = vrot.slane %v3898_v4, 1  ;;  %v3950_v24 = vadd.f32 %v3949_v52, %v3948_v17  ;;  %v3886_v31 = vrot.slane %v3885_v9, 1 }
 0x44f   : > { %v3425_v47 = vsel %vm3414_vm10, nan, %v3424_v2  ;;  %v3957_v40 = vadd.f32 %v3956_v44, %v3955_v41  ;;  %v3925_v0 = vrot.slane %v3924_v58, 1  ;;  %v3976_v16 = vadd.f32 %v3975_v3, %v3974_v49 }
 0x450   : > { %v3869_v8 = vmul.f32 %v9132_v21, %v3425_v47  ;;  %v3912_v28 = vrot.slane %v3911_v39, 1  ;;  %v3938_v10 = vrot.slane %v3937_v54, 1  ;;  %v3900_v63 = vadd.f32 %v3899_v22, %v3898_v4 }
 0x451   : > { %v3951_v50 = vrot.slane %v3950_v24, 1  ;;  %v3887_v46 = vadd.f32 %v3886_v31, %v3885_v9  ;;  %v3926_v32 = vadd.f32 %v3925_v0, %v3924_v58  ;;  %v3977_v21 = vrot.slane %v3976_v16, 1 }
 0x452   : > { %v3958_v14 = vsel %vm3874_vm2, %v3869_v8, 0.0  ;;  %v3913_v20 = vadd.f32 %v3912_v28, %v3911_v39  ;;  %v3939_v57 = vadd.f32 %v3938_v10, %v3937_v54  ;;  %v3986_v26 = vadd.f32 %v4279_v62, %v3900_v63 }
 0x453   : > { %v3959_v30 = vadd.f32 %v3958_v14, %v3957_v40  ;;  %v3952_v25 = vadd.f32 %v3951_v50, %v3950_v24  ;;  %v3978_v51 = vadd.f32 %v3977_v21, %v3976_v16  ;;  %v3985_v6 = vadd.f32 %v4279_v62, %v3887_v46 }
 0x454   : > { %v3988_v45 = vadd.f32 %v4279_v62, %v3926_v32  ;;  %v3987_v33 = vadd.f32 %v4279_v62, %v3913_v20  ;;  %v3989_v34 = vadd.f32 %v4279_v62, %v3939_v57  ;;  %vm4002_vm0 = vcmask 1041409  }
 0x455   : > { %v3960_v59 = vrot.slane %v3959_v30, 4  ;;  %v3990_v53 = vadd.f32 %v4279_v62, %v3952_v25  ;;  %v4001_v38 = vrot.slane %v3986_v26, 7  ;;  %v3992_v23 = vadd.f32 %v4279_v62, %v3978_v51 }
 0x456   : > { %vm4005_vm5 = vcmask 1042434   ;;  %v4007_v7 = vrot.slane %v3988_v45, 5  ;;  %v4004_v27 = vrot.slane %v3987_v33, 6  ;;  %vm4008_vm14 = vcmask 1043459  }
 0x457   : > { %v3961_v13 = vadd.f32 %v3960_v59, %v3959_v30  ;;  %v4003_v37 = vsel %vm4002_vm0, %v4001_v38, %v3985_v6  ;;  %v4010_v17 = vrot.slane %v3989_v34, 4  ;;  %vm4011_vm8 = vcmask 1044484  }
 0x458   : > { %v4013_v56 = vrot.slane %v3990_v53, 3  ;;  %v4006_v19 = vsel %vm4005_vm5, %v4004_v27, %v4003_v37  ;;  %vm4014_vm13 = vcmask 1045509   ;;  %vm4017_vm12 = vcmask 1046534  }
 0x459   : > { %v3962_v43 = vrot.slane %v3961_v13, 2  ;;  %v4009_v29 = vsel %vm4008_vm14, %v4007_v7, %v4006_v19  ;;  %v4019_v60 = vrot.slane %v3992_v23, 1  ;;  %vm4020_vm1 = vcmask 1047559  }
 0x45a   : > { %v4012_v35 = vsel %vm4011_vm8, %v4010_v17, %v4009_v29 }
 0x45b   : > { %v3963_v15 = vadd.f32 %v3962_v43, %v3961_v13  ;;  %v4015_v36 = vsel %vm4014_vm13, %v4013_v56, %v4012_v35 }
 0x45d   : > { %v3964_v42 = vrot.slane %v3963_v15, 1 }
 0x45f   : > { %v3965_v12 = vadd.f32 %v3964_v42, %v3963_v15 }
 0x461   : > { %v3991_v4 = vadd.f32 %v4279_v62, %v3965_v12 }
 0x463   : > { %v4016_v61 = vrot.slane %v3991_v4, 2 }
 0x465   : > { %v4018_v49 = vsel %vm4017_vm12, %v4016_v61, %v4015_v36 }
 0x466   : > { %v4021_v5 = vsel %vm4020_vm1, %v4019_v60, %v4018_v49 }
 0x467   : > { %4023 = vst.msk [vmem:[%s283_s13] sm:$0xff] %vm3874_vm2, %v4021_v5 }
 0x468   : > { %4785 = shalt.err (!%p4782_p4)
}
 0x469   : > { %s4786_s6 = scalar_lea.hbm %s9551_s8, 128  ;;  %s4790_s17 = scalar_lea.hbm %s9601_s5, 256 }
 0x46a   : > { %p4787_p0 = scmp.ne.s32.totalorder %s9551_s8, %s4786_s6  ;;  %p4791_p8 = scmp.lt.u32.totalorder %s9551_s8, %s9601_s5 }
 0x46b   : > { %p4792_p13 = scmp.lt.u32.totalorder %s4790_s17, %s4786_s6  ;;  %p4794_p10 = scmp.lt.u32.totalorder %s4786_s6, %s9551_s8 }
 0x46c   : > { %p4788_p9 = pnand %p4787_p0, %p5045_p5 }
 0x46d   : > { %p4793_p6 = por %p4792_p13, %p4791_p8 }
 0x46e   : > { %p4789_p11 = pneg %p4788_p9 }
 0x46f   : > { %p4795_p3 = por %p4794_p10, %p4793_p6 }
 0x471   : > { %p4796_p7 = pnand %p4795_p3, %p4789_p11 }
 0x473   : > { %4799 = shalt.err (!%p4796_p7)
}
 0x474   : > { %4426 = dma.vmem_to_hbm [thread:$0]  (%p5045_p5), %s9553_s15, 128, %s9551_s8, %s4025_s22  }
 0x475 PF: > { %s4050_s11 = sand.u32 1, %s4834_s18   ;;  %p9892_p12 = scmp.ne.s32.totalorder %s9682_s25, 0 }
 0x476   : > { %p9893_p1 = scmp.ge.s32.totalorder %s4846_s21, 2  ;;  %s4051_s13 = scalar_lea.sflag [#allocation4], %s4050_s11 }
 0x478   : > { %p4443_p2 = pnand %p9893_p1, %p9892_p12 }
 0x47a   : > { %4829 = dma.done.wait (!%p4443_p2), %s4051_s13, 128  }
 0x47b   : > { %4831 = vsyncadd (!%p4443_p2), %s4051_s13, 4294967168  ;;  %p20_p4 = scmp.ge.s32.totalorder %s5031_s14, 4   ;;  %s9894_s18 = smov %s4838_s19 }
 0x47c   : > { %s9895_s19 = smov %s4842_s20  ;;  %s9896_s20 = smov %s5041_s30 }
 0x47d   : > { %s9897_s21 = smov %s5031_s14  ;;  %22 = sbr.rel (!%p20_p4) target bundleno = 7 (0x7), region = 97 }
 0x484   :  { %4056 = vsyncpa [#allocation3], 1 }
 0x485   :  { %4058 = vsyncpa [#allocation3 + $0x1], 1 }
 0x486   :  { %4059 = vsyncpa [#allocation6], 1 }
 0x487   :  { %4060 = vsyncpa [#allocation9], 1 }
 0x488   :  { %4061 = vsyncpa [#allocation4], 1 }
 0x489   :  { %4063 = vsyncpa [#allocation4 + $0x1], 1 }

</bundles_post_ra>
